<compile_context>
chip_gen: v6e
topology: v6e:2x2x1
jax: 0.10.0
libtpu: 0.0.40
codegen_flags: <defaults>
</compile_context>

<pallas_src>
import functools

import jax
import jax.numpy as jnp
from jax.experimental import pallas as pl
from jax.experimental.pallas import tpu as pltpu


HID1, HID2, HID3 = 512, 256, 256


def _round_up(x, m):
    return ((x + m - 1) // m) * m


def _leaky_relu(v, slope=0.2):
    # max-form LeakyReLU: 2 VPU ops instead of cmp + mul + select.
    return jnp.maximum(v, slope * v)


def _device_kind():
    try:
        return jax.devices()[0].device_kind.lower()
    except Exception:
        return ""


def _default_bf16_elementwise():
    # bf16 VALU exists on v6e / v7x; older gens keep the f32 elementwise path.
    kind = _device_kind()
    return any(t in kind for t in ("v6", "v7", "7x"))


def _default_block_b():
    kind = _device_kind()
    if any(t in kind for t in ("v7", "7x")):
        return 1024      # 64 MiB VMEM per TC, and we want >=2 grid steps
    return 2048          # v5e / v6e: 128 MiB VMEM, bigger tiles amortize step cost


def _make_kernel(num_features, num_labels, has_emb, ew_dtype):
    """Fused 3-layer MLP + scalar output head."""
    F, L = num_features, num_labels
    bf16 = jnp.bfloat16

    def body(x_bf16, w1_ref, b1_ref, w2_ref, b2_ref, w3_ref, b3_ref,
             wo_ref, bo_ref, out_ref):
        h = jnp.dot(x_bf16, w1_ref[...], preferred_element_type=jnp.float32)
        h = _leaky_relu(h.astype(ew_dtype) + b1_ref[...])
        h = jnp.dot(h.astype(bf16), w2_ref[...],
                    preferred_element_type=jnp.float32)
        h = _leaky_relu(h.astype(ew_dtype) + b2_ref[...])
        h = jnp.dot(h.astype(bf16), w3_ref[...],
                    preferred_element_type=jnp.float32)
        h = _leaky_relu(h.astype(ew_dtype) + b3_ref[...])
        # 256 -> 1 head: VPU multiply + lane reduction (skip an N=1 matmul).
        out_ref[...] = ((h.astype(jnp.float32) * wo_ref[...])
                        .sum(axis=-1, keepdims=True) + bo_ref[...])

    if has_emb:
        def kernel(f_ref, e_ref, w1_ref, b1_ref, w2_ref, b2_ref,
                   w3_ref, b3_ref, wo_ref, bo_ref, out_ref, x_ref):
            # In-kernel lane concat via masked sub-tile stores into a VMEM
            # scratch: keeps the HBM concat eliminated while layer 1 is one
            # MXU pass over K = F + L.
            x_ref[:, 0:F] = f_ref[...]
            x_ref[:, F:F + L] = e_ref[...]
            body(x_ref[...].astype(bf16), w1_ref, b1_ref, w2_ref, b2_ref,
                 w3_ref, b3_ref, wo_ref, bo_ref, out_ref)
    else:
        def kernel(f_ref, w1_ref, b1_ref, w2_ref, b2_ref,
                   w3_ref, b3_ref, wo_ref, bo_ref, out_ref):
            body(f_ref[...].astype(bf16), w1_ref, b1_ref, w2_ref, b2_ref,
                 w3_ref, b3_ref, wo_ref, bo_ref, out_ref)

    return kernel


@functools.partial(
    jax.jit,
    static_argnames=("use_label_condition", "block_b", "bf16_elementwise"))
def _forward_impl(features, labels, params, *, use_label_condition,
                  block_b, bf16_elementwise):
    B, F = features.shape
    ew = jnp.bfloat16 if bf16_elementwise else jnp.float32
    has_emb = bool(use_label_condition)

    if has_emb:
        L = params["label_embedding"].shape[1]
        emb = params["label_embedding"][labels]          # [B, L] gather in JAX
        K1 = F + L
    else:
        L = 0
        emb = None
        K1 = F

    # ---- batch tiling -----------------------------------------------------
    block_b = max(256, _round_up(int(block_b), 256))     # keep (8,128)-aligned
    Bp = _round_up(B, 256)
    nblk = Bp // 256
    # Largest TB (multiple of 256, <= block_b) dividing Bp; prefer >=2 grid
    # steps so ("parallel",) can use both TensorCores on v7x.
    TB = 256
    for d in range(2 if nblk >= 2 else 1, nblk + 1):
        if nblk % d == 0 and (Bp // d) <= block_b:
            TB = Bp // d
            break
    if Bp != B:
        pad = ((0, Bp - B), (0, 0))
        features = jnp.pad(features, pad)
        if has_emb:
            emb = jnp.pad(emb, pad)
    grid = (Bp // TB,)

    act_spec = lambda d: pl.BlockSpec((TB, d), lambda i: (i, 0))
    res_spec = lambda r, c: pl.BlockSpec((r, c), lambda i: (0, 0))  # resident

    # Weights bf16 for the MXU; biases in the elementwise dtype; head f32.
    w1 = params["w1"].astype(jnp.bfloat16)
    w2 = params["w2"].astype(jnp.bfloat16)
    w3 = params["w3"].astype(jnp.bfloat16)
    b1 = params["b1"].astype(ew)
    b2 = params["b2"].astype(ew)
    b3 = params["b3"].astype(ew)
    wo = params["w_out"].astype(jnp.float32)
    bo = params["b_out"].astype(jnp.float32)

    operands = [features]
    in_specs = [act_spec(F)]
    if has_emb:
        operands.append(emb)
        in_specs.append(act_spec(L))
    operands += [w1, b1, w2, b2, w3, b3, wo, bo]
    in_specs += [res_spec(K1, HID1), res_spec(1, HID1),
                 res_spec(HID1, HID2), res_spec(1, HID2),
                 res_spec(HID2, HID3), res_spec(1, HID3),
                 res_spec(1, HID3), res_spec(1, 1)]

    scratch_shapes = ([pltpu.VMEM((TB, K1), jnp.float32)] if has_emb else [])

    flops = 2 * Bp * (K1 * HID1 + HID1 * HID2 + HID2 * HID3 + HID3)
    bytes_accessed = int(Bp * K1 * 4
                         + 2 * (K1 * HID1 + HID1 * HID2 + HID2 * HID3)
                         + 4 * (HID1 + HID2 + HID3 + HID3 + 1)
                         + Bp * 4)
    cost = pl.CostEstimate(flops=flops, transcendentals=0,
                           bytes_accessed=bytes_accessed)

    kernel = _make_kernel(F, L, has_emb, ew)

    out = pl.pallas_call(
        kernel,
        out_shape=jax.ShapeDtypeStruct((Bp, 1), jnp.float32),
        grid=grid,
        in_specs=in_specs,
        out_specs=pl.BlockSpec((TB, 1), lambda i: (i, 0)),
        scratch_shapes=scratch_shapes,
        compiler_params=pltpu.CompilerParams(
            dimension_semantics=("parallel",),
            # well under physical VMEM on every gen (64 MiB on v7x):
            # ~0.5 MiB resident weights + streamed tiles + intermediates.
            vmem_limit_bytes=32 << 20,
        ),
        cost_estimate=cost,
    )(*operands)

    return out[:B]                                        # validity: [B, 1]


def discriminator_big_forward(features, labels=None, params=None, *,
                              use_label_condition=True, block_b=None,
                              bf16_elementwise=None):
    """Forward pass matching DiscriminatorBig.forward (use_class_head=False)."""
    if use_label_condition and labels is None:
        raise ValueError("labels required when use_label_condition=True")
    if block_b is None:
        block_b = _default_block_b()
    if bf16_elementwise is None:
        bf16_elementwise = _default_bf16_elementwise()
    if not use_label_condition:
        labels = None
    return _forward_impl(features, labels, params,
                         use_label_condition=bool(use_label_condition),
                         block_b=int(block_b),
                         bf16_elementwise=bool(bf16_elementwise))


def init_params(key, num_features, num_labels, use_label_condition=True):
    """Deterministic synthetic params (shapes match nn.Module __init__)."""
    ks = jax.random.split(key, 9)
    input_size = num_features + (num_labels if use_label_condition else 0)

    def lin_w(kw, fan_in, fan_out):
        s = 1.0 / jnp.sqrt(jnp.float32(fan_in))
        return jax.random.uniform(kw, (fan_in, fan_out), jnp.float32, -s, s)

    params = {
        "w1": lin_w(ks[1], input_size, HID1).astype(jnp.bfloat16),
        "b1": jax.random.uniform(ks[2], (1, HID1), jnp.float32, -0.05, 0.05),
        "w2": lin_w(ks[3], HID1, HID2).astype(jnp.bfloat16),
        "b2": jax.random.uniform(ks[4], (1, HID2), jnp.float32, -0.05, 0.05),
        "w3": lin_w(ks[5], HID2, HID3).astype(jnp.bfloat16),
        "b3": jax.random.uniform(ks[6], (1, HID3), jnp.float32, -0.05, 0.05),
        # output head stays f32 as a row vector (used on the VPU, not the MXU)
        "w_out": lin_w(ks[7], HID3, 1).reshape(1, HID3),
        "b_out": jax.random.uniform(ks[8], (1, 1), jnp.float32, -0.05, 0.05),
    }
    if use_label_condition:
        params["label_embedding"] = jax.random.normal(
            ks[0], (num_labels, num_labels), jnp.float32)
    return params


def reference_forward(features, labels, params, *, use_label_condition=True,
                      bf16_elementwise=True):
    """Pure-JAX reference mirroring the kernel's dtype path."""
    bf16 = jnp.bfloat16
    ew = bf16 if bf16_elementwise else jnp.float32
    if use_label_condition:
        emb = params["label_embedding"][labels]
        x = jnp.concatenate([features, emb], axis=-1)
    else:
        x = features
    h = jnp.dot(x.astype(bf16), params["w1"].astype(bf16),
                preferred_element_type=jnp.float32)
    h = _leaky_relu(h.astype(ew) + params["b1"].astype(ew))
    h = jnp.dot(h.astype(bf16), params["w2"].astype(bf16),
                preferred_element_type=jnp.float32)
    h = _leaky_relu(h.astype(ew) + params["b2"].astype(ew))
    h = jnp.dot(h.astype(bf16), params["w3"].astype(bf16),
                preferred_element_type=jnp.float32)
    h = _leaky_relu(h.astype(ew) + params["b3"].astype(ew))
    return ((h.astype(jnp.float32) * params["w_out"]).sum(-1, keepdims=True)
            + params["b_out"])


if __name__ == "__main__":
    num_features = 32
    num_labels = 8
    batch = 64            # small demo batch; wrapper pads to an aligned tile

    key = jax.random.PRNGKey(0)
    k_params, k_feat, k_lab = jax.random.split(key, 3)

    params = init_params(k_params, num_features, num_labels)
    features = jax.random.normal(k_feat, (batch, num_features), jnp.float32)
    labels = jax.random.randint(k_lab, (batch,), 0, num_labels, jnp.int32)

    bf16_ew = _default_bf16_elementwise()
    validity = discriminator_big_forward(features, labels, params,
                                         bf16_elementwise=bf16_ew)
    validity = jax.block_until_ready(validity)
    assert validity.shape == (batch, 1)

    ref = reference_forward(features, labels, params, bf16_elementwise=bf16_ew)
    assert jnp.allclose(validity, ref, atol=2e-2, rtol=2e-2), \
        "mismatch vs reference"

    print("KERNEL_OK")
</pallas_src>

<mosaic_0001>
module attributes {stable_mosaic.version = 11 : i64} {
  func.func @kernel(%arg0: i32, %arg1: memref<256x32xf32, #tpu.memory_space<vmem>>, %arg2: memref<256x8xf32, #tpu.memory_space<vmem>>, %arg3: memref<40x512xbf16, #tpu.memory_space<vmem>>, %arg4: memref<1x512xf32, #tpu.memory_space<vmem>>, %arg5: memref<512x256xbf16, #tpu.memory_space<vmem>>, %arg6: memref<1x256xf32, #tpu.memory_space<vmem>>, %arg7: memref<256x256xbf16, #tpu.memory_space<vmem>>, %arg8: memref<1x256xf32, #tpu.memory_space<vmem>>, %arg9: memref<1x256xf32, #tpu.memory_space<vmem>>, %arg10: memref<1x1xf32, #tpu.memory_space<vmem>>, %arg11: memref<256x1xf32, #tpu.memory_space<vmem>>, %arg12: memref<256x40xf32, #tpu.memory_space<vmem>>) attributes {dimension_semantics = [#tpu.dimension_semantics<parallel>], iteration_bounds = array<i64: 1>, scalar_prefetch = 0 : i64, scratch_operands = 1 : i64, tpu.core_type = #tpu.core_type<tc>, window_params = [{transform_indices = @transform_0, window_bounds = array<i64: 256, 32>}, {transform_indices = @transform_1, window_bounds = array<i64: 256, 8>}, {pipeline_mode = #tpu.pipeline_mode<synchronous>, transform_indices = @transform_2, window_bounds = array<i64: 40, 512>}, {pipeline_mode = #tpu.pipeline_mode<synchronous>, transform_indices = @transform_3, window_bounds = array<i64: 1, 512>}, {pipeline_mode = #tpu.pipeline_mode<synchronous>, transform_indices = @transform_4, window_bounds = array<i64: 512, 256>}, {pipeline_mode = #tpu.pipeline_mode<synchronous>, transform_indices = @transform_5, window_bounds = array<i64: 1, 256>}, {pipeline_mode = #tpu.pipeline_mode<synchronous>, transform_indices = @transform_6, window_bounds = array<i64: 256, 256>}, {pipeline_mode = #tpu.pipeline_mode<synchronous>, transform_indices = @transform_7, window_bounds = array<i64: 1, 256>}, {pipeline_mode = #tpu.pipeline_mode<synchronous>, transform_indices = @transform_8, window_bounds = array<i64: 1, 256>}, {pipeline_mode = #tpu.pipeline_mode<synchronous>, transform_indices = @transform_9, window_bounds = array<i64: 1, 1>}, {transform_indices = @transform_10, window_bounds = array<i64: 256, 1>}]} {
    %c0 = arith.constant 0 : index
    %c0_0 = arith.constant 0 : index
    %0 = vector.load %arg1[%c0, %c0_0] : memref<256x32xf32, #tpu.memory_space<vmem>>, vector<256x32xf32>
    %c0_1 = arith.constant 0 : index
    %c0_2 = arith.constant 0 : index
    %1 = vector.load %arg12[%c0_1, %c0_2] : memref<256x40xf32, #tpu.memory_space<vmem>>, vector<256x32xf32>
    tpu.vector_store %arg12[%c0_1, %c0_2], %0 {strides = array<i32>} : memref<256x40xf32, #tpu.memory_space<vmem>>, vector<256x32xf32>,
    %c0_3 = arith.constant 0 : index
    %c0_4 = arith.constant 0 : index
    %2 = vector.load %arg2[%c0_3, %c0_4] : memref<256x8xf32, #tpu.memory_space<vmem>>, vector<256x8xf32>
    %c0_5 = arith.constant 0 : index
    %c32 = arith.constant 32 : index
    %3 = vector.load %arg12[%c0_5, %c32] : memref<256x40xf32, #tpu.memory_space<vmem>>, vector<256x8xf32>
    tpu.vector_store %arg12[%c0_5, %c32], %2 {strides = array<i32>} : memref<256x40xf32, #tpu.memory_space<vmem>>, vector<256x8xf32>,
    %c0_6 = arith.constant 0 : index
    %c0_7 = arith.constant 0 : index
    %4 = vector.load %arg12[%c0_6, %c0_7] : memref<256x40xf32, #tpu.memory_space<vmem>>, vector<256x40xf32>
    %5 = arith.truncf %4 : vector<256x40xf32> to vector<256x40xbf16>
    %c0_8 = arith.constant 0 : index
    %c0_9 = arith.constant 0 : index
    %6 = vector.load %arg3[%c0_8, %c0_9] : memref<40x512xbf16, #tpu.memory_space<vmem>>, vector<40x512xbf16>
    %cst = arith.constant dense<0.000000e+00> : vector<256x512xf32>
    %7 = tpu.matmul %5, %6, %cst {dimension_numbers = #tpu.dot_dimension_numbers<[1], [0], [0], [1], [0, 0, 1, 1], [], []>} : vector<256x40xbf16>, vector<40x512xbf16>, vector<256x512xf32> -> vector<256x512xf32>
    %c0_10 = arith.constant 0 : index
    %c0_11 = arith.constant 0 : index
    %8 = vector.load %arg4[%c0_10, %c0_11] : memref<1x512xf32, #tpu.memory_space<vmem>>, vector<1x512xf32>
    %9 = vector.broadcast %8 : vector<1x512xf32> to vector<256x512xf32>
    %10 = arith.addf %7, %9 : vector<256x512xf32>
    %cst_12 = arith.constant 2.000000e-01 : f32
    %11 = vector.broadcast %cst_12 : f32 to vector<256x512xf32>
    %12 = arith.mulf %11, %10 : vector<256x512xf32>
    %13 = arith.maximumf %10, %12 : vector<256x512xf32>
    %14 = arith.truncf %13 : vector<256x512xf32> to vector<256x512xbf16>
    %c0_13 = arith.constant 0 : index
    %c0_14 = arith.constant 0 : index
    %15 = vector.load %arg5[%c0_13, %c0_14] : memref<512x256xbf16, #tpu.memory_space<vmem>>, vector<512x256xbf16>
    %cst_15 = arith.constant dense<0.000000e+00> : vector<256x256xf32>
    %16 = tpu.matmul %14, %15, %cst_15 {dimension_numbers = #tpu.dot_dimension_numbers<[1], [0], [0], [1], [0, 0, 1, 1], [], []>} : vector<256x512xbf16>, vector<512x256xbf16>, vector<256x256xf32> -> vector<256x256xf32>
    %c0_16 = arith.constant 0 : index
    %c0_17 = arith.constant 0 : index
    %17 = vector.load %arg6[%c0_16, %c0_17] : memref<1x256xf32, #tpu.memory_space<vmem>>, vector<1x256xf32>
    %18 = vector.broadcast %17 : vector<1x256xf32> to vector<256x256xf32>
    %19 = arith.addf %16, %18 : vector<256x256xf32>
    %cst_18 = arith.constant 2.000000e-01 : f32
    %20 = vector.broadcast %cst_18 : f32 to vector<256x256xf32>
    %21 = arith.mulf %20, %19 : vector<256x256xf32>
    %22 = arith.maximumf %19, %21 : vector<256x256xf32>
    %23 = arith.truncf %22 : vector<256x256xf32> to vector<256x256xbf16>
    %c0_19 = arith.constant 0 : index
    %c0_20 = arith.constant 0 : index
    %24 = vector.load %arg7[%c0_19, %c0_20] : memref<256x256xbf16, #tpu.memory_space<vmem>>, vector<256x256xbf16>
    %cst_21 = arith.constant dense<0.000000e+00> : vector<256x256xf32>
    %25 = tpu.matmul %23, %24, %cst_21 {dimension_numbers = #tpu.dot_dimension_numbers<[1], [0], [0], [1], [0, 0, 1, 1], [], []>} : vector<256x256xbf16>, vector<256x256xbf16>, vector<256x256xf32> -> vector<256x256xf32>
    %c0_22 = arith.constant 0 : index
    %c0_23 = arith.constant 0 : index
    %26 = vector.load %arg8[%c0_22, %c0_23] : memref<1x256xf32, #tpu.memory_space<vmem>>, vector<1x256xf32>
    %27 = vector.broadcast %26 : vector<1x256xf32> to vector<256x256xf32>
    %28 = arith.addf %25, %27 : vector<256x256xf32>
    %cst_24 = arith.constant 2.000000e-01 : f32
    %29 = vector.broadcast %cst_24 : f32 to vector<256x256xf32>
    %30 = arith.mulf %29, %28 : vector<256x256xf32>
    %31 = arith.maximumf %28, %30 : vector<256x256xf32>
    %c0_25 = arith.constant 0 : index
    %c0_26 = arith.constant 0 : index
    %32 = vector.load %arg9[%c0_25, %c0_26] : memref<1x256xf32, #tpu.memory_space<vmem>>, vector<1x256xf32>
    %33 = vector.broadcast %32 : vector<1x256xf32> to vector<256x256xf32>
    %34 = arith.mulf %31, %33 : vector<256x256xf32>
    %cst_27 = arith.constant dense<0.000000e+00> : vector<256xf32>
    %35 = vector.multi_reduction <add>, %34, %cst_27 [1] : vector<256x256xf32> to vector<256xf32>
    %36 = vector.shape_cast %35 : vector<256xf32> to vector<256x1xf32>
    %c0_28 = arith.constant 0 : index
    %c0_29 = arith.constant 0 : index
    %37 = vector.load %arg10[%c0_28, %c0_29] : memref<1x1xf32, #tpu.memory_space<vmem>>, vector<1x1xf32>
    %38 = vector.broadcast %37 : vector<1x1xf32> to vector<256x1xf32>
    %39 = arith.addf %36, %38 : vector<256x1xf32>
    %c0_30 = arith.constant 0 : index
    %c0_31 = arith.constant 0 : index
    %40 = vector.load %arg11[%c0_30, %c0_31] : memref<256x1xf32, #tpu.memory_space<vmem>>, vector<256x1xf32>
    tpu.vector_store %arg11[%c0_30, %c0_31], %39 {strides = array<i32>} : memref<256x1xf32, #tpu.memory_space<vmem>>, vector<256x1xf32>,
    return
  }
  func.func @transform_0(%arg0: i32) -> (i32, i32) {
    %c0_i32 = arith.constant 0 : i32
    %c0_i32_0 = arith.constant 0 : i32
    return %arg0, %c0_i32 : i32, i32
  }
  func.func @transform_1(%arg0: i32) -> (i32, i32) {
    %c0_i32 = arith.constant 0 : i32
    %c0_i32_0 = arith.constant 0 : i32
    return %arg0, %c0_i32 : i32, i32
  }
  func.func @transform_2(%arg0: i32) -> (i32, i32) {
    %c0_i32 = arith.constant 0 : i32
    %c0_i32_0 = arith.constant 0 : i32
    %c0_i32_1 = arith.constant 0 : i32
    return %c0_i32, %c0_i32_0 : i32, i32
  }
  func.func @transform_3(%arg0: i32) -> (i32, i32) {
    %c0_i32 = arith.constant 0 : i32
    %c0_i32_0 = arith.constant 0 : i32
    %c0_i32_1 = arith.constant 0 : i32
    return %c0_i32, %c0_i32_0 : i32, i32
  }
  func.func @transform_4(%arg0: i32) -> (i32, i32) {
    %c0_i32 = arith.constant 0 : i32
    %c0_i32_0 = arith.constant 0 : i32
    %c0_i32_1 = arith.constant 0 : i32
    return %c0_i32, %c0_i32_0 : i32, i32
  }
  func.func @transform_5(%arg0: i32) -> (i32, i32) {
    %c0_i32 = arith.constant 0 : i32
    %c0_i32_0 = arith.constant 0 : i32
    %c0_i32_1 = arith.constant 0 : i32
    return %c0_i32, %c0_i32_0 : i32, i32
  }
  func.func @transform_6(%arg0: i32) -> (i32, i32) {
    %c0_i32 = arith.constant 0 : i32
    %c0_i32_0 = arith.constant 0 : i32
    %c0_i32_1 = arith.constant 0 : i32
    return %c0_i32, %c0_i32_0 : i32, i32
  }
  func.func @transform_7(%arg0: i32) -> (i32, i32) {
    %c0_i32 = arith.constant 0 : i32
    %c0_i32_0 = arith.constant 0 : i32
    %c0_i32_1 = arith.constant 0 : i32
    return %c0_i32, %c0_i32_0 : i32, i32
  }
  func.func @transform_8(%arg0: i32) -> (i32, i32) {
    %c0_i32 = arith.constant 0 : i32
    %c0_i32_0 = arith.constant 0 : i32
    %c0_i32_1 = arith.constant 0 : i32
    return %c0_i32, %c0_i32_0 : i32, i32
  }
  func.func @transform_9(%arg0: i32) -> (i32, i32) {
    %c0_i32 = arith.constant 0 : i32
    %c0_i32_0 = arith.constant 0 : i32
    %c0_i32_1 = arith.constant 0 : i32
    return %c0_i32, %c0_i32_0 : i32, i32
  }
  func.func @transform_10(%arg0: i32) -> (i32, i32) {
    %c0_i32 = arith.constant 0 : i32
    %c0_i32_0 = arith.constant 0 : i32
    return %arg0, %c0_i32 : i32, i32
  }
}

</mosaic_0001>

<bundles_post_ra>
// kernel: _forward_impl.1
= control target key start
LH: loop header
LB: loop body
LE: loop exit
PB: predicated region body
PF: predicated region fallthrough
CT: control target
= control target key end

     0   :  { %s3220_s17 = smov 32   ;;  %v3221_v4 = vmov 0   ;;  %vm70_vm0 = vcmask 261120   ;;  %vm475_vm1 = vcmask 1043456   ;;  %vm263_vm2 = vcmask 326912   ;;  %s4823_s1 = inlined_call_operand.vmem [shape: f32[256,8], index: 1, kind: input, shape index: {}]   ;;  %s4824_s0 = inlined_call_operand.vmem [shape: f32[256,32], index: 0, kind: input, shape index: {}]   ;;  %s4825_s2 = inlined_call_operand.vmem [shape: bf16[40,512], index: 2, kind: input, shape index: {}]   ;;  %s4826_s4 = inlined_call_operand.vmem [shape: bf16[512,256], index: 4, kind: input, shape index: {}]   ;;  %s4827_s3 = inlined_call_operand.vmem [shape: f32[1,512], index: 3, kind: input, shape index: {}]   ;;  %s4828_s6 = inlined_call_operand.vmem [shape: bf16[256,256], index: 6, kind: input, shape index: {}]   ;;  %s4829_s5 = inlined_call_operand.vmem [shape: f32[1,256], index: 5, kind: input, shape index: {}]   ;;  %s4830_s7 = inlined_call_operand.vmem [shape: f32[1,256], index: 7, kind: input, shape index: {}]   ;;  %s4831_s8 = inlined_call_operand.vmem [shape: f32[1,256], index: 8, kind: input, shape index: {}]   ;;  %s4832_s9 = inlined_call_operand.<no memory space> [shape: f32[1,1], index: 9, kind: input, shape index: {}]   ;;  %s4833_s10 = inlined_call_operand.vmem [shape: f32[256,1], index: 10, kind: output, shape index: {}]  }
   0x1   :  { %v121_v0 = vld [vmem:[%s4823_s1 + $0x90] sm:$0xff]  ;;  %v119_v1 = vld [vmem:[%s4823_s1 + $0x80] sm:$0xff]  ;;  %v122_v2 = vld [vmem:[%s4823_s1 + $0x98] sm:$0xff]  ;;  %600 = vmatprep.mubr.bf16.mxu1 %v3221_v4  ;;  %520 = vmatprep.mubr.bf16.mxu0 %v3221_v4  ;;  %vm426_vm3 = vcmask 326656   ;;  %vm2872_vm4 = vcmask 7168  }
   0x2   :  { %203 = vrot.lane.b32.xlu1 %v121_v0, %s3220_s17  ;;  %199 = vrot.lane.b32.xlu0 %v119_v1, %s3220_s17  ;;  %v120_v3 = vld [vmem:[%s4823_s1 + $0x88] sm:$0xff]  ;;  %v123_v6 = vld [vmem:[%s4823_s1 + $0xa0] sm:$0xff] }
   0x3   :  { %v124_v5 = vld [vmem:[%s4823_s1 + $0xa8] sm:$0xff]  ;;  %v126_v7 = vld [vmem:[%s4823_s1 + $0xb8] sm:$0xff]  ;;  %v125_v8 = vld [vmem:[%s4823_s1 + $0xb0] sm:$0xff] }
   0x4   :  { %v56_v9 = vld [vmem:[%s4824_s0 + $0x90] sm:$0xff]  ;;  %v128_v10 = vld [vmem:[%s4823_s1 + $0xc8] sm:$0xff]  ;;  %v54_v11 = vld [vmem:[%s4824_s0 + $0x80] sm:$0xff] }
   0x5   :  { %89 = vst.msk [vmem:[#allocation2 + $0x90] sm:$0xff] %vm70_vm0, %v56_v9  ;;  %v352_v12 = vld [vmem:[%s4825_s2 + $0x40] sm:$0xff]  ;;  %v57_v13 = vld [vmem:[%s4824_s0 + $0x98] sm:$0xff]  ;;  %87 = vst.msk [vmem:[#allocation2 + $0x80] sm:$0xff] %vm70_vm0, %v54_v11 }
   0x6   :  { %205 = vrot.lane.b32.xlu1 %v122_v2, %s3220_s17  ;;  %201 = vrot.lane.b32.xlu0 %v120_v3, %s3220_s17  ;;  %v2918_v14 = vcombine.high %v352_v12, %v352_v12  ;;  %v2917_v15 = vcombine.low %v352_v12, %v352_v12  ;;  %90 = vst.msk [vmem:[#allocation2 + $0x98] sm:$0xff] %vm70_vm0, %v57_v13  ;;  %v55_v16 = vld [vmem:[%s4824_s0 + $0x88] sm:$0xff]  ;;  %v127_v17 = vld [vmem:[%s4823_s1 + $0xc0] sm:$0xff] }
   0x7   :  { %88 = vst.msk [vmem:[#allocation2 + $0x88] sm:$0xff] %vm70_vm0, %v55_v16  ;;  %v3062_v18 = vld [vmem:[%s4825_s2 + $0x24] ss:$16 sps:$4 sm:$0xff]   ;;  %v59_v20 = vld [vmem:[%s4824_s0 + $0xa8] sm:$0xff]  ;;  %v130_v22 = vld [vmem:[%s4823_s1 + $0xd8] sm:$0xff] }
   0x8   :  { %3052 = vmatprep.subr.msk.bf16.mxu1 %vm475_vm1, %v2918_v14  ;;  %v477_v19 = vsel %vm475_vm1, %v2917_v15, 0  ;;  %v58_v21 = vld [vmem:[%s4824_s0 + $0xa0] sm:$0xff]  ;;  %2921 = vmatprep.subr.msk.bf16.mxu0 %vm475_vm1, %v2918_v14  ;;  %v129_v23 = vld [vmem:[%s4823_s1 + $0xd0] sm:$0xff]  ;;  %92 = vst.msk [vmem:[#allocation2 + $0xa8] sm:$0xff] %vm70_vm0, %v59_v20  ;;  %v61_v26 = vld [vmem:[%s4824_s0 + $0xb8] sm:$0xff] }
   0x9   :  { %3055 = vmatpush1.bf16.msra.mxu1 %v477_v19  ;;  %v3064_v24 = vld [vmem:[%s4825_s2 + $0x20] ss:$16 sps:$4 sm:$0xff]   ;;  %91 = vst.msk [vmem:[#allocation2 + $0xa0] sm:$0xff] %vm70_vm0, %v58_v21  ;;  %v3065_v25 = vld [vmem:[%s4825_s2 + $0x4] ss:$16 sps:$4 sm:$0xff]   ;;  %499 = vmatpush1.bf16.msra.mxu0 %v477_v19  ;;  %94 = vst.msk [vmem:[#allocation2 + $0xb8] sm:$0xff] %vm70_vm0, %v61_v26 }
   0xa   :  { %209 = vrot.lane.b32.xlu1 %v124_v5, %s3220_s17  ;;  %207 = vrot.lane.b32.xlu0 %v123_v6, %s3220_s17  ;;  %v60_v27 = vld [vmem:[%s4824_s0 + $0xb0] sm:$0xff]  ;;  %v353_v29 = vld [vmem:[%s4825_s2 + $0x48] sm:$0xff] }
   0xb   :  { %3053 = vmatprep.subr.bf16.mxu1 %v3062_v18  ;;  %v3067_v28 = vld [vmem:[%s4825_s2] ss:$16 sps:$4 sm:$0xff]   ;;  %93 = vst.msk [vmem:[#allocation2 + $0xb0] sm:$0xff] %vm70_vm0, %v60_v27  ;;  %v63_v30 = vld [vmem:[%s4824_s0 + $0xc8] sm:$0xff]  ;;  %500 = vmatprep.subr.bf16.mxu0 %v3062_v18  ;;  %v2919_v32 = vcombine.low %v353_v29, %v353_v29  ;;  %v65_v33 = vld [vmem:[%s4824_s0 + $0xd8] sm:$0xff]  ;;  %v2920_v44 = vcombine.high %v353_v29, %v353_v29 }
   0xc   :  { %v62_v31 = vld [vmem:[%s4824_s0 + $0xc0] sm:$0xff]  ;;  %96 = vst.msk [vmem:[#allocation2 + $0xc8] sm:$0xff] %vm70_vm0, %v63_v30  ;;  %v64_v34 = vld [vmem:[%s4824_s0 + $0xd0] sm:$0xff]  ;;  %v67_v35 = vld [vmem:[%s4824_s0 + $0xe8] sm:$0xff] }
   0xd   :  { %95 = vst.msk [vmem:[#allocation2 + $0xc0] sm:$0xff] %vm70_vm0, %v62_v31  ;;  %v132_v36 = vld [vmem:[%s4823_s1 + $0xe8] sm:$0xff]  ;;  %3056 = vmatpush1.bf16.msra.mxu1 %v3064_v24  ;;  %98 = vst.msk [vmem:[#allocation2 + $0xd8] sm:$0xff] %vm70_vm0, %v65_v33  ;;  %v66_v37 = vld [vmem:[%s4824_s0 + $0xe0] sm:$0xff]  ;;  %501 = vmatpush1.bf16.msra.mxu0 %v3064_v24  ;;  %v3413_v40 = vsel %vm475_vm1, %v2919_v32, 0 }
   0xe   :  { %213 = vrot.lane.b32.xlu1 %v126_v7, %s3220_s17  ;;  %211 = vrot.lane.b32.xlu0 %v125_v8, %s3220_s17  ;;  %97 = vst.msk [vmem:[#allocation2 + $0xd0] sm:$0xff] %vm70_vm0, %v64_v34  ;;  %100 = vst.msk [vmem:[#allocation2 + $0xe8] sm:$0xff] %vm70_vm0, %v67_v35  ;;  %v69_v38 = vld [vmem:[%s4824_s0 + $0xf8] sm:$0xff]  ;;  %v68_v39 = vld [vmem:[%s4824_s0 + $0xf0] sm:$0xff] }
   0xf   :  { %99 = vst.msk [vmem:[#allocation2 + $0xe0] sm:$0xff] %vm70_vm0, %v66_v37  ;;  %102 = vst.msk [vmem:[#allocation2 + $0xf8] sm:$0xff] %vm70_vm0, %v69_v38  ;;  %v39_v41 = vld [vmem:[%s4824_s0 + $0x8] sm:$0xff]  ;;  %v38_v42 = vld [vmem:[%s4824_s0] sm:$0xff]  ;;  %3054 = vmatprep.subr.bf16.mxu1 %v3065_v25  ;;  %502 = vmatprep.subr.bf16.mxu0 %v3065_v25 }
  0x10   :  { %101 = vst.msk [vmem:[#allocation2 + $0xf0] sm:$0xff] %vm70_vm0, %v68_v39  ;;  %v131_v43 = vld [vmem:[%s4823_s1 + $0xe0] sm:$0xff]  ;;  %72 = vst.msk [vmem:[#allocation2 + $0x8] sm:$0xff] %vm70_vm0, %v39_v41  ;;  %v134_v45 = vld [vmem:[%s4823_s1 + $0xf8] sm:$0xff] }
  0x11   :  { %71 = vst.msk [vmem:[#allocation2] sm:$0xff] %vm70_vm0, %v38_v42  ;;  %3057 = vmatpush1.bf16.msra.mxu1 %v3067_v28  ;;  %503 = vmatpush1.bf16.msra.mxu0 %v3067_v28  ;;  %v133_v46 = vld [vmem:[%s4823_s1 + $0xf0] sm:$0xff]  ;;  %v41_v47 = vld [vmem:[%s4824_s0 + $0x18] sm:$0xff]  ;;  %v104_v49 = vld [vmem:[%s4823_s1 + $0x8] sm:$0xff] }
  0x12   :  { %217 = vrot.lane.b32.xlu1 %v128_v10, %s3220_s17  ;;  %215 = vrot.lane.b32.xlu0 %v127_v17, %s3220_s17  ;;  %v40_v48 = vld [vmem:[%s4824_s0 + $0x10] sm:$0xff]  ;;  %74 = vst.msk [vmem:[#allocation2 + $0x18] sm:$0xff] %vm70_vm0, %v41_v47  ;;  %v103_v50 = vld [vmem:[%s4823_s1] sm:$0xff] }
  0x13   :  { %2938 = vmatprep.subr.msk.bf16.mxu1 %vm475_vm1, %v2920_v44  ;;  %73 = vst.msk [vmem:[#allocation2 + $0x10] sm:$0xff] %vm70_vm0, %v40_v48  ;;  %v106_v51 = vld [vmem:[%s4823_s1 + $0x18] sm:$0xff]  ;;  %v105_v52 = vld [vmem:[%s4823_s1 + $0x10] sm:$0xff]  ;;  %v43_v53 = vld [vmem:[%s4824_s0 + $0x28] sm:$0xff] }
  0x14   :  { %v42_v54 = vld [vmem:[%s4824_s0 + $0x20] sm:$0xff]  ;;  %76 = vst.msk [vmem:[#allocation2 + $0x28] sm:$0xff] %vm70_vm0, %v43_v53  ;;  %v108_v55 = vld [vmem:[%s4823_s1 + $0x28] sm:$0xff]  ;;  %v110_v57 = vld [vmem:[%s4823_s1 + $0x38] sm:$0xff] }
  0x15   :  { %75 = vst.msk [vmem:[#allocation2 + $0x20] sm:$0xff] %vm70_vm0, %v42_v54  ;;  %v107_v56 = vld [vmem:[%s4823_s1 + $0x20] sm:$0xff]  ;;  %v109_v58 = vld [vmem:[%s4823_s1 + $0x30] sm:$0xff]  ;;  %v45_v59 = vld [vmem:[%s4824_s0 + $0x38] sm:$0xff] }
  0x16   :  { %221 = vrot.lane.b32.xlu1 %v130_v22, %s3220_s17  ;;  %219 = vrot.lane.b32.xlu0 %v129_v23, %s3220_s17  ;;  %v44_v60 = vld [vmem:[%s4824_s0 + $0x30] sm:$0xff]  ;;  %78 = vst.msk [vmem:[#allocation2 + $0x38] sm:$0xff] %vm70_vm0, %v45_v59  ;;  %v112_v61 = vld [vmem:[%s4823_s1 + $0x48] sm:$0xff] }
  0x17   :  { %77 = vst.msk [vmem:[#allocation2 + $0x30] sm:$0xff] %vm70_vm0, %v44_v60  ;;  %v111_v62 = vld [vmem:[%s4823_s1 + $0x40] sm:$0xff]  ;;  %v114_v63 = vld [vmem:[%s4823_s1 + $0x58] sm:$0xff]  ;;  %v113_v0 = vld [vmem:[%s4823_s1 + $0x50] sm:$0xff] }
  0x18   :  { %v47_v1 = vld [vmem:[%s4824_s0 + $0x48] sm:$0xff]  ;;  %v46_v2 = vld [vmem:[%s4824_s0 + $0x40] sm:$0xff]  ;;  %v118_v6 = vld [vmem:[%s4823_s1 + $0x78] sm:$0xff] }
  0x19   :  { %80 = vst.msk [vmem:[#allocation2 + $0x48] sm:$0xff] %vm70_vm0, %v47_v1  ;;  %79 = vst.msk [vmem:[#allocation2 + $0x40] sm:$0xff] %vm70_vm0, %v46_v2  ;;  %v116_v3 = vld [vmem:[%s4823_s1 + $0x68] sm:$0xff]  ;;  %v115_v5 = vld [vmem:[%s4823_s1 + $0x60] sm:$0xff] }
  0x1a   :  { %225 = vrot.lane.b32.xlu1 %v132_v36, %s3220_s17  ;;  %223 = vrot.lane.b32.xlu0 %v131_v43, %s3220_s17  ;;  %v117_v7 = vld [vmem:[%s4823_s1 + $0x70] sm:$0xff]  ;;  %v49_v8 = vld [vmem:[%s4824_s0 + $0x58] sm:$0xff] }
  0x1b   :  { %v48_v9 = vld [vmem:[%s4824_s0 + $0x50] sm:$0xff]  ;;  %82 = vst.msk [vmem:[#allocation2 + $0x58] sm:$0xff] %vm70_vm0, %v49_v8  ;;  %v51_v10 = vld [vmem:[%s4824_s0 + $0x68] sm:$0xff]  ;;  %v50_v11 = vld [vmem:[%s4824_s0 + $0x60] sm:$0xff] }
  0x1c   :  { %81 = vst.msk [vmem:[#allocation2 + $0x50] sm:$0xff] %vm70_vm0, %v48_v9  ;;  %84 = vst.msk [vmem:[#allocation2 + $0x68] sm:$0xff] %vm70_vm0, %v51_v10  ;;  %v53_v12 = vld [vmem:[%s4824_s0 + $0x78] sm:$0xff]  ;;  %v52_v13 = vld [vmem:[%s4824_s0 + $0x70] sm:$0xff] }
  0x1d   :  { %83 = vst.msk [vmem:[#allocation2 + $0x60] sm:$0xff] %vm70_vm0, %v50_v11  ;;  %86 = vst.msk [vmem:[#allocation2 + $0x78] sm:$0xff] %vm70_vm0, %v53_v12  ;;  %v3072_v25 = vld [vmem:[%s4825_s2 + $0x2c] ss:$16 sps:$4 sm:$0xff]   ;;  %v3070_v28 = vld [vmem:[%s4825_s2 + $0x28] ss:$16 sps:$4 sm:$0xff]  }
  0x1e   :  { %229 = vrot.lane.b32.xlu1 %v134_v45, %s3220_s17  ;;  %227 = vrot.lane.b32.xlu0 %v133_v46, %s3220_s17  ;;  %85 = vst.msk [vmem:[#allocation2 + $0x70] sm:$0xff] %vm70_vm0, %v52_v13  ;;  %v3075_v29 = vld [vmem:[%s4825_s2 + $0xc] ss:$16 sps:$4 sm:$0xff]   ;;  %v3073_v34 = vld [vmem:[%s4825_s2 + $0x8] ss:$16 sps:$4 sm:$0xff]  }
  0x1f   :  { %v3088_v11 = vld [vmem:[%s4826_s4 + $0x70] ss:$8 sps:$4 sm:$0xff]   ;;  %v3090_v12 = vld [vmem:[%s4826_s4 + $0x74] ss:$8 sps:$4 sm:$0xff]  }
  0x20   :  { %1590 = vmatprep.subr.bf16.mxu0 %v3090_v12  ;;  %v3133_v12 = vld [vmem:[%s4826_s4 + $0xd0] ss:$8 sps:$4 sm:$0xff]  }
  0x22   :  { %169 = vrot.lane.b32.xlu1 %v104_v49, %s3220_s17  ;;  %167 = vrot.lane.b32.xlu0 %v103_v50, %s3220_s17 }
  0x26   :  { %173 = vrot.lane.b32.xlu1 %v106_v51, %s3220_s17  ;;  %171 = vrot.lane.b32.xlu0 %v105_v52, %s3220_s17 }
  0x2a   :  { %177 = vrot.lane.b32.xlu1 %v108_v55, %s3220_s17  ;;  %175 = vrot.lane.b32.xlu0 %v107_v56, %s3220_s17 }
  0x2e   :  { %181 = vrot.lane.b32.xlu1 %v110_v57, %s3220_s17  ;;  %179 = vrot.lane.b32.xlu0 %v109_v58, %s3220_s17 }
  0x32   :  { %185 = vrot.lane.b32.xlu1 %v112_v61, %s3220_s17  ;;  %183 = vrot.lane.b32.xlu0 %v111_v62, %s3220_s17 }
  0x36   :  { %189 = vrot.lane.b32.xlu1 %v114_v63, %s3220_s17  ;;  %187 = vrot.lane.b32.xlu0 %v113_v0, %s3220_s17 }
  0x3a   :  { %193 = vrot.lane.b32.xlu1 %v116_v3, %s3220_s17  ;;  %191 = vrot.lane.b32.xlu0 %v115_v5, %s3220_s17 }
  0x3e   :  { %197 = vrot.lane.b32.xlu1 %v118_v6, %s3220_s17  ;;  %195 = vrot.lane.b32.xlu0 %v117_v7, %s3220_s17 }
  0x74   :  { %v204_v14 = vpop.permute.xlu1 %203  ;;  %v200_v15 = vpop.permute.xlu0 %199 }
  0x75   :  { %282 = vst.msk [vmem:[#allocation2 + $0x90] sm:$0xff] %vm263_vm2, %v204_v14  ;;  %280 = vst.msk [vmem:[#allocation2 + $0x80] sm:$0xff] %vm263_vm2, %v200_v15 }
  0x78   :  { %v206_v16 = vpop.permute.xlu1 %205  ;;  %v202_v17 = vpop.permute.xlu0 %201 }
  0x79   :  { %283 = vst.msk [vmem:[#allocation2 + $0x98] sm:$0xff] %vm263_vm2, %v206_v16  ;;  %281 = vst.msk [vmem:[#allocation2 + $0x88] sm:$0xff] %vm263_vm2, %v202_v17 }
  0x7c   :  { %v210_v18 = vpop.permute.xlu1 %209  ;;  %v208_v19 = vpop.permute.xlu0 %207  ;;  %v312_v22 = vld [vmem:[#allocation2 + $0x80] sm:$0xff]  ;;  %v314_v30 = vld [vmem:[#allocation2 + $0x90] sm:$0xff] }
  0x7d   :  { %285 = vst.msk [vmem:[#allocation2 + $0xa8] sm:$0xff] %vm263_vm2, %v210_v18  ;;  %284 = vst.msk [vmem:[#allocation2 + $0xa0] sm:$0xff] %vm263_vm2, %v208_v19 }
  0x80   :  { %v214_v20 = vpop.permute.xlu1 %213  ;;  %v212_v21 = vpop.permute.xlu0 %211  ;;  %v313_v23 = vld [vmem:[#allocation2 + $0x88] sm:$0xff]  ;;  %v315_v31 = vld [vmem:[#allocation2 + $0x98] sm:$0xff] }
  0x81   :  { %287 = vst.msk [vmem:[#allocation2 + $0xb8] sm:$0xff] %vm263_vm2, %v214_v20  ;;  %286 = vst.msk [vmem:[#allocation2 + $0xb0] sm:$0xff] %vm263_vm2, %v212_v21  ;;  %v3568_v24 = vpack.c.bf16 %v313_v23, %v312_v22  ;;  %v3590_v35 = vpack.c.bf16 %v315_v31, %v314_v30  ;;  %v3096_v22 = vld [vmem:[%s4826_s4 + $0x64] ss:$8 sps:$4 sm:$0xff]   ;;  %v3094_v23 = vld [vmem:[%s4826_s4 + $0x60] ss:$8 sps:$4 sm:$0xff]  }
  0x83   :  { %2930 = vmatmul.mubr.msk.bf16.vlgmr.msra.gmra.mxu1 %vm426_vm3, %v3568_v24 }
  0x84   :  { %692 = vmatpush1.bf16.msra.mxu1 %v3413_v40  ;;  %v218_v26 = vpop.permute.xlu1 %217  ;;  %v216_v27 = vpop.permute.xlu0 %215  ;;  %610 = vmatprep.mubr.bf16.mxu1 %v3221_v4  ;;  %v316_v38 = vld [vmem:[#allocation2 + $0xa0] sm:$0xff]  ;;  %v317_v39 = vld [vmem:[#allocation2 + $0xa8] sm:$0xff]  ;;  %v3078_v40 = vld [vmem:[%s4826_s4 + $0x174] ss:$8 sps:$4 sm:$0xff]  }
  0x85   :  { %289 = vst.msk [vmem:[#allocation2 + $0xc8] sm:$0xff] %vm263_vm2, %v218_v26  ;;  %288 = vst.msk [vmem:[#allocation2 + $0xc0] sm:$0xff] %vm263_vm2, %v216_v27  ;;  %693 = vmatprep.subr.bf16.mxu1 %v3072_v25  ;;  %v3600_v41 = vpack.c.bf16 %v317_v39, %v316_v38  ;;  %v3099_v26 = vld [vmem:[%s4826_s4 + $0x54] ss:$8 sps:$4 sm:$0xff]   ;;  %v3106_v38 = vld [vmem:[%s4826_s4 + $0x30] ss:$8 sps:$4 sm:$0xff]  }
  0x88   :  { %v222_v32 = vpop.permute.xlu1 %221  ;;  %v220_v33 = vpop.permute.xlu0 %219  ;;  %694 = vmatpush1.bf16.msra.mxu1 %v3070_v28  ;;  %v318_v46 = vld [vmem:[#allocation2 + $0xb0] sm:$0xff]  ;;  %v319_v47 = vld [vmem:[#allocation2 + $0xb8] sm:$0xff] }
  0x89   :  { %291 = vst.msk [vmem:[#allocation2 + $0xd8] sm:$0xff] %vm263_vm2, %v222_v32  ;;  %290 = vst.msk [vmem:[#allocation2 + $0xd0] sm:$0xff] %vm263_vm2, %v220_v33  ;;  %695 = vmatprep.subr.bf16.mxu1 %v3075_v29  ;;  %v3609_v48 = vpack.c.bf16 %v319_v47, %v318_v46  ;;  %v3097_v29 = vld [vmem:[%s4826_s4 + $0x50] ss:$8 sps:$4 sm:$0xff]   ;;  %v3105_v33 = vld [vmem:[%s4826_s4 + $0x44] ss:$8 sps:$4 sm:$0xff]  }
  0x8a   :  { %v3079_v47 = vld [vmem:[%s4826_s4 + $0x160] ss:$8 sps:$4 sm:$0xff]  }
  0x8b   :  { %2931 = vmatmul.mubr.msk.bf16.gmra.mxu1 %vm426_vm3, %v3590_v35 }
  0x8c   :  { %v226_v36 = vpop.permute.xlu1 %225  ;;  %v224_v37 = vpop.permute.xlu0 %223  ;;  %620 = vmatprep.mubr.bf16.mxu1 %v3221_v4  ;;  %696 = vmatpush1.bf16.msra.mxu1 %v3073_v34  ;;  %v320_v51 = vld [vmem:[#allocation2 + $0xc0] sm:$0xff]  ;;  %v321_v54 = vld [vmem:[#allocation2 + $0xc8] sm:$0xff] }
  0x8d   :  { %293 = vst.msk [vmem:[#allocation2 + $0xe8] sm:$0xff] %vm263_vm2, %v226_v36  ;;  %292 = vst.msk [vmem:[#allocation2 + $0xe0] sm:$0xff] %vm263_vm2, %v224_v37  ;;  %1783 = vmatprep.subr.bf16.mxu1 %v3078_v40  ;;  %v3622_v58 = vpack.c.bf16 %v321_v54, %v320_v51  ;;  %v3103_v34 = vld [vmem:[%s4826_s4 + $0x40] ss:$8 sps:$4 sm:$0xff]   ;;  %v3108_v37 = vld [vmem:[%s4826_s4 + $0x34] ss:$8 sps:$4 sm:$0xff]  }
  0x8e   :  { %v3115_v51 = vld [vmem:[%s4826_s4 + $0x10] ss:$8 sps:$4 sm:$0xff]  }
  0x8f   :  { %v3082_v54 = vld [vmem:[%s4826_s4 + $0x150] ss:$8 sps:$4 sm:$0xff]  }
  0x90   :  { %v230_v42 = vpop.permute.xlu1 %229  ;;  %v228_v43 = vpop.permute.xlu0 %227  ;;  %v322_v0 = vld [vmem:[#allocation2 + $0xd0] sm:$0xff]  ;;  %v323_v1 = vld [vmem:[#allocation2 + $0xd8] sm:$0xff] }
  0x91   :  { %295 = vst.msk [vmem:[#allocation2 + $0xf8] sm:$0xff] %vm263_vm2, %v230_v42  ;;  %294 = vst.msk [vmem:[#allocation2 + $0xf0] sm:$0xff] %vm263_vm2, %v228_v43  ;;  %v3636_v5 = vpack.c.bf16 %v323_v1, %v322_v0  ;;  %v3076_v42 = vld [vmem:[%s4826_s4 + $0x170] ss:$8 sps:$4 sm:$0xff]   ;;  %v3081_v43 = vld [vmem:[%s4826_s4 + $0x164] ss:$8 sps:$4 sm:$0xff]  }
  0x93   :  { %2932 = vmatmul.mubr.msk.bf16.gmra.mxu1 %vm426_vm3, %v3600_v41 }
  0x94   :  { %v170_v44 = vpop.permute.xlu1 %169  ;;  %v168_v45 = vpop.permute.xlu0 %167  ;;  %630 = vmatprep.mubr.bf16.mxu1 %v3221_v4  ;;  %v324_v13 = vld [vmem:[#allocation2 + $0xe0] sm:$0xff]  ;;  %v325_v14 = vld [vmem:[#allocation2 + $0xe8] sm:$0xff] }
  0x95   :  { %265 = vst.msk [vmem:[#allocation2 + $0x8] sm:$0xff] %vm263_vm2, %v170_v44  ;;  %264 = vst.msk [vmem:[#allocation2] sm:$0xff] %vm263_vm2, %v168_v45  ;;  %v3656_v17 = vpack.c.bf16 %v325_v14, %v324_v13  ;;  %v3114_v44 = vld [vmem:[%s4826_s4 + $0x24] ss:$8 sps:$4 sm:$0xff]   ;;  %v3112_v45 = vld [vmem:[%s4826_s4 + $0x20] ss:$8 sps:$4 sm:$0xff]  }
  0x96   :  { %v3109_v13 = vld [vmem:[%s4826_s4 + $0x110] ss:$8 sps:$4 sm:$0xff]   ;;  %v3120_v14 = vld [vmem:[%s4826_s4 + $0x104] ss:$8 sps:$4 sm:$0xff]  }
  0x98   :  { %v174_v49 = vpop.permute.xlu1 %173  ;;  %v172_v50 = vpop.permute.xlu0 %171  ;;  %v326_v27 = vld [vmem:[#allocation2 + $0xf0] sm:$0xff]  ;;  %v327_v28 = vld [vmem:[#allocation2 + $0xf8] sm:$0xff] }
  0x99   :  { %267 = vst.msk [vmem:[#allocation2 + $0x18] sm:$0xff] %vm263_vm2, %v174_v49  ;;  %266 = vst.msk [vmem:[#allocation2 + $0x10] sm:$0xff] %vm263_vm2, %v172_v50  ;;  %v3680_v30 = vpack.c.bf16 %v327_v28, %v326_v27  ;;  %v3084_v49 = vld [vmem:[%s4826_s4 + $0x154] ss:$8 sps:$4 sm:$0xff]   ;;  %v3136_v27 = vld [vmem:[%s4826_s4 + $0x1e0] ss:$8 sps:$4 sm:$0xff]  }
  0x9a   :  { %v3117_v50 = vld [vmem:[%s4826_s4 + $0x14] ss:$8 sps:$4 sm:$0xff]  }
  0x9b   :  { %2933 = vmatmul.mubr.msk.bf16.gmra.mxu1 %vm426_vm3, %v3609_v48  ;;  %v3153_v28 = vld [vmem:[%s4826_s4 + $0x94] ss:$8 sps:$4 sm:$0xff]  }
  0x9c   :  { %v296_v52 = vld [vmem:[#allocation2] sm:$0xff]  ;;  %v297_v53 = vld [vmem:[#allocation2 + $0x8] sm:$0xff]  ;;  %640 = vmatprep.mubr.bf16.mxu1 %v3221_v4  ;;  %v178_v55 = vpop.permute.xlu1 %177  ;;  %v176_v56 = vpop.permute.xlu0 %175 }
  0x9d   :  { %v3616_v57 = vpack.c.bf16 %v297_v53, %v296_v52  ;;  %269 = vst.msk [vmem:[#allocation2 + $0x28] sm:$0xff] %vm263_vm2, %v178_v55  ;;  %268 = vst.msk [vmem:[#allocation2 + $0x20] sm:$0xff] %vm263_vm2, %v176_v56  ;;  %v3087_v55 = vld [vmem:[%s4826_s4 + $0x144] ss:$8 sps:$4 sm:$0xff]  }
  0x9e   :  { %v3123_v56 = vld [vmem:[%s4826_s4 + $0x4] ss:$8 sps:$4 sm:$0xff]  }
  0x9f   :  { %2922 = vmatmul.mubr.msk.bf16.vlgmr.msra.gmra.mxu0 %vm426_vm3, %v3616_v57 }
  0xa0   :  { %530 = vmatprep.mubr.bf16.mxu0 %v3221_v4  ;;  %v298_v59 = vld [vmem:[#allocation2 + $0x10] sm:$0xff]  ;;  %v299_v60 = vld [vmem:[#allocation2 + $0x18] sm:$0xff]  ;;  %v182_v61 = vpop.permute.xlu1 %181  ;;  %v180_v62 = vpop.permute.xlu0 %179  ;;  %1591 = vmatpush1.bf16.msra.mxu0 %v3088_v11 }
  0xa1   :  { %271 = vst.msk [vmem:[#allocation2 + $0x38] sm:$0xff] %vm263_vm2, %v182_v61  ;;  %270 = vst.msk [vmem:[#allocation2 + $0x30] sm:$0xff] %vm263_vm2, %v180_v62  ;;  %v3629_v63 = vpack.c.bf16 %v299_v60, %v298_v59  ;;  %1592 = vmatprep.subr.bf16.mxu0 %v3096_v22  ;;  %v3085_v60 = vld [vmem:[%s4826_s4 + $0x140] ss:$8 sps:$4 sm:$0xff]   ;;  %v3093_v61 = vld [vmem:[%s4826_s4 + $0x134] ss:$8 sps:$4 sm:$0xff]  }
  0xa2   :  { %v3126_v62 = vld [vmem:[%s4826_s4 + $0xf4] ss:$8 sps:$4 sm:$0xff]   ;;  %v3127_v22 = vld [vmem:[%s4826_s4 + $0x1f0] ss:$8 sps:$4 sm:$0xff]  }
  0xa3   :  { %2934 = vmatmul.mubr.msk.bf16.gmra.mxu1 %vm426_vm3, %v3622_v58  ;;  %v3111_v11 = vld [vmem:[%s4826_s4 + $0x114] ss:$8 sps:$4 sm:$0xff]  }
  0xa4   :  { %650 = vmatprep.mubr.bf16.mxu1 %v3221_v4  ;;  %v186_v2 = vpop.permute.xlu1 %185  ;;  %v184_v3 = vpop.permute.xlu0 %183  ;;  %v300_v6 = vld [vmem:[#allocation2 + $0x20] sm:$0xff]  ;;  %v301_v7 = vld [vmem:[#allocation2 + $0x28] sm:$0xff]  ;;  %1593 = vmatpush1.bf16.msra.mxu0 %v3094_v23 }
  0xa5   :  { %273 = vst.msk [vmem:[#allocation2 + $0x48] sm:$0xff] %vm263_vm2, %v186_v2  ;;  %272 = vst.msk [vmem:[#allocation2 + $0x40] sm:$0xff] %vm263_vm2, %v184_v3  ;;  %v3643_v10 = vpack.c.bf16 %v301_v7, %v300_v6  ;;  %1594 = vmatprep.subr.bf16.mxu0 %v3099_v26  ;;  %v3091_v2 = vld [vmem:[%s4826_s4 + $0x130] ss:$8 sps:$4 sm:$0xff]   ;;  %v3102_v3 = vld [vmem:[%s4826_s4 + $0x124] ss:$8 sps:$4 sm:$0xff]  }
  0xa6   :  { %v3132_v6 = vld [vmem:[%s4826_s4 + $0xe4] ss:$8 sps:$4 sm:$0xff]   ;;  %v3130_v7 = vld [vmem:[%s4826_s4 + $0xe0] ss:$8 sps:$4 sm:$0xff]  }
  0xa7   :  { %2923 = vmatmul.mubr.msk.bf16.gmra.mxu0 %vm426_vm3, %v3629_v63  ;;  %v3138_v23 = vld [vmem:[%s4826_s4 + $0x1e4] ss:$8 sps:$4 sm:$0xff]   ;;  %v3148_v26 = vld [vmem:[%s4826_s4 + $0xa0] ss:$8 sps:$4 sm:$0xff]  }
  0xa8   :  { %540 = vmatprep.mubr.bf16.mxu0 %v3221_v4  ;;  %v190_v8 = vpop.permute.xlu1 %189  ;;  %v188_v9 = vpop.permute.xlu0 %187  ;;  %v302_v18 = vld [vmem:[#allocation2 + $0x30] sm:$0xff]  ;;  %v303_v19 = vld [vmem:[#allocation2 + $0x38] sm:$0xff]  ;;  %1595 = vmatpush1.bf16.msra.mxu0 %v3097_v29 }
  0xa9   :  { %275 = vst.msk [vmem:[#allocation2 + $0x58] sm:$0xff] %vm263_vm2, %v190_v8  ;;  %274 = vst.msk [vmem:[#allocation2 + $0x50] sm:$0xff] %vm263_vm2, %v188_v9  ;;  %v3669_v25 = vpack.c.bf16 %v303_v19, %v302_v18  ;;  %1596 = vmatprep.subr.bf16.mxu0 %v3105_v33  ;;  %v3100_v9 = vld [vmem:[%s4826_s4 + $0x120] ss:$8 sps:$4 sm:$0xff]   ;;  %v3129_v19 = vld [vmem:[%s4826_s4 + $0x1f4] ss:$8 sps:$4 sm:$0xff]  }
  0xaa   :  { %v3118_v18 = vld [vmem:[%s4826_s4 + $0x100] ss:$8 sps:$4 sm:$0xff]   ;;  %v3147_v29 = vld [vmem:[%s4826_s4 + $0x1d4] ss:$8 sps:$4 sm:$0xff]   ;;  %v3159_v33 = vld [vmem:[%s4826_s4 + $0x84] ss:$8 sps:$4 sm:$0xff]  }
  0xab   :  { %2935 = vmatmul.mubr.msk.bf16.gmra.mxu1 %vm426_vm3, %v3636_v5 }
  0xac   :  { %660 = vmatprep.mubr.bf16.mxu1 %v3221_v4  ;;  %v194_v15 = vpop.permute.xlu1 %193  ;;  %v192_v16 = vpop.permute.xlu0 %191  ;;  %v304_v31 = vld [vmem:[#allocation2 + $0x40] sm:$0xff]  ;;  %v305_v32 = vld [vmem:[#allocation2 + $0x48] sm:$0xff]  ;;  %1597 = vmatpush1.bf16.msra.mxu0 %v3103_v34 }
  0xad   :  { %277 = vst.msk [vmem:[#allocation2 + $0x68] sm:$0xff] %vm263_vm2, %v194_v15  ;;  %276 = vst.msk [vmem:[#allocation2 + $0x60] sm:$0xff] %vm263_vm2, %v192_v16  ;;  %v3691_v36 = vpack.c.bf16 %v305_v32, %v304_v31  ;;  %1598 = vmatprep.subr.bf16.mxu0 %v3108_v37  ;;  %v3141_v15 = vld [vmem:[%s4826_s4 + $0xc4] ss:$8 sps:$4 sm:$0xff]   ;;  %v3139_v16 = vld [vmem:[%s4826_s4 + $0xc0] ss:$8 sps:$4 sm:$0xff]  }
  0xae   :  { %v3151_v31 = vld [vmem:[%s4826_s4 + $0x90] ss:$8 sps:$4 sm:$0xff]   ;;  %v3157_v34 = vld [vmem:[%s4826_s4 + $0x80] ss:$8 sps:$4 sm:$0xff]   ;;  %v3156_v37 = vld [vmem:[%s4826_s4 + $0x1c4] ss:$8 sps:$4 sm:$0xff]  }
  0xaf   :  { %2924 = vmatmul.mubr.msk.bf16.gmra.mxu0 %vm426_vm3, %v3643_v10  ;;  %v3145_v32 = vld [vmem:[%s4826_s4 + $0x1d0] ss:$8 sps:$4 sm:$0xff]  }
  0xb0   :  { %550 = vmatprep.mubr.bf16.mxu0 %v3221_v4  ;;  %v198_v20 = vpop.permute.xlu1 %197  ;;  %v196_v21 = vpop.permute.xlu0 %195  ;;  %v306_v39 = vld [vmem:[#allocation2 + $0x50] sm:$0xff]  ;;  %v307_v40 = vld [vmem:[#allocation2 + $0x58] sm:$0xff]  ;;  %1599 = vmatpush1.bf16.msra.mxu0 %v3106_v38 }
  0xb1   :  { %279 = vst.msk [vmem:[#allocation2 + $0x78] sm:$0xff] %vm263_vm2, %v198_v20  ;;  %278 = vst.msk [vmem:[#allocation2 + $0x70] sm:$0xff] %vm263_vm2, %v196_v21  ;;  %v3717_v46 = vpack.c.bf16 %v307_v40, %v306_v39  ;;  %1600 = vmatprep.subr.bf16.mxu0 %v3114_v44  ;;  %v3144_v20 = vld [vmem:[%s4826_s4 + $0xb4] ss:$8 sps:$4 sm:$0xff]   ;;  %v3142_v21 = vld [vmem:[%s4826_s4 + $0xb0] ss:$8 sps:$4 sm:$0xff]  }
  0xb2   :  { %v3160_v38 = vld [vmem:[%s4826_s4 + $0x1b0] ss:$8 sps:$4 sm:$0xff]   ;;  %v3162_v39 = vld [vmem:[%s4826_s4 + $0x1b4] ss:$8 sps:$4 sm:$0xff]   ;;  %v3163_v40 = vld [vmem:[%s4826_s4 + $0x1a0] ss:$8 sps:$4 sm:$0xff]  }
  0xb3   :  { %2936 = vmatmul.mubr.msk.bf16.gmra.mxu1 %vm426_vm3, %v3656_v17  ;;  %v3168_v44 = vld [vmem:[%s4826_s4 + $0x194] ss:$8 sps:$4 sm:$0xff]  }
  0xb4   :  { %670 = vmatprep.mubr.bf16.mxu1 %v3221_v4  ;;  %1601 = vmatpush1.bf16.msra.mxu0 %v3112_v45  ;;  %v308_v52 = vld [vmem:[#allocation2 + $0x60] sm:$0xff]  ;;  %v309_v53 = vld [vmem:[#allocation2 + $0x68] sm:$0xff] }
  0xb5   :  { %1602 = vmatprep.subr.bf16.mxu0 %v3117_v50  ;;  %v3749_v59 = vpack.c.bf16 %v309_v53, %v308_v52  ;;  %v3169_v45 = vld [vmem:[%s4826_s4 + $0x180] ss:$8 sps:$4 sm:$0xff]  }
  0xb7   :  { %2925 = vmatmul.mubr.msk.bf16.gmra.mxu0 %vm426_vm3, %v3669_v25 }
  0xb8   :  { %560 = vmatprep.mubr.bf16.mxu0 %v3221_v4  ;;  %1603 = vmatpush1.bf16.msra.mxu0 %v3115_v51  ;;  %v310_v0 = vld [vmem:[#allocation2 + $0x70] sm:$0xff]  ;;  %v311_v1 = vld [vmem:[#allocation2 + $0x78] sm:$0xff] }
  0xb9   :  { %1604 = vmatprep.subr.bf16.mxu0 %v3123_v56  ;;  %v3781_v8 = vpack.c.bf16 %v311_v1, %v310_v0 }
  0xbb   :  { %2937 = vmatmul.mubr.msk.bf16.gmra.mxu1 %vm426_vm3, %v3680_v30 }
  0xbc   :  { %713 = vmatprep.mubr.bf16.mxu1 %v3221_v4 }
  0xbf   :  { %2926 = vmatmul.mubr.msk.bf16.gmra.mxu0 %vm426_vm3, %v3691_v36 }
  0xc0   :  { %570 = vmatprep.mubr.bf16.mxu0 %v3221_v4 }
  0xc3   :  { %2939 = vmatmul.mubr.msk.bf16.vlgmr.msra.gmra.mxu1 %vm426_vm3, %v3616_v57  ;;  %v3121_v57 = vld [vmem:[%s4826_s4] ss:$8 sps:$4 sm:$0xff]  }
  0xc4   :  { %723 = vmatprep.mubr.bf16.mxu1 %v3221_v4  ;;  %1784 = vmatpush1.bf16.msra.mxu1 %v3076_v42  ;;  %v3165_v42 = vld [vmem:[%s4826_s4 + $0x1a4] ss:$8 sps:$4 sm:$0xff]  }
  0xc5   :  { %1785 = vmatprep.subr.bf16.mxu1 %v3081_v43  ;;  %1605 = vmatpush1.bf16.msra.mxu0 %v3121_v57  ;;  %v3166_v43 = vld [vmem:[%s4826_s4 + $0x190] ss:$8 sps:$4 sm:$0xff]  }
  0xc6   :  { %1606 = vmatprep.subr.bf16.mxu0 %v3126_v62 }
  0xc7   :  { %2927 = vmatmul.mubr.msk.bf16.gmra.mxu0 %vm426_vm3, %v3717_v46 }
  0xc8   :  { %580 = vmatprep.mubr.bf16.mxu0 %v3221_v4  ;;  %1786 = vmatpush1.bf16.msra.mxu1 %v3079_v47 }
  0xc9   :  { %1787 = vmatprep.subr.bf16.mxu1 %v3084_v49 }
  0xcb   :  { %2940 = vmatmul.mubr.msk.bf16.gmra.mxu1 %vm426_vm3, %v3629_v63  ;;  %v3124_v63 = vld [vmem:[%s4826_s4 + $0xf0] ss:$8 sps:$4 sm:$0xff]  }
  0xcc   :  { %733 = vmatprep.mubr.bf16.mxu1 %v3221_v4  ;;  %1788 = vmatpush1.bf16.msra.mxu1 %v3082_v54 }
  0xcd   :  { %1789 = vmatprep.subr.bf16.mxu1 %v3087_v55  ;;  %1607 = vmatpush2.bf16.msra.mxu0 %v3124_v63 }
  0xce   :  { %1608 = vmatprep.subr.bf16.mxu0 %v3132_v6 }
  0xcf   :  { %2928 = vmatmul.mubr.msk.bf16.gmra.mxu0 %vm426_vm3, %v3749_v59 }
  0xd0   :  { %590 = vmatprep.mubr.bf16.mxu0 %v3221_v4  ;;  %1790 = vmatpush1.bf16.msra.mxu1 %v3085_v60 }
  0xd1   :  { %1791 = vmatprep.subr.bf16.mxu1 %v3093_v61  ;;  %1609 = vmatpush2.bf16.msra.mxu0 %v3130_v7 }
  0xd3   :  { %2941 = vmatmul.mubr.msk.bf16.gmra.mxu1 %vm426_vm3, %v3643_v10  ;;  %v3135_v10 = vld [vmem:[%s4826_s4 + $0xd4] ss:$8 sps:$4 sm:$0xff]  }
  0xd4   :  { %743 = vmatprep.mubr.bf16.mxu1 %v3221_v4  ;;  %1792 = vmatpush1.bf16.msra.mxu1 %v3091_v2 }
  0xd5   :  { %1793 = vmatprep.subr.bf16.mxu1 %v3102_v3  ;;  %1610 = vmatprep.subr.bf16.mxu0 %v3135_v10 }
  0xd6   :  { %1611 = vmatpush2.bf16.msra.mxu0 %v3133_v12 }
  0xd7   :  { %2929 = vmatmul.mubr.msk.bf16.gmra.mxu0 %vm426_vm3, %v3781_v8  ;;  %1612 = vmatprep.subr.bf16.mxu0 %v3141_v15 }
  0xd8   :  { %1794 = vmatpush1.bf16.msra.mxu1 %v3100_v9 }
  0xd9   :  { %1795 = vmatprep.subr.bf16.mxu1 %v3111_v11 }
  0xda   :  { %1613 = vmatpush2.bf16.msra.mxu0 %v3139_v16 }
  0xdb   :  { %2942 = vmatmul.mubr.msk.bf16.gmra.mxu1 %vm426_vm3, %v3669_v25  ;;  %1614 = vmatprep.subr.bf16.mxu0 %v3144_v20  ;;  %v3150_v25 = vld [vmem:[%s4826_s4 + $0xa4] ss:$8 sps:$4 sm:$0xff]  }
  0xdc   :  { %753 = vmatprep.mubr.bf16.mxu1 %v3221_v4  ;;  %1796 = vmatpush1.bf16.msra.mxu1 %v3109_v13 }
  0xdd   :  { %1797 = vmatprep.subr.bf16.mxu1 %v3120_v14 }
  0xde   :  { %1615 = vmatpush2.bf16.msra.mxu0 %v3142_v21 }
  0xdf   :  { %1616 = vmatprep.subr.bf16.mxu0 %v3150_v25 }
  0xe0   :  { %1798 = vmatpush1.bf16.msra.mxu1 %v3118_v18 }
  0xe1   :  { %1799 = vmatprep.subr.bf16.mxu1 %v3129_v19 }
  0xe2   :  { %1617 = vmatpush2.bf16.msra.mxu0 %v3148_v26 }
  0xe3   :  { %2943 = vmatmul.mubr.msk.bf16.gmra.mxu1 %vm426_vm3, %v3691_v36  ;;  %1618 = vmatprep.subr.bf16.mxu0 %v3153_v28  ;;  %v3154_v36 = vld [vmem:[%s4826_s4 + $0x1c0] ss:$8 sps:$4 sm:$0xff]  }
  0xe4   :  { %763 = vmatprep.mubr.bf16.mxu1 %v3221_v4  ;;  %1800 = vmatpush2.bf16.msra.mxu1 %v3127_v22 }
  0xe5   :  { %1801 = vmatprep.subr.bf16.mxu1 %v3138_v23 }
  0xe6   :  { %1619 = vmatpush2.bf16.msra.mxu0 %v3151_v31 }
  0xe7   :  { %1620 = vmatprep.subr.bf16.mxu0 %v3159_v33 }
  0xe8   :  { %1802 = vmatpush2.bf16.msra.mxu1 %v3136_v27 }
  0xe9   :  { %1803 = vmatprep.subr.bf16.mxu1 %v3147_v29 }
  0xea   :  { %1621 = vmatpush2.bf16.msra.mxu0 %v3157_v34 }
  0xeb   :  { %2944 = vmatmul.mubr.msk.bf16.gmra.mxu1 %vm426_vm3, %v3717_v46 }
  0xec   :  { %773 = vmatprep.mubr.bf16.mxu1 %v3221_v4  ;;  %1804 = vmatpush2.bf16.msra.mxu1 %v3145_v32 }
  0xed   :  { %1805 = vmatprep.subr.bf16.mxu1 %v3156_v37 }
  0xf0   :  { %1806 = vmatpush2.bf16.msra.mxu1 %v3154_v36 }
  0xf1   :  { %1807 = vmatprep.subr.bf16.mxu1 %v3162_v39 }
  0xf3   :  { %2945 = vmatmul.mubr.msk.bf16.gmra.mxu1 %vm426_vm3, %v3749_v59 }
  0xf4   :  { %783 = vmatprep.mubr.bf16.mxu1 %v3221_v4  ;;  %1808 = vmatpush2.bf16.msra.mxu1 %v3160_v38 }
  0xf5   :  { %1809 = vmatprep.subr.bf16.mxu1 %v3165_v42 }
  0xf8   :  { %1810 = vmatpush2.bf16.msra.mxu1 %v3163_v40 }
  0xf9   :  { %1811 = vmatprep.subr.bf16.mxu1 %v3168_v44 }
  0xfb   :  { %2946 = vmatmul.mubr.msk.bf16.gmra.mxu1 %vm426_vm3, %v3781_v8 }
  0xfc   :  { %793 = vmatprep.mubr.bf16.mxu1 %v3221_v4  ;;  %1812 = vmatpush2.bf16.msra.mxu1 %v3166_v43 }
 0x103   :  { %2947 = vmatmul.mubr.msk.bf16.gmra.mxu1 %vm426_vm3, %v3568_v24  ;;  %v3171_v24 = vld [vmem:[%s4826_s4 + $0x184] ss:$8 sps:$4 sm:$0xff]  }
 0x104   :  { %803 = vmatprep.mubr.bf16.mxu1 %v3221_v4  ;;  %1813 = vmatprep.subr.bf16.mxu1 %v3171_v24 }
 0x105   :  { %1814 = vmatpush2.bf16.msra.mxu1 %v3169_v45 }
 0x10b   :  { %2948 = vmatmul.mubr.msk.bf16.gmra.mxu1 %vm426_vm3, %v3590_v35  ;;  %v356_v35 = vlaneseq }
 0x10c   :  { %813 = vmatprep.mubr.bf16.mxu1 %v3221_v4 }
 0x113   :  { %2949 = vmatmul.mubr.msk.bf16.gmra.mxu1 %vm426_vm3, %v3600_v41  ;;  %v3921_v41 = vshrl.u32 %v356_v35, 7 }
 0x114   :  { %823 = vmatprep.mubr.bf16.mxu1 %v3221_v4 }
 0x115   :  { %v3960_v14 = vsub.s32 1, %v3921_v41 }
 0x11b   :  { %2950 = vmatmul.mubr.msk.bf16.gmra.mxu1 %vm426_vm3, %v3609_v48  ;;  %v3926_v48 = vsub.s32 0, %v3921_v41 }
 0x11c   :  { %833 = vmatprep.mubr.bf16.mxu1 %v3221_v4 }
 0x123   :  { %2951 = vmatmul.mubr.msk.bf16.gmra.mxu1 %vm426_vm3, %v3622_v58  ;;  %v3931_v58 = vld [vmem:[%s4827_s3] sm:$0xf] }
 0x124   :  { %843 = vmatprep.mubr.bf16.mxu1 %v3221_v4  ;;  %v3969_v23 = vrot.slane %v3931_v58, %v3960_v14 }
 0x12b   :  { %2952 = vmatmul.mubr.msk.bf16.gmra.mxu1 %vm426_vm3, %v3636_v5  ;;  %v3935_v5 = vrot.slane %v3931_v58, %v3926_v48 }
 0x12c   :  { %853 = vmatprep.mubr.bf16.mxu1 %v3221_v4 }
 0x133   :  { %2953 = vmatmul.mubr.msk.bf16.gmra.mxu1 %vm426_vm3, %v3656_v17 }
 0x134   :  { %863 = vmatprep.mubr.bf16.mxu1 %v3221_v4 }
 0x13b   :  { %2954 = vmatmul.mubr.msk.bf16.gmra.mxu1 %vm426_vm3, %v3680_v30 }
 0x143   :  { %v602_v17 = vpop.f32.mrf.mxu1 }
 0x144   :  { %v603_v4 = vadd.f32 %v602_v17, %v3935_v5 }
 0x145   :  { %v3938_v46 = vpop.f32.mrf.mxu1 }
 0x146   :  { %v938_v49 = vmul.f32 0.2, %v603_v4 }
 0x147   :  { %v606_v47 = vpop.f32.mrf.mxu1 }
 0x148   :  { %v607_v30 = vadd.f32 %v606_v47, %v3935_v5  ;;  %v1066_v53 = vmax.f32 %v603_v4, %v938_v49 }
 0x149   :  { %v3941_v50 = vpop.f32.mrf.mxu1 }
 0x14a   :  { %v942_v51 = vmul.f32 0.2, %v607_v30 }
 0x14b   :  { %v612_v52 = vpop.f32.mrf.mxu1 }
 0x14c   :  { %v1070_v54 = vmax.f32 %v607_v30, %v942_v51  ;;  %v613_v55 = vadd.f32 %v612_v52, %v3935_v5 }
 0x14d   :  { %v3944_v56 = vpop.f32.mrf.mxu1 }
 0x14e   :  { %v3946_v57 = vpack.c.bf16 %v1070_v54, %v1066_v53  ;;  %v946_v60 = vmul.f32 0.2, %v613_v55  ;;  %v3174_v53 = vld [vmem:[%s4828_s6 + $0x74] ss:$8 sps:$4 sm:$0xff]  }
 0x14f   :  { %v616_v59 = vpop.f32.mrf.mxu1  ;;  %2340 = vmatprep.subr.bf16.mxu0 %v3174_v53 }
 0x150   :  { %v617_v61 = vadd.f32 %v616_v59, %v3935_v5  ;;  %v1074_v1 = vmax.f32 %v613_v55, %v946_v60 }
 0x151   :  { %v3949_v62 = vpop.f32.mrf.mxu1 }
 0x152   :  { %v950_v63 = vmul.f32 0.2, %v617_v61 }
 0x153   :  { %v622_v0 = vpop.f32.mrf.mxu1 }
 0x154   :  { %v1078_v2 = vmax.f32 %v617_v61, %v950_v63  ;;  %v623_v3 = vadd.f32 %v622_v0, %v3935_v5  ;;  %v3172_v63 = vld [vmem:[%s4828_s6 + $0x70] ss:$8 sps:$4 sm:$0xff]  }
 0x155   :  { %v3952_v6 = vpop.f32.mrf.mxu1 }
 0x156   :  { %v3954_v7 = vpack.c.bf16 %v1078_v2, %v1074_v1  ;;  %v954_v9 = vmul.f32 0.2, %v623_v3 }
 0x157   :  { %v626_v8 = vpop.f32.mrf.mxu1 }
 0x158   :  { %v627_v11 = vadd.f32 %v626_v8, %v3935_v5  ;;  %v1082_v15 = vmax.f32 %v623_v3, %v954_v9 }
 0x159   :  { %v3957_v10 = vpop.f32.mrf.mxu1 }
 0x15a   :  { %v958_v12 = vmul.f32 0.2, %v627_v11 }
 0x15b   :  { %v632_v13 = vpop.f32.mrf.mxu1 }
 0x15c   :  { %v1086_v16 = vmax.f32 %v627_v11, %v958_v12  ;;  %v633_v18 = vadd.f32 %v632_v13, %v3935_v5 }
 0x15d   :  { %v3963_v19 = vpop.f32.mrf.mxu1 }
 0x15e   :  { %v3965_v20 = vpack.c.bf16 %v1086_v16, %v1082_v15  ;;  %v962_v27 = vmul.f32 0.2, %v633_v18 }
 0x15f   :  { %v522_v21 = vpop.f32.mrf.mxu0  ;;  %v636_v22 = vpop.f32.mrf.mxu1 }
 0x160   :  { %v523_v25 = vadd.f32 %v522_v21, %v3935_v5  ;;  %v637_v26 = vadd.f32 %v636_v22, %v3935_v5  ;;  %v1090_v40 = vmax.f32 %v633_v18, %v962_v27 }
 0x161   :  { %v524_v28 = vpop.f32.mrf.mxu0  ;;  %v3973_v29 = vpop.f32.mrf.mxu1 }
 0x162   :  { %v966_v31 = vmul.f32 0.2, %v637_v26  ;;  %v525_v32 = vadd.f32 %v524_v28, %v3969_v23  ;;  %v874_v33 = vmul.f32 0.2, %v523_v25 }
 0x163   :  { %v526_v34 = vpop.f32.mrf.mxu0  ;;  %v642_v36 = vpop.f32.mrf.mxu1 }
 0x164   :  { %v1094_v37 = vmax.f32 %v637_v26, %v966_v31  ;;  %v875_v38 = vmul.f32 0.2, %v525_v32  ;;  %v527_v39 = vadd.f32 %v526_v34, %v3935_v5  ;;  %v643_v42 = vadd.f32 %v642_v36, %v3935_v5 }
 0x165   :  { %v528_v43 = vpop.f32.mrf.mxu0  ;;  %v3978_v44 = vpop.f32.mrf.mxu1  ;;  %v1002_v35 = vmax.f32 %v523_v25, %v874_v33 }
 0x166   :  { %v878_v24 = vmul.f32 0.2, %v527_v39  ;;  %v529_v45 = vadd.f32 %v528_v43, %v3969_v23  ;;  %v3981_v47 = vpack.c.bf16 %v1094_v37, %v1090_v40  ;;  %v1003_v49 = vmax.f32 %v525_v32, %v875_v38  ;;  %v3177_v32 = vld [vmem:[%s4828_s6 + $0x64] ss:$8 sps:$4 sm:$0xff]   ;;  %v3175_v37 = vld [vmem:[%s4828_s6 + $0x60] ss:$8 sps:$4 sm:$0xff]  }
 0x167   :  { %v532_v17 = vpop.f32.mrf.mxu0  ;;  %v646_v4 = vpop.f32.mrf.mxu1  ;;  %v970_v54 = vmul.f32 0.2, %v643_v42 }
 0x168   :  { %v1006_v30 = vmax.f32 %v527_v39, %v878_v24  ;;  %v879_v51 = vmul.f32 0.2, %v529_v45  ;;  %v533_v52 = vadd.f32 %v532_v17, %v3935_v5  ;;  %v647_v55 = vadd.f32 %v646_v4, %v3935_v5 }
 0x169   :  { %v534_v59 = vpop.f32.mrf.mxu0  ;;  %v3988_v60 = vpop.f32.mrf.mxu1  ;;  %v1098_v13 = vmax.f32 %v643_v42, %v970_v54 }
 0x16a   :  { %v1007_v61 = vmax.f32 %v529_v45, %v879_v51  ;;  %v1130_v0 = vpack.c.bf16 %v1006_v30, %v1002_v35  ;;  %v974_v1 = vmul.f32 0.2, %v647_v55  ;;  %v535_v2 = vadd.f32 %v534_v59, %v3969_v23 }
 0x16b   :  { %v536_v3 = vpop.f32.mrf.mxu0  ;;  %v652_v8 = vpop.f32.mrf.mxu1  ;;  %v882_v9 = vmul.f32 0.2, %v533_v52 }
 0x16c   :  { %v537_v11 = vadd.f32 %v536_v3, %v3935_v5  ;;  %v1131_v12 = vpack.c.bf16 %v1007_v61, %v1003_v49  ;;  %v1102_v15 = vmax.f32 %v647_v55, %v974_v1  ;;  %v883_v16 = vmul.f32 0.2, %v535_v2 }
 0x16d   :  { %v653_v18 = vadd.f32 %v652_v8, %v3935_v5  ;;  %v538_v21 = vpop.f32.mrf.mxu0  ;;  %v3996_v22 = vpop.f32.mrf.mxu1  ;;  %v1010_v33 = vmax.f32 %v533_v52, %v882_v9 }
 0x16e   :  { %v886_v25 = vmul.f32 0.2, %v537_v11  ;;  %v539_v26 = vadd.f32 %v538_v21, %v3969_v23  ;;  %1622 = vmatprep.mubr.bf16.mxu0 %v1131_v12  ;;  %v3999_v31 = vpack.c.bf16 %v1102_v15, %v1098_v13  ;;  %v1011_v38 = vmax.f32 %v535_v2, %v883_v16  ;;  %v3178_v2 = vld [vmem:[%s4828_s6 + $0x50] ss:$8 sps:$4 sm:$0xff]   ;;  %v3180_v13 = vld [vmem:[%s4828_s6 + $0x54] ss:$8 sps:$4 sm:$0xff]  }
 0x16f   :  { %v542_v27 = vpop.f32.mrf.mxu0  ;;  %v656_v28 = vpop.f32.mrf.mxu1  ;;  %1623 = vmatmul.mubr.bf16.vlgmr.msra.gmra.mxu0 %v1130_v0  ;;  %v978_v39 = vmul.f32 0.2, %v653_v18 }
 0x170   :  { %v1014_v34 = vmax.f32 %v537_v11, %v886_v25  ;;  %v887_v36 = vmul.f32 0.2, %v539_v26  ;;  %2341 = vmatpush1.bf16.msra.mxu0 %v3172_v63  ;;  %v543_v40 = vadd.f32 %v542_v27, %v3935_v5  ;;  %v657_v42 = vadd.f32 %v656_v28, %v3935_v5 }
 0x171   :  { %v544_v43 = vpop.f32.mrf.mxu0  ;;  %v4009_v24 = vpop.f32.mrf.mxu1  ;;  %2342 = vmatprep.subr.bf16.mxu0 %v3177_v32  ;;  %v1106_v54 = vmax.f32 %v653_v18, %v978_v39 }
 0x172   :  { %v1015_v45 = vmax.f32 %v539_v26, %v887_v36  ;;  %v545_v35 = vadd.f32 %v544_v43, %v3969_v23  ;;  %v890_v17 = vmul.f32 0.2, %v543_v40  ;;  %v982_v4 = vmul.f32 0.2, %v657_v42 }
 0x173   :  { %v546_v49 = vpop.f32.mrf.mxu0  ;;  %v662_v30 = vpop.f32.mrf.mxu1  ;;  %v1134_v53 = vpack.c.bf16 %v1014_v34, %v1010_v33 }
 0x174   :  { %v547_v51 = vadd.f32 %v546_v49, %v3935_v5  ;;  %v663_v52 = vadd.f32 %v662_v30, %v3935_v5  ;;  %2343 = vmatpush1.bf16.msra.mxu0 %v3175_v37  ;;  %v1110_v55 = vmax.f32 %v657_v42, %v982_v4  ;;  %v891_v59 = vmul.f32 0.2, %v545_v35 }
 0x175   :  { %v548_v61 = vpop.f32.mrf.mxu0  ;;  %v4014_v63 = vpop.f32.mrf.mxu1  ;;  %v1135_v0 = vpack.c.bf16 %v1015_v45, %v1011_v38  ;;  %v1018_v3 = vmax.f32 %v543_v40, %v890_v17  ;;  %2344 = vmatprep.subr.bf16.mxu0 %v3180_v13  ;;  %v366_v38 = vsub.s32 2, %v3921_v41 }
 0x176   :  { %v894_v1 = vmul.f32 0.2, %v547_v51  ;;  %v549_v8 = vadd.f32 %v548_v61, %v3969_v23  ;;  %v4020_v12 = vpack.c.bf16 %v1110_v55, %v1106_v54  ;;  %v986_v16 = vmul.f32 0.2, %v663_v52  ;;  %v3183_v54 = vld [vmem:[%s4828_s6 + $0x44] ss:$8 sps:$4 sm:$0xff]  }
 0x177   :  { %1632 = vmatprep.mubr.bf16.mxu0 %v1135_v0  ;;  %v552_v9 = vpop.f32.mrf.mxu0  ;;  %v666_v11 = vpop.f32.mrf.mxu1  ;;  %v1019_v25 = vmax.f32 %v545_v35, %v891_v59 }
 0x178   :  { %v1022_v15 = vmax.f32 %v547_v51, %v894_v1  ;;  %v553_v18 = vadd.f32 %v552_v9, %v3935_v5  ;;  %v667_v21 = vadd.f32 %v666_v11, %v3935_v5  ;;  %1633 = vmatmul.mubr.bf16.gmra.mxu0 %v1134_v53  ;;  %v895_v26 = vmul.f32 0.2, %v549_v8 }
 0x179   :  { %v554_v27 = vpop.f32.mrf.mxu0  ;;  %v4027_v28 = vpop.f32.mrf.mxu1  ;;  %2345 = vmatpush1.bf16.msra.mxu0 %v3178_v2  ;;  %v1114_v39 = vmax.f32 %v663_v52, %v986_v16  ;;  %v370_v53 = vsub.s32 3, %v3921_v41  ;;  %v3181_v52 = vld [vmem:[%s4828_s6 + $0x40] ss:$8 sps:$4 sm:$0xff]   ;;  %v4050_v16 = vrot.slane %v3931_v58, %v366_v38 }
 0x17a   :  { %v990_v32 = vmul.f32 0.2, %v667_v21  ;;  %v555_v33 = vadd.f32 %v554_v27, %v3969_v23  ;;  %v1023_v34 = vmax.f32 %v549_v8, %v895_v26  ;;  %v898_v40 = vmul.f32 0.2, %v553_v18  ;;  %2346 = vmatprep.subr.bf16.mxu0 %v3183_v54 }
 0x17b   :  { %v556_v36 = vpop.f32.mrf.mxu0  ;;  %v672_v37 = vpop.f32.mrf.mxu1  ;;  %v1138_v43 = vpack.c.bf16 %v1022_v15, %v1018_v3 }
 0x17c   :  { %v1118_v42 = vmax.f32 %v667_v21, %v990_v32  ;;  %v899_v45 = vmul.f32 0.2, %v555_v33  ;;  %v557_v35 = vadd.f32 %v556_v36, %v3935_v5  ;;  %v673_v17 = vadd.f32 %v672_v37, %v3935_v5 }
 0x17d   :  { %v558_v4 = vpop.f32.mrf.mxu0  ;;  %v4033_v49 = vpop.f32.mrf.mxu1  ;;  %v1139_v30 = vpack.c.bf16 %v1023_v34, %v1019_v25  ;;  %v1026_v1 = vmax.f32 %v553_v18, %v898_v40  ;;  %2347 = vmatpush1.bf16.msra.mxu0 %v3181_v52  ;;  %v4053_v18 = vrot.slane %v3931_v58, %v370_v53  ;;  %v3186_v52 = vld [vmem:[%s4828_s6 + $0x34] ss:$8 sps:$4 sm:$0xff]  }
 0x17e   :  { %v559_v51 = vadd.f32 %v558_v4, %v3969_v23  ;;  %v902_v55 = vmul.f32 0.2, %v557_v35  ;;  %v4043_v0 = vpack.c.bf16 %v1118_v42, %v1114_v39  ;;  %v1027_v8 = vmax.f32 %v555_v33, %v899_v45  ;;  %2348 = vmatprep.subr.bf16.mxu0 %v3186_v52 }
 0x17f   :  { %1642 = vmatprep.mubr.bf16.mxu0 %v1139_v30  ;;  %v562_v59 = vpop.f32.mrf.mxu0  ;;  %v676_v61 = vpop.f32.mrf.mxu1  ;;  %v994_v11 = vmul.f32 0.2, %v673_v17  ;;  %v3184_v30 = vld [vmem:[%s4828_s6 + $0x30] ss:$8 sps:$4 sm:$0xff]  }
 0x180   :  { %v903_v2 = vmul.f32 0.2, %v559_v51  ;;  %v563_v3 = vadd.f32 %v562_v59, %v3935_v5  ;;  %v677_v41 = vadd.f32 %v676_v61, %v3935_v5  ;;  %1643 = vmatmul.mubr.bf16.gmra.mxu0 %v1138_v43  ;;  %v1030_v9 = vmax.f32 %v557_v35, %v902_v55 }
 0x181   :  { %v564_v13 = vpop.f32.mrf.mxu0  ;;  %v4047_v15 = vpop.f32.mrf.mxu1  ;;  %v1122_v39 = vmax.f32 %v673_v17, %v994_v11  ;;  %2349 = vmatpush1.bf16.msra.mxu0 %v3184_v30 }
 0x182   :  { %v1031_v21 = vmax.f32 %v559_v51, %v903_v2  ;;  %v998_v25 = vmul.f32 0.2, %v677_v41  ;;  %v565_v26 = vadd.f32 %v564_v13, %v3969_v23  ;;  %v906_v34 = vmul.f32 0.2, %v563_v3 }
 0x183   :  { %v566_v27 = vpop.f32.mrf.mxu0  ;;  %v715_v32 = vpop.f32.mrf.mxu1  ;;  %v1142_v37 = vpack.c.bf16 %v1030_v9, %v1026_v1 }
 0x184   :  { %v1126_v33 = vmax.f32 %v677_v41, %v998_v25  ;;  %v567_v36 = vadd.f32 %v566_v27, %v3935_v5  ;;  %v907_v40 = vmul.f32 0.2, %v565_v26  ;;  %v4058_v38 = vadd.f32 %v715_v32, %v4050_v16  ;;  %v3187_v25 = vld [vmem:[%s4828_s6 + $0x20] ss:$8 sps:$4 sm:$0xff]  }
 0x185   :  { %v568_v42 = vpop.f32.mrf.mxu0  ;;  %v717_v43 = vpop.f32.mrf.mxu1  ;;  %v1143_v45 = vpack.c.bf16 %v1031_v21, %v1027_v8  ;;  %v1034_v54 = vmax.f32 %v563_v3, %v906_v34 }
 0x186   :  { %v910_v35 = vmul.f32 0.2, %v567_v36  ;;  %v569_v58 = vadd.f32 %v568_v42, %v3969_v23  ;;  %v4062_v4 = vadd.f32 %v717_v43, %v4053_v18  ;;  %v4067_v53 = vpack.c.bf16 %v1126_v33, %v1122_v39 }
 0x187   :  { %1652 = vmatprep.mubr.bf16.mxu0 %v1143_v45  ;;  %v572_v51 = vpop.f32.mrf.mxu0  ;;  %v719_v17 = vpop.f32.mrf.mxu1  ;;  %v1035_v61 = vmax.f32 %v565_v26, %v907_v40  ;;  %v876_v1 = vmul.f32 0.2, %v4058_v38  ;;  %v3189_v26 = vld [vmem:[%s4828_s6 + $0x24] ss:$8 sps:$4 sm:$0xff]  }
 0x188   :  { %v1038_v55 = vmax.f32 %v567_v36, %v910_v35  ;;  %v911_v59 = vmul.f32 0.2, %v569_v58  ;;  %1653 = vmatmul.mubr.bf16.gmra.mxu0 %v1142_v37  ;;  %v4074_v2 = vadd.f32 %v572_v51, %v3935_v5  ;;  %v720_v41 = vadd.f32 %v719_v17, %v4050_v16  ;;  %2350 = vmatprep.subr.bf16.mxu0 %v3189_v26 }
 0x189   :  { %v574_v8 = vpop.f32.mrf.mxu0  ;;  %v721_v9 = vpop.f32.mrf.mxu1  ;;  %v877_v13 = vmul.f32 0.2, %v4062_v4  ;;  %v1004_v40 = vmax.f32 %v4058_v38, %v876_v1  ;;  %2351 = vmatpush1.bf16.msra.mxu0 %v3187_v25 }
 0x18a   :  { %v1039_v11 = vmax.f32 %v569_v58, %v911_v59  ;;  %v4079_v21 = vadd.f32 %v574_v8, %v3969_v23  ;;  %v722_v3 = vadd.f32 %v721_v9, %v4053_v18  ;;  %v880_v27 = vmul.f32 0.2, %v720_v41  ;;  %v3192_v58 = vld [vmem:[%s4828_s6 + $0x14] ss:$8 sps:$4 sm:$0xff]  }
 0x18b   :  { %v576_v32 = vpop.f32.mrf.mxu0  ;;  %v725_v34 = vpop.f32.mrf.mxu1  ;;  %v914_v33 = vmul.f32 0.2, %v4074_v2  ;;  %v1146_v39 = vpack.c.bf16 %v1038_v55, %v1034_v54  ;;  %v1005_v30 = vmax.f32 %v4062_v4, %v877_v13  ;;  %v3190_v54 = vld [vmem:[%s4828_s6 + $0x10] ss:$8 sps:$4 sm:$0xff]   ;;  %2352 = vmatprep.subr.bf16.mxu0 %v3192_v58  ;;  %v3195_v4 = vld [vmem:[%s4828_s6 + $0x4] ss:$8 sps:$4 sm:$0xff]  }
 0x18c   :  { %v881_v36 = vmul.f32 0.2, %v722_v3  ;;  %v577_v37 = vadd.f32 %v576_v32, %v3935_v5  ;;  %v915_v42 = vmul.f32 0.2, %v4079_v21  ;;  %v1147_v35 = vpack.c.bf16 %v1039_v11, %v1035_v61 }
 0x18d   :  { %v578_v43 = vpop.f32.mrf.mxu0  ;;  %v727_v45 = vpop.f32.mrf.mxu1  ;;  %v1008_v51 = vmax.f32 %v720_v41, %v880_v27  ;;  %v4100_v38 = vadd.f32 %v725_v34, %v4050_v16  ;;  %v1042_v41 = vmax.f32 %v4074_v2, %v914_v33  ;;  %2353 = vmatpush1.bf16.msra.mxu0 %v3190_v54  ;;  %v3193_v33 = vld [vmem:[%s4828_s6] ss:$8 sps:$4 sm:$0xff]  }
 0x18e   :  { %v1009_v17 = vmax.f32 %v722_v3, %v881_v36  ;;  %v918_v52 = vmul.f32 0.2, %v577_v37  ;;  %v579_v55 = vadd.f32 %v578_v43, %v3969_v23  ;;  %v4104_v59 = vadd.f32 %v727_v45, %v4053_v18  ;;  %1662 = vmatprep.mubr.bf16.mxu0 %v1147_v35  ;;  %2354 = vmatprep.subr.bf16.mxu0 %v3195_v4 }
 0x18f   :  { %v582_v61 = vpop.f32.mrf.mxu0  ;;  %v729_v1 = vpop.f32.mrf.mxu1  ;;  %v1043_v13 = vmax.f32 %v4079_v21, %v915_v42  ;;  %v1132_v32 = vpack.c.bf16 %v1008_v51, %v1004_v40  ;;  %v3198_v40 = vld [vmem:[%s4828_s6 + $0xf4] ss:$8 sps:$4 sm:$0xff]  }
 0x190   :  { %v1046_v8 = vmax.f32 %v577_v37, %v918_v52  ;;  %v4111_v9 = vadd.f32 %v582_v61, %v3935_v5  ;;  %v730_v11 = vadd.f32 %v729_v1, %v4050_v16  ;;  %1663 = vmatmul.mubr.bf16.gmra.mxu0 %v1146_v39  ;;  %v919_v3 = vmul.f32 0.2, %v579_v55 }
 0x191   :  { %v584_v25 = vpop.f32.mrf.mxu0  ;;  %v731_v26 = vpop.f32.mrf.mxu1  ;;  %v1133_v27 = vpack.c.bf16 %v1009_v17, %v1005_v30  ;;  %v884_v37 = vmul.f32 0.2, %v4100_v38  ;;  %v885_v21 = vmul.f32 0.2, %v4104_v59  ;;  %2355 = vmatpush1.bf16.msra.mxu0 %v3193_v33 }
 0x192   :  { %v888_v34 = vmul.f32 0.2, %v730_v11  ;;  %v4116_v36 = vadd.f32 %v584_v25, %v3969_v23  ;;  %v732_v2 = vadd.f32 %v731_v26, %v4053_v18  ;;  %v1047_v39 = vmax.f32 %v579_v55, %v919_v3  ;;  %v3196_v3 = vld [vmem:[%s4828_s6 + $0xf0] ss:$8 sps:$4 sm:$0xff]   ;;  %2356 = vmatprep.subr.bf16.mxu0 %v3198_v40 }
 0x193   :  { %1815 = vmatprep.mubr.bf16.mxu1 %v1133_v27  ;;  %v586_v42 = vpop.f32.mrf.mxu0  ;;  %v735_v43 = vpop.f32.mrf.mxu1  ;;  %v922_v45 = vmul.f32 0.2, %v4111_v9  ;;  %v1150_v58 = vpack.c.bf16 %v1046_v8, %v1042_v41  ;;  %v1012_v41 = vmax.f32 %v4100_v38, %v884_v37  ;;  %v1013_v8 = vmax.f32 %v4104_v59, %v885_v21  ;;  %v3201_v27 = vld [vmem:[%s4828_s6 + $0xe4] ss:$8 sps:$4 sm:$0xff]  }
 0x194   :  { %v889_v35 = vmul.f32 0.2, %v732_v2  ;;  %1816 = vmatmul.mubr.bf16.vlgmr.msra.gmra.mxu1 %v1132_v32  ;;  %v923_v30 = vmul.f32 0.2, %v4116_v36  ;;  %v587_v51 = vadd.f32 %v586_v42, %v3935_v5  ;;  %v1151_v54 = vpack.c.bf16 %v1047_v39, %v1043_v13 }
 0x195   :  { %v588_v17 = vpop.f32.mrf.mxu0  ;;  %v737_v52 = vpop.f32.mrf.mxu1  ;;  %v1016_v55 = vmax.f32 %v730_v11, %v888_v34  ;;  %v4131_v1 = vadd.f32 %v735_v43, %v4050_v16  ;;  %v1050_v32 = vmax.f32 %v4111_v9, %v922_v45  ;;  %v4150_v59 = vadd.f32 %v3941_v50, %v3969_v23  ;;  %2357 = vmatpush2.bf16.msra.mxu0 %v3196_v3 }
 0x196   :  { %v1017_v61 = vmax.f32 %v732_v2, %v889_v35  ;;  %v589_v4 = vadd.f32 %v588_v17, %v3969_v23  ;;  %v926_v25 = vmul.f32 0.2, %v587_v51  ;;  %v738_v26 = vadd.f32 %v737_v52, %v4053_v18  ;;  %1672 = vmatprep.mubr.bf16.mxu0 %v1151_v54  ;;  %v3199_v35 = vld [vmem:[%s4828_s6 + $0xe0] ss:$8 sps:$4 sm:$0xff]   ;;  %2358 = vmatprep.subr.bf16.mxu0 %v3201_v27 }
 0x197   :  { %v592_v11 = vpop.f32.mrf.mxu0  ;;  %v739_v13 = vpop.f32.mrf.mxu1  ;;  %v1051_v33 = vmax.f32 %v4116_v36, %v923_v30  ;;  %v892_v43 = vmul.f32 0.2, %v4131_v1  ;;  %v1136_v45 = vpack.c.bf16 %v1016_v55, %v1012_v41  ;;  %v605_v52 = vadd.f32 %v3938_v46, %v3969_v23 }
 0x198   :  { %v927_v34 = vmul.f32 0.2, %v589_v4  ;;  %v4145_v2 = vadd.f32 %v592_v11, %v3935_v5  ;;  %v740_v38 = vadd.f32 %v739_v13, %v4050_v16  ;;  %1673 = vmatmul.mubr.bf16.gmra.mxu0 %v1150_v58  ;;  %v1054_v37 = vmax.f32 %v587_v51, %v926_v25 }
 0x199   :  { %v594_v39 = vpop.f32.mrf.mxu0  ;;  %v741_v21 = vpop.f32.mrf.mxu1  ;;  %v1137_v42 = vpack.c.bf16 %v1017_v61, %v1013_v8  ;;  %v893_v58 = vmul.f32 0.2, %v738_v26  ;;  %v943_v61 = vmul.f32 0.2, %v4150_v59  ;;  %2359 = vmatpush2.bf16.msra.mxu0 %v3199_v35  ;;  %v1020_v46 = vmax.f32 %v4131_v1, %v892_v43 }
 0x19a   :  { %v1055_v9 = vmax.f32 %v589_v4, %v927_v34  ;;  %v896_v40 = vmul.f32 0.2, %v740_v38  ;;  %v930_v50 = vmul.f32 0.2, %v4145_v2  ;;  %v595_v17 = vadd.f32 %v594_v39, %v3969_v23 }
 0x19b   :  { %v742_v36 = vadd.f32 %v741_v21, %v4053_v18  ;;  %1825 = vmatprep.mubr.bf16.mxu1 %v1137_v42  ;;  %v596_v30 = vpop.f32.mrf.mxu0  ;;  %v745_v51 = vpop.f32.mrf.mxu1  ;;  %v1154_v55 = vpack.c.bf16 %v1054_v37, %v1050_v32  ;;  %v1021_v39 = vmax.f32 %v738_v26, %v893_v58  ;;  %v619_v43 = vadd.f32 %v3949_v62, %v3969_v23 }
 0x19c   :  { %v597_v54 = vadd.f32 %v596_v30, %v3935_v5  ;;  %1826 = vmatmul.mubr.bf16.gmra.mxu1 %v1136_v45  ;;  %v931_v4 = vmul.f32 0.2, %v595_v17  ;;  %v1155_v25 = vpack.c.bf16 %v1055_v9, %v1051_v33  ;;  %v1024_v11 = vmax.f32 %v740_v38, %v896_v40 }
 0x19d   :  { %v897_v3 = vmul.f32 0.2, %v742_v36  ;;  %v598_v41 = vpop.f32.mrf.mxu0  ;;  %v747_v8 = vpop.f32.mrf.mxu1  ;;  %v1058_v5 = vmax.f32 %v4145_v2, %v930_v50  ;;  %v746_v45 = vadd.f32 %v745_v51, %v4050_v16  ;;  %v939_v38 = vmul.f32 0.2, %v605_v52 }
 0x19e   :  { %v934_v13 = vmul.f32 0.2, %v597_v54  ;;  %v599_v34 = vadd.f32 %v598_v41, %v3969_v23  ;;  %v748_v27 = vadd.f32 %v747_v8, %v4053_v18  ;;  %1682 = vmatprep.mubr.bf16.mxu0 %v1155_v25  ;;  %v1059_v21 = vmax.f32 %v595_v17, %v931_v4 }
 0x19f   :  { %v1025_v32 = vmax.f32 %v742_v36, %v897_v3  ;;  %v749_v37 = vpop.f32.mrf.mxu1  ;;  %v1140_v26 = vpack.c.bf16 %v1024_v11, %v1020_v46  ;;  %v1071_v2 = vmax.f32 %v4150_v59, %v943_v61  ;;  %v900_v17 = vmul.f32 0.2, %v746_v45 }
 0x1a0   :  { %v1062_v42 = vmax.f32 %v597_v54, %v934_v13  ;;  %v935_v33 = vmul.f32 0.2, %v599_v34  ;;  %1683 = vmatmul.mubr.bf16.gmra.mxu0 %v1154_v55  ;;  %v750_v9 = vadd.f32 %v749_v37, %v4050_v16  ;;  %v901_v41 = vmul.f32 0.2, %v748_v27 }
 0x1a1   :  { %v751_v40 = vpop.f32.mrf.mxu1  ;;  %v1141_v30 = vpack.c.bf16 %v1025_v32, %v1021_v39  ;;  %v1067_v55 = vmax.f32 %v605_v52, %v939_v38  ;;  %v615_v4 = vadd.f32 %v3944_v56, %v3969_v23  ;;  %v951_v62 = vmul.f32 0.2, %v619_v43 }
 0x1a2   :  { %v1063_v35 = vmax.f32 %v599_v34, %v935_v33  ;;  %v752_v1 = vadd.f32 %v751_v40, %v4053_v18  ;;  %v904_v58 = vmul.f32 0.2, %v750_v9  ;;  %v1158_v54 = vpack.c.bf16 %v1062_v42, %v1058_v5 }
 0x1a3   :  { %1835 = vmatprep.mubr.bf16.mxu1 %v1141_v30  ;;  %v755_v50 = vpop.f32.mrf.mxu1  ;;  %v1029_v8 = vmax.f32 %v748_v27, %v901_v41  ;;  %v1163_v13 = vpack.c.bf16 %v1071_v2, %v1067_v55  ;;  %v1028_v34 = vmax.f32 %v746_v45, %v900_v17  ;;  %v947_v5 = vmul.f32 0.2, %v615_v4 }
 0x1a4   :  { %v905_v36 = vmul.f32 0.2, %v752_v1  ;;  %1836 = vmatmul.mubr.bf16.gmra.mxu1 %v1140_v26  ;;  %v1159_v51 = vpack.c.bf16 %v1063_v35, %v1059_v21  ;;  %v1032_v25 = vmax.f32 %v750_v9, %v904_v58  ;;  %v756_v46 = vadd.f32 %v755_v50, %v4050_v16 }
 0x1a5   :  { %v757_v3 = vpop.f32.mrf.mxu1  ;;  %v1079_v42 = vmax.f32 %v619_v43, %v951_v62  ;;  %v629_v33 = vadd.f32 %v3957_v10, %v3969_v23  ;;  %v1075_v40 = vmax.f32 %v615_v4, %v947_v5  ;;  %v625_v30 = vadd.f32 %v3952_v6, %v3969_v23 }
 0x1a6   :  { %v1033_v11 = vmax.f32 %v752_v1, %v905_v36  ;;  %v758_v59 = vadd.f32 %v757_v3, %v4053_v18  ;;  %1692 = vmatprep.mubr.bf16.mxu0 %v1159_v51  ;;  %v1144_v21 = vpack.c.bf16 %v1032_v25, %v1028_v34  ;;  %v908_v38 = vmul.f32 0.2, %v756_v46  ;;  %v3202_v25 = vld [vmem:[%s4828_s6 + $0xd0] ss:$8 sps:$4 sm:$0xff]  }
 0x1a7   :  { %v759_v61 = vpop.f32.mrf.mxu1  ;;  %v959_v58 = vmul.f32 0.2, %v629_v33  ;;  %v1167_v43 = vpack.c.bf16 %v1079_v42, %v1075_v40 }
 0x1a8   :  { %v760_v39 = vadd.f32 %v759_v61, %v4050_v16  ;;  %1693 = vmatmul.mubr.bf16.gmra.mxu0 %v1158_v54  ;;  %v1145_v52 = vpack.c.bf16 %v1033_v11, %v1029_v8  ;;  %v909_v32 = vmul.f32 0.2, %v758_v59  ;;  %v1036_v17 = vmax.f32 %v756_v46, %v908_v38  ;;  %v3204_v11 = vld [vmem:[%s4828_s6 + $0xd4] ss:$8 sps:$4 sm:$0xff]  }
 0x1a9   :  { %1702 = vmatprep.mubr.bf16.mxu0 %v1163_v13  ;;  %v761_v56 = vpop.f32.mrf.mxu1  ;;  %v955_v54 = vmul.f32 0.2, %v625_v30  ;;  %2360 = vmatprep.subr.bf16.mxu0 %v3204_v11  ;;  %v635_v46 = vadd.f32 %v3963_v19, %v3969_v23 }
 0x1aa   :  { %v912_v27 = vmul.f32 0.2, %v760_v39  ;;  %v762_v37 = vadd.f32 %v761_v56, %v4053_v18  ;;  %1845 = vmatprep.mubr.bf16.mxu1 %v1145_v52  ;;  %v1037_v41 = vmax.f32 %v758_v59, %v909_v32  ;;  %v1087_v59 = vmax.f32 %v629_v33, %v959_v58  ;;  %2361 = vmatpush2.bf16.msra.mxu0 %v3202_v25 }
 0x1ab   :  { %v765_v45 = vpop.f32.mrf.mxu1  ;;  %v1083_v34 = vmax.f32 %v625_v30, %v955_v54  ;;  %v963_v38 = vmul.f32 0.2, %v635_v46 }
 0x1ac   :  { %v913_v9 = vmul.f32 0.2, %v762_v37  ;;  %1846 = vmatmul.mubr.bf16.gmra.mxu1 %v1144_v21  ;;  %v1040_v1 = vmax.f32 %v760_v39, %v912_v27  ;;  %v766_v10 = vadd.f32 %v765_v45, %v4050_v16 }
 0x1ad   :  { %v767_v35 = vpop.f32.mrf.mxu1  ;;  %v1171_v21 = vpack.c.bf16 %v1087_v59, %v1083_v34 }
 0x1ae   :  { %v1041_v26 = vmax.f32 %v762_v37, %v913_v9  ;;  %v768_v2 = vadd.f32 %v767_v35, %v4053_v18  ;;  %v1148_v4 = vpack.c.bf16 %v1040_v1, %v1036_v17  ;;  %v916_v61 = vmul.f32 0.2, %v766_v10 }
 0x1af   :  { %v769_v50 = vpop.f32.mrf.mxu1  ;;  %v649_v1 = vadd.f32 %v3988_v60, %v3969_v23  ;;  %v645_v17 = vadd.f32 %v3978_v44, %v3969_v23 }
 0x1b0   :  { %v770_v36 = vadd.f32 %v769_v50, %v4050_v16  ;;  %1703 = vmatmul.mubr.bf16.gmra.mxu0 %v3946_v57  ;;  %v1149_v51 = vpack.c.bf16 %v1041_v26, %v1037_v41  ;;  %v917_v55 = vmul.f32 0.2, %v768_v2  ;;  %v639_v57 = vadd.f32 %v3973_v29, %v3969_v23 }
 0x1b1   :  { %1712 = vmatprep.mubr.bf16.mxu0 %v1167_v43  ;;  %v771_v6 = vpop.f32.mrf.mxu1  ;;  %v1044_v29 = vmax.f32 %v766_v10, %v916_v61  ;;  %v1091_v43 = vmax.f32 %v635_v46, %v963_v38  ;;  %v971_v44 = vmul.f32 0.2, %v645_v17  ;;  %v659_v46 = vadd.f32 %v4009_v24, %v3969_v23 }
 0x1b2   :  { %v920_v3 = vmul.f32 0.2, %v770_v36  ;;  %v772_v8 = vadd.f32 %v771_v6, %v4053_v18  ;;  %1855 = vmatprep.mubr.bf16.mxu1 %v1149_v51  ;;  %v1045_v52 = vmax.f32 %v768_v2, %v917_v55  ;;  %v967_v27 = vmul.f32 0.2, %v639_v57  ;;  %v3205_v2 = vld [vmem:[%s4828_s6 + $0xc0] ss:$8 sps:$4 sm:$0xff]  }
 0x1b3   :  { %v775_v62 = vpop.f32.mrf.mxu1  ;;  %v975_v55 = vmul.f32 0.2, %v649_v1 }
 0x1b4   :  { %v921_v13 = vmul.f32 0.2, %v772_v8  ;;  %1856 = vmatmul.mubr.bf16.gmra.mxu1 %v1148_v4  ;;  %v1048_v5 = vmax.f32 %v770_v36, %v920_v3  ;;  %v776_v42 = vadd.f32 %v775_v62, %v4050_v16  ;;  %v1095_v41 = vmax.f32 %v639_v57, %v967_v27 }
 0x1b5   :  { %v777_v39 = vpop.f32.mrf.mxu1  ;;  %v1103_v34 = vmax.f32 %v649_v1, %v975_v55  ;;  %v655_v27 = vadd.f32 %v3996_v22, %v3969_v23 }
 0x1b6   :  { %v1049_v56 = vmax.f32 %v772_v8, %v921_v13  ;;  %v778_v32 = vadd.f32 %v777_v39, %v4053_v18  ;;  %v1152_v9 = vpack.c.bf16 %v1048_v5, %v1044_v29  ;;  %v924_v58 = vmul.f32 0.2, %v776_v42 }
 0x1b7   :  { %v779_v37 = vpop.f32.mrf.mxu1  ;;  %v1175_v4 = vpack.c.bf16 %v1095_v41, %v1091_v43  ;;  %v979_v22 = vmul.f32 0.2, %v655_v27  ;;  %v3211_v43 = vld [vmem:[%s4828_s6 + $0xa0] ss:$8 sps:$4 sm:$0xff]  }
 0x1b8   :  { %v780_v33 = vadd.f32 %v779_v37, %v4050_v16  ;;  %1713 = vmatmul.mubr.bf16.gmra.mxu0 %v3954_v7  ;;  %v1153_v45 = vpack.c.bf16 %v1049_v56, %v1045_v52  ;;  %v925_v40 = vmul.f32 0.2, %v778_v32  ;;  %v3207_v7 = vld [vmem:[%s4828_s6 + $0xc4] ss:$8 sps:$4 sm:$0xff]   ;;  %v1052_v3 = vmax.f32 %v776_v42, %v924_v58  ;;  %v3208_v52 = vld [vmem:[%s4828_s6 + $0xb0] ss:$8 sps:$4 sm:$0xff]  }
 0x1b9   :  { %1722 = vmatprep.mubr.bf16.mxu0 %v1171_v21  ;;  %v781_v19 = vpop.f32.mrf.mxu1  ;;  %2362 = vmatprep.subr.bf16.mxu0 %v3207_v7  ;;  %v669_v58 = vadd.f32 %v4027_v28, %v3969_v23 }
 0x1ba   :  { %v928_v30 = vmul.f32 0.2, %v780_v33  ;;  %v782_v35 = vadd.f32 %v781_v19, %v4053_v18  ;;  %1865 = vmatprep.mubr.bf16.mxu1 %v1153_v45  ;;  %v1053_v36 = vmax.f32 %v778_v32, %v925_v40  ;;  %2363 = vmatpush2.bf16.msra.mxu0 %v3205_v2  ;;  %v1099_v32 = vmax.f32 %v645_v17, %v971_v44 }
 0x1bb   :  { %v785_v26 = vpop.f32.mrf.mxu1 }
 0x1bc   :  { %v929_v50 = vmul.f32 0.2, %v782_v35  ;;  %1866 = vmatmul.mubr.bf16.gmra.mxu1 %v1152_v9  ;;  %v1056_v60 = vmax.f32 %v780_v33, %v928_v30  ;;  %v786_v8 = vadd.f32 %v785_v26, %v4050_v16  ;;  %v983_v33 = vmul.f32 0.2, %v659_v46 }
 0x1bd   :  { %v787_v10 = vpop.f32.mrf.mxu1  ;;  %v1179_v38 = vpack.c.bf16 %v1103_v34, %v1099_v32 }
 0x1be   :  { %v1057_v51 = vmax.f32 %v782_v35, %v929_v50  ;;  %v788_v54 = vadd.f32 %v787_v10, %v4053_v18  ;;  %v1156_v57 = vpack.c.bf16 %v1056_v60, %v1052_v3  ;;  %v932_v5 = vmul.f32 0.2, %v786_v8 }
 0x1bf   :  { %v789_v6 = vpop.f32.mrf.mxu1  ;;  %v1111_v7 = vmax.f32 %v659_v46, %v983_v33  ;;  %v665_v60 = vadd.f32 %v4014_v63, %v3969_v23 }
 0x1c0   :  { %v790_v25 = vadd.f32 %v789_v6, %v4050_v16  ;;  %1723 = vmatmul.mubr.bf16.gmra.mxu0 %v3965_v20  ;;  %v1157_v11 = vpack.c.bf16 %v1057_v51, %v1053_v36  ;;  %v933_v62 = vmul.f32 0.2, %v788_v54  ;;  %v3210_v20 = vld [vmem:[%s4828_s6 + $0xb4] ss:$8 sps:$4 sm:$0xff]   ;;  %v1060_v19 = vmax.f32 %v786_v8, %v932_v5 }
 0x1c1   :  { %1732 = vmatprep.mubr.bf16.mxu0 %v1175_v4  ;;  %v791_v59 = vpop.f32.mrf.mxu1  ;;  %2364 = vmatprep.subr.bf16.mxu0 %v3210_v20  ;;  %v1107_v36 = vmax.f32 %v655_v27, %v979_v22  ;;  %v991_v4 = vmul.f32 0.2, %v669_v58  ;;  %v987_v63 = vmul.f32 0.2, %v665_v60  ;;  %v3214_v20 = vld [vmem:[%s4828_s6 + $0x90] ss:$8 sps:$4 sm:$0xff]   ;;  %v675_v27 = vadd.f32 %v4033_v49, %v3969_v23 }
 0x1c2   :  { %v936_v61 = vmul.f32 0.2, %v790_v25  ;;  %v792_v13 = vadd.f32 %v791_v59, %v4053_v18  ;;  %1875 = vmatprep.mubr.bf16.mxu1 %v1157_v11  ;;  %v1061_v21 = vmax.f32 %v788_v54, %v933_v62  ;;  %2365 = vmatpush2.bf16.msra.mxu0 %v3208_v52 }
 0x1c3   :  { %v795_v39 = vpop.f32.mrf.mxu1  ;;  %v1183_v8 = vpack.c.bf16 %v1111_v7, %v1107_v36  ;;  %v1119_v46 = vmax.f32 %v669_v58, %v991_v4  ;;  %v1115_v32 = vmax.f32 %v665_v60, %v987_v63 }
 0x1c4   :  { %v937_v56 = vmul.f32 0.2, %v792_v13  ;;  %1876 = vmatmul.mubr.bf16.gmra.mxu1 %v1156_v57  ;;  %v1064_v24 = vmax.f32 %v790_v25, %v936_v61  ;;  %v796_v9 = vadd.f32 %v795_v39, %v4050_v16  ;;  %v679_v39 = vadd.f32 %v4047_v15, %v3969_v23 }
 0x1c5   :  { %v797_v37 = vpop.f32.mrf.mxu1  ;;  %v995_v23 = vmul.f32 0.2, %v675_v27 }
 0x1c6   :  { %v1065_v29 = vmax.f32 %v792_v13, %v937_v56  ;;  %v798_v42 = vadd.f32 %v797_v37, %v4053_v18  ;;  %v1160_v41 = vpack.c.bf16 %v1064_v24, %v1060_v19  ;;  %v940_v17 = vmul.f32 0.2, %v796_v9 }
 0x1c7   :  { %v799_v45 = vpop.f32.mrf.mxu1  ;;  %v1123_v58 = vmax.f32 %v675_v27, %v995_v23 }
 0x1c8   :  { %v800_v40 = vadd.f32 %v799_v45, %v4050_v16  ;;  %1733 = vmatmul.mubr.bf16.gmra.mxu0 %v3981_v47  ;;  %v1161_v30 = vpack.c.bf16 %v1065_v29, %v1061_v21  ;;  %v941_v1 = vmul.f32 0.2, %v798_v42  ;;  %v3213_v47 = vld [vmem:[%s4828_s6 + $0xa4] ss:$8 sps:$4 sm:$0xff]   ;;  %v1068_v25 = vmax.f32 %v796_v9, %v940_v17 }
 0x1c9   :  { %1742 = vmatprep.mubr.bf16.mxu0 %v1179_v38  ;;  %v801_v35 = vpop.f32.mrf.mxu1  ;;  %2366 = vmatprep.subr.bf16.mxu0 %v3213_v47  ;;  %v1187_v38 = vpack.c.bf16 %v1119_v46, %v1115_v32 }
 0x1ca   :  { %v944_v26 = vmul.f32 0.2, %v800_v40  ;;  %v802_v2 = vadd.f32 %v801_v35, %v4053_v18  ;;  %1885 = vmatprep.mubr.bf16.mxu1 %v1161_v30  ;;  %v1069_v54 = vmax.f32 %v798_v42, %v941_v1  ;;  %2367 = vmatpush2.bf16.msra.mxu0 %v3211_v43  ;;  %v999_v42 = vmul.f32 0.2, %v679_v39 }
 0x1cb   :  { %v805_v50 = vpop.f32.mrf.mxu1 }
 0x1cc   :  { %v945_v10 = vmul.f32 0.2, %v802_v2  ;;  %1886 = vmatmul.mubr.bf16.gmra.mxu1 %v1160_v41  ;;  %v1072_v28 = vmax.f32 %v800_v40, %v944_v26  ;;  %v806_v11 = vadd.f32 %v805_v50, %v4050_v16  ;;  %v1127_v1 = vmax.f32 %v679_v39, %v999_v42 }
 0x1cd   :  { %v807_v51 = vpop.f32.mrf.mxu1 }
 0x1ce   :  { %v1073_v55 = vmax.f32 %v802_v2, %v945_v10  ;;  %v808_v6 = vadd.f32 %v807_v51, %v4053_v18  ;;  %v1164_v62 = vpack.c.bf16 %v1072_v28, %v1068_v25  ;;  %v948_v5 = vmul.f32 0.2, %v806_v11  ;;  %v3219_v10 = vld [vmem:[%s4828_s6 + $0x84] ss:$8 sps:$4 sm:$0xff]  }
 0x1cf   :  { %v809_v3 = vpop.f32.mrf.mxu1  ;;  %v1191_v51 = vpack.c.bf16 %v1127_v1, %v1123_v58 }
 0x1d0   :  { %v810_v44 = vadd.f32 %v809_v3, %v4050_v16  ;;  %1743 = vmatmul.mubr.bf16.gmra.mxu0 %v3999_v31  ;;  %v1165_v59 = vpack.c.bf16 %v1073_v55, %v1069_v54  ;;  %v949_v61 = vmul.f32 0.2, %v808_v6  ;;  %v3216_v31 = vld [vmem:[%s4828_s6 + $0x94] ss:$8 sps:$4 sm:$0xff]   ;;  %v1076_v19 = vmax.f32 %v806_v11, %v948_v5  ;;  %v3217_v54 = vld [vmem:[%s4828_s6 + $0x80] ss:$8 sps:$4 sm:$0xff]  }
 0x1d1   :  { %1752 = vmatprep.mubr.bf16.mxu0 %v1183_v8  ;;  %v811_v57 = vpop.f32.mrf.mxu1  ;;  %2368 = vmatprep.subr.bf16.mxu0 %v3216_v31 }
 0x1d2   :  { %v952_v13 = vmul.f32 0.2, %v810_v44  ;;  %v812_v34 = vadd.f32 %v811_v57, %v4053_v18  ;;  %1895 = vmatprep.mubr.bf16.mxu1 %v1165_v59  ;;  %v1077_v21 = vmax.f32 %v808_v6, %v949_v61  ;;  %2369 = vmatpush2.bf16.msra.mxu0 %v3214_v20 }
 0x1d3   :  { %v815_v52 = vpop.f32.mrf.mxu1  ;;  %2370 = vmatprep.subr.bf16.mxu0 %v3219_v10 }
 0x1d4   :  { %v953_v56 = vmul.f32 0.2, %v812_v34  ;;  %1896 = vmatmul.mubr.bf16.gmra.mxu1 %v1164_v62  ;;  %v1080_v15 = vmax.f32 %v810_v44, %v952_v13  ;;  %v816_v33 = vadd.f32 %v815_v52, %v4050_v16 }
 0x1d5   :  { %v817_v37 = vpop.f32.mrf.mxu1 }
 0x1d6   :  { %v1081_v24 = vmax.f32 %v812_v34, %v953_v56  ;;  %v818_v29 = vadd.f32 %v817_v37, %v4053_v18  ;;  %v1168_v30 = vpack.c.bf16 %v1080_v15, %v1076_v19  ;;  %v956_v26 = vmul.f32 0.2, %v816_v33  ;;  %2371 = vmatpush2.bf16.msra.mxu0 %v3217_v54 }
 0x1d7   :  { %v819_v45 = vpop.f32.mrf.mxu1 }
 0x1d8   :  { %v820_v9 = vadd.f32 %v819_v45, %v4050_v16  ;;  %1753 = vmatmul.mubr.bf16.gmra.mxu0 %v4020_v12  ;;  %v1169_v40 = vpack.c.bf16 %v1081_v24, %v1077_v21  ;;  %v957_v22 = vmul.f32 0.2, %v818_v29  ;;  %v1084_v36 = vmax.f32 %v816_v33, %v956_v26 }
 0x1d9   :  { %1762 = vmatprep.mubr.bf16.mxu0 %v1187_v38  ;;  %v821_v49 = vpop.f32.mrf.mxu1 }
 0x1da   :  { %v960_v35 = vmul.f32 0.2, %v820_v9  ;;  %v822_v41 = vadd.f32 %v821_v49, %v4053_v18  ;;  %1905 = vmatprep.mubr.bf16.mxu1 %v1169_v40  ;;  %v1085_v43 = vmax.f32 %v818_v29, %v957_v22 }
 0x1db   :  { %v825_v2 = vpop.f32.mrf.mxu1 }
 0x1dc   :  { %v961_v7 = vmul.f32 0.2, %v822_v41  ;;  %1906 = vmatmul.mubr.bf16.gmra.mxu1 %v1168_v30  ;;  %v1088_v47 = vmax.f32 %v820_v9, %v960_v35  ;;  %v826_v28 = vadd.f32 %v825_v2, %v4050_v16 }
 0x1dd   :  { %v827_v50 = vpop.f32.mrf.mxu1 }
 0x1de   :  { %v1089_v12 = vmax.f32 %v822_v41, %v961_v7  ;;  %v828_v17 = vadd.f32 %v827_v50, %v4053_v18  ;;  %v1172_v3 = vpack.c.bf16 %v1088_v47, %v1084_v36  ;;  %v964_v59 = vmul.f32 0.2, %v826_v28 }
 0x1df   :  { %v829_v60 = vpop.f32.mrf.mxu1 }
 0x1e0   :  { %v830_v55 = vadd.f32 %v829_v60, %v4050_v16  ;;  %1763 = vmatmul.mubr.bf16.gmra.mxu0 %v4043_v0  ;;  %v1173_v6 = vpack.c.bf16 %v1089_v12, %v1085_v43  ;;  %v965_v8 = vmul.f32 0.2, %v828_v17  ;;  %v1092_v46 = vmax.f32 %v826_v28, %v964_v59 }
 0x1e1   :  { %1772 = vmatprep.mubr.bf16.mxu0 %v1191_v51  ;;  %v831_v4 = vpop.f32.mrf.mxu1 }
 0x1e2   :  { %v968_v25 = vmul.f32 0.2, %v830_v55  ;;  %v832_v11 = vadd.f32 %v831_v4, %v4053_v18  ;;  %1915 = vmatprep.mubr.bf16.mxu1 %v1173_v6  ;;  %v1093_v62 = vmax.f32 %v828_v17, %v965_v8 }
 0x1e3   :  { %v835_v44 = vpop.f32.mrf.mxu1 }
 0x1e4   :  { %v969_v63 = vmul.f32 0.2, %v832_v11  ;;  %1916 = vmatmul.mubr.bf16.gmra.mxu1 %v1172_v3  ;;  %v1096_v61 = vmax.f32 %v830_v55, %v968_v25  ;;  %v836_v39 = vadd.f32 %v835_v44, %v4050_v16 }
 0x1e5   :  { %v837_v57 = vpop.f32.mrf.mxu1 }
 0x1e6   :  { %v1097_v13 = vmax.f32 %v832_v11, %v969_v63  ;;  %v838_v0 = vadd.f32 %v837_v57, %v4053_v18  ;;  %v1176_v5 = vpack.c.bf16 %v1096_v61, %v1092_v46  ;;  %v972_v21 = vmul.f32 0.2, %v836_v39 }
 0x1e7   :  { %v839_v34 = vpop.f32.mrf.mxu1 }
 0x1e8   :  { %v840_v52 = vadd.f32 %v839_v34, %v4050_v16  ;;  %1773 = vmatmul.mubr.bf16.gmra.mxu0 %v4067_v53  ;;  %v1177_v20 = vpack.c.bf16 %v1097_v13, %v1093_v62  ;;  %v973_v56 = vmul.f32 0.2, %v838_v0  ;;  %v1100_v53 = vmax.f32 %v836_v39, %v972_v21 }
 0x1e9   :  { %v841_v31 = vpop.f32.mrf.mxu1 }
 0x1ea   :  { %v976_v32 = vmul.f32 0.2, %v840_v52  ;;  %v842_v27 = vadd.f32 %v841_v31, %v4053_v18  ;;  %1925 = vmatprep.mubr.bf16.mxu1 %v1177_v20  ;;  %v1101_v29 = vmax.f32 %v838_v0, %v973_v56 }
 0x1eb   :  { %v845_v37 = vpop.f32.mrf.mxu1 }
 0x1ec   :  { %v977_v15 = vmul.f32 0.2, %v842_v27  ;;  %1926 = vmatmul.mubr.bf16.gmra.mxu1 %v1176_v5  ;;  %v1104_v42 = vmax.f32 %v840_v52, %v976_v32  ;;  %v846_v19 = vadd.f32 %v845_v37, %v4050_v16 }
 0x1ed   :  { %v847_v24 = vpop.f32.mrf.mxu1 }
 0x1ee   :  { %v1105_v33 = vmax.f32 %v842_v27, %v977_v15  ;;  %v848_v45 = vadd.f32 %v847_v24, %v4053_v18  ;;  %v1180_v49 = vpack.c.bf16 %v1104_v42, %v1100_v53  ;;  %v980_v1 = vmul.f32 0.2, %v846_v19 }
 0x1ef   :  { %v849_v38 = vpop.f32.mrf.mxu1 }
 0x1f0   :  { %v850_v9 = vadd.f32 %v849_v38, %v4050_v16  ;;  %v1181_v40 = vpack.c.bf16 %v1105_v33, %v1101_v29  ;;  %v981_v30 = vmul.f32 0.2, %v848_v45  ;;  %v1108_v12 = vmax.f32 %v846_v19, %v980_v1 }
 0x1f1   :  { %v851_v23 = vpop.f32.mrf.mxu1 }
 0x1f2   :  { %v984_v22 = vmul.f32 0.2, %v850_v9  ;;  %v852_v35 = vadd.f32 %v851_v23, %v4053_v18  ;;  %1935 = vmatprep.mubr.bf16.mxu1 %v1181_v40  ;;  %v1109_v7 = vmax.f32 %v848_v45, %v981_v30  ;;  %v1258_v30 = vld [vmem:[%s4829_s5] sm:$0x3] }
 0x1f3   :  { %v855_v41 = vpop.f32.mrf.mxu1  ;;  %v4317_v1 = vrot.slane %v1258_v30, %v3926_v48 }
 0x1f4   :  { %v985_v26 = vmul.f32 0.2, %v852_v35  ;;  %1936 = vmatmul.mubr.bf16.gmra.mxu1 %v1180_v49  ;;  %v1112_v58 = vmax.f32 %v850_v9, %v984_v22  ;;  %v856_v17 = vadd.f32 %v855_v41, %v4050_v16  ;;  %v4314_v41 = vrot.slane %v1258_v30, %v3960_v14 }
 0x1f5   :  { %v857_v2 = vpop.f32.mrf.mxu1 }
 0x1f6   :  { %v1113_v50 = vmax.f32 %v852_v35, %v985_v26  ;;  %v858_v43 = vadd.f32 %v857_v2, %v4053_v18  ;;  %v1184_v51 = vpack.c.bf16 %v1112_v58, %v1108_v12  ;;  %v988_v4 = vmul.f32 0.2, %v856_v17 }
 0x1f7   :  { %v859_v47 = vpop.f32.mrf.mxu1 }
 0x1f8   :  { %v860_v10 = vadd.f32 %v859_v47, %v4050_v16  ;;  %v1185_v36 = vpack.c.bf16 %v1113_v50, %v1109_v7  ;;  %v989_v54 = vmul.f32 0.2, %v858_v43  ;;  %v1116_v57 = vmax.f32 %v856_v17, %v988_v4 }
 0x1f9   :  { %v861_v60 = vpop.f32.mrf.mxu1 }
 0x1fa   :  { %v992_v28 = vmul.f32 0.2, %v860_v10  ;;  %v862_v55 = vadd.f32 %v861_v60, %v4053_v18  ;;  %1945 = vmatprep.mubr.bf16.mxu1 %v1185_v36  ;;  %v1117_v25 = vmax.f32 %v858_v43, %v989_v54 }
 0x1fb   :  { %v865_v6 = vpop.f32.mrf.mxu1 }
 0x1fc   :  { %v993_v3 = vmul.f32 0.2, %v862_v55  ;;  %1946 = vmatmul.mubr.bf16.gmra.mxu1 %v1184_v51  ;;  %v1120_v11 = vmax.f32 %v860_v10, %v992_v28  ;;  %v866_v62 = vadd.f32 %v865_v6, %v4050_v16 }
 0x1fd   :  { %v867_v8 = vpop.f32.mrf.mxu1 }
 0x1fe   :  { %v1121_v44 = vmax.f32 %v862_v55, %v993_v3  ;;  %v868_v59 = vadd.f32 %v867_v8, %v4053_v18  ;;  %v1188_v34 = vpack.c.bf16 %v1120_v11, %v1116_v57  ;;  %v996_v20 = vmul.f32 0.2, %v866_v62 }
 0x1ff   :  { %v869_v63 = vpop.f32.mrf.mxu1 }
 0x200   :  { %v870_v61 = vadd.f32 %v869_v63, %v4050_v16  ;;  %v1189_v13 = vpack.c.bf16 %v1121_v44, %v1117_v25  ;;  %v997_v46 = vmul.f32 0.2, %v868_v59  ;;  %v1124_v27 = vmax.f32 %v866_v62, %v996_v20 }
 0x201   :  { %v871_v0 = vpop.f32.mrf.mxu1 }
 0x202   :  { %v1000_v39 = vmul.f32 0.2, %v870_v61  ;;  %v872_v52 = vadd.f32 %v871_v0, %v4053_v18  ;;  %1955 = vmatprep.mubr.bf16.mxu1 %v1189_v13  ;;  %v1125_v5 = vmax.f32 %v868_v59, %v997_v46 }
 0x204   :  { %v1001_v31 = vmul.f32 0.2, %v872_v52  ;;  %1956 = vmatmul.mubr.bf16.gmra.mxu1 %v1188_v34  ;;  %v1128_v56 = vmax.f32 %v870_v61, %v1000_v39 }
 0x206   :  { %v1129_v32 = vmax.f32 %v872_v52, %v1001_v31  ;;  %v1192_v21 = vpack.c.bf16 %v1128_v56, %v1124_v27 }
 0x208   :  { %v1193_v37 = vpack.c.bf16 %v1129_v32, %v1125_v5 }
 0x20a   :  { %1965 = vmatprep.mubr.bf16.mxu1 %v1193_v37 }
 0x20c   :  { %1966 = vmatmul.mubr.bf16.gmra.mxu1 %v1192_v21 }
 0x22f   :  { %v1624_v16 = vpop.f32.mrf.mxu0 }
 0x230   :  { %v1625_v50 = vadd.f32 %v1624_v16, %v4317_v1 }
 0x231   :  { %v1626_v15 = vpop.f32.mrf.mxu0 }
 0x232   :  { %v1627_v58 = vadd.f32 %v1626_v15, %v4314_v41 }
 0x233   :  { %v1628_v24 = vpop.f32.mrf.mxu0 }
 0x234   :  { %v1629_v12 = vadd.f32 %v1628_v24, %v4317_v1 }
 0x235   :  { %v1630_v29 = vpop.f32.mrf.mxu0 }
 0x236   :  { %v1631_v51 = vadd.f32 %v1630_v29, %v4314_v41 }
 0x238   :  { %v1634_v42 = vpop.f32.mrf.mxu0 }
 0x239   :  { %v1635_v61 = vadd.f32 %v1634_v42, %v4317_v1 }
 0x23a   :  { %v1636_v33 = vpop.f32.mrf.mxu0 }
 0x23b   :  { %v1637_v59 = vadd.f32 %v1636_v33, %v4314_v41 }
 0x23c   :  { %v1638_v45 = vpop.f32.mrf.mxu0 }
 0x23d   :  { %v1639_v13 = vadd.f32 %v1638_v45, %v4317_v1 }
 0x23e   :  { %v1640_v18 = vpop.f32.mrf.mxu0 }
 0x23f   :  { %v1641_v31 = vadd.f32 %v1640_v18, %v4314_v41 }
 0x240   :  { %v4292_v38 = vpop.f32.mrf.mxu0 }
 0x242   :  { %v4294_v53 = vpop.f32.mrf.mxu0 }
 0x243   :  { %v1647_v18 = vadd.f32 %v4294_v53, %v4314_v41 }
 0x244   :  { %v4296_v19 = vpop.f32.mrf.mxu0 }
 0x246   :  { %v4298_v9 = vpop.f32.mrf.mxu0 }
 0x248   :  { %v4300_v40 = vpop.f32.mrf.mxu0 }
 0x24a   :  { %v4302_v23 = vpop.f32.mrf.mxu0 }
 0x24c   :  { %v4304_v49 = vpop.f32.mrf.mxu0 }
 0x24e   :  { %v4309_v22 = vpop.f32.mrf.mxu0 }
 0x250   :  { %v4311_v35 = vpop.f32.mrf.mxu0 }
 0x252   :  { %v4319_v26 = vpop.f32.mrf.mxu0 }
 0x254   :  { %v4321_v2 = vpop.f32.mrf.mxu0  ;;  %v1817_v7 = vpop.f32.mrf.mxu1 }
 0x255   :  { %v1818_v10 = vadd.f32 %v1817_v7, %v1625_v50  ;;  %v1649_v50 = vadd.f32 %v4296_v19, %v4317_v1 }
 0x256   :  { %v4325_v43 = vpop.f32.mrf.mxu0  ;;  %v1819_v47 = vpop.f32.mrf.mxu1 }
 0x257   :  { %v1820_v17 = vadd.f32 %v1819_v47, %v1627_v58  ;;  %v1976_v8 = vmul.f32 0.2, %v1818_v10  ;;  %v1645_v58 = vadd.f32 %v4292_v38, %v4317_v1 }
 0x258   :  { %v4328_v36 = vpop.f32.mrf.mxu0  ;;  %v1821_v60 = vpop.f32.mrf.mxu1 }
 0x259   :  { %v1822_v54 = vadd.f32 %v1821_v60, %v1629_v12  ;;  %v1977_v6 = vmul.f32 0.2, %v1820_v17  ;;  %v2040_v46 = vmax.f32 %v1818_v10, %v1976_v8 }
 0x25a   :  { %v4331_v28 = vpop.f32.mrf.mxu0  ;;  %v1823_v55 = vpop.f32.mrf.mxu1 }
 0x25b   :  { %v1978_v4 = vmul.f32 0.2, %v1822_v54  ;;  %v1824_v3 = vadd.f32 %v1823_v55, %v1631_v51  ;;  %v2041_v0 = vmax.f32 %v1820_v17, %v1977_v6 }
 0x25c   :  { %v4333_v25 = vpop.f32.mrf.mxu0  ;;  %v1827_v11 = vpop.f32.mrf.mxu1 }
 0x25d   :  { %v1979_v44 = vmul.f32 0.2, %v1824_v3  ;;  %v2042_v63 = vmax.f32 %v1822_v54, %v1978_v4  ;;  %v1828_v5 = vadd.f32 %v1827_v11, %v1635_v61  ;;  %v1651_v54 = vadd.f32 %v4298_v9, %v4314_v41 }
 0x25e   :  { %v4336_v57 = vpop.f32.mrf.mxu0  ;;  %v1829_v62 = vpop.f32.mrf.mxu1  ;;  %v1657_v9 = vadd.f32 %v4302_v23, %v4314_v41 }
 0x25f   :  { %v2043_v34 = vmax.f32 %v1824_v3, %v1979_v44  ;;  %v1830_v39 = vadd.f32 %v1829_v62, %v1637_v59  ;;  %v2104_v27 = vpack.c.bf16 %v2042_v63, %v2040_v46  ;;  %v1980_v33 = vmul.f32 0.2, %v1828_v5 }
 0x260   :  { %v4340_v52 = vpop.f32.mrf.mxu0  ;;  %v1831_v20 = vpop.f32.mrf.mxu1  ;;  %v1659_v46 = vadd.f32 %v4304_v49, %v4317_v1 }
 0x261   :  { %v1832_v56 = vadd.f32 %v1831_v20, %v1639_v13  ;;  %v2105_v32 = vpack.c.bf16 %v2043_v34, %v2041_v0  ;;  %v1981_v24 = vmul.f32 0.2, %v1830_v39  ;;  %v2044_v53 = vmax.f32 %v1828_v5, %v1980_v33 }
 0x262   :  { %v4343_v37 = vpop.f32.mrf.mxu0  ;;  %v1833_v21 = vpop.f32.mrf.mxu1  ;;  %v1655_v34 = vadd.f32 %v4300_v40, %v4317_v1 }
 0x263   :  { %v1982_v16 = vmul.f32 0.2, %v1832_v56  ;;  %v1834_v15 = vadd.f32 %v1833_v21, %v1641_v31  ;;  %2372 = vmatprep.mubr.bf16.mxu0 %v2105_v32  ;;  %v2045_v17 = vmax.f32 %v1830_v39, %v1981_v24 }
 0x264   :  { %v4345_v29 = vpop.f32.mrf.mxu0  ;;  %v1837_v42 = vpop.f32.mrf.mxu1  ;;  %2373 = vmatmul.mubr.bf16.vlgmr.msra.gmra.mxu0 %v2104_v27  ;;  %v1661_v27 = vadd.f32 %v4309_v22, %v4314_v41 }
 0x265   :  { %v1983_v45 = vmul.f32 0.2, %v1834_v15  ;;  %v2046_v47 = vmax.f32 %v1832_v56, %v1982_v16  ;;  %v1838_v55 = vadd.f32 %v1837_v42, %v1645_v58  ;;  %v1667_v58 = vadd.f32 %v4319_v26, %v4314_v41 }
 0x266   :  { %v4349_v30 = vpop.f32.mrf.mxu0  ;;  %v1839_v7 = vpop.f32.mrf.mxu1  ;;  %v1671_v26 = vadd.f32 %v4325_v43, %v4314_v41  ;;  %v1675_v43 = vadd.f32 %v4328_v36, %v4317_v1 }
 0x267   :  { %v2047_v12 = vmax.f32 %v1834_v15, %v1983_v45  ;;  %v1840_v10 = vadd.f32 %v1839_v7, %v1647_v18  ;;  %v2106_v19 = vpack.c.bf16 %v2046_v47, %v2044_v53  ;;  %v1984_v62 = vmul.f32 0.2, %v1838_v55 }
 0x268   :  { %v4355_v60 = vpop.f32.mrf.mxu0  ;;  %v1841_v51 = vpop.f32.mrf.mxu1  ;;  %v1665_v47 = vadd.f32 %v4311_v35, %v4317_v1 }
 0x269   :  { %v1842_v6 = vadd.f32 %v1841_v51, %v1649_v50  ;;  %v2107_v38 = vpack.c.bf16 %v2047_v12, %v2045_v17  ;;  %v1985_v44 = vmul.f32 0.2, %v1840_v10  ;;  %v2048_v23 = vmax.f32 %v1838_v55, %v1984_v62 }
 0x26a   :  { %v4359_v4 = vpop.f32.mrf.mxu0  ;;  %v1843_v3 = vpop.f32.mrf.mxu1 }
 0x26b   :  { %v1986_v8 = vmul.f32 0.2, %v1842_v6  ;;  %v1844_v11 = vadd.f32 %v1843_v3, %v1651_v54  ;;  %2382 = vmatprep.mubr.bf16.mxu0 %v2107_v38  ;;  %v2049_v31 = vmax.f32 %v1840_v10, %v1985_v44  ;;  %v1669_v10 = vadd.f32 %v4321_v2, %v4317_v1 }
 0x26c   :  { %v4361_v59 = vpop.f32.mrf.mxu0  ;;  %v1847_v63 = vpop.f32.mrf.mxu1  ;;  %2383 = vmatmul.mubr.bf16.gmra.mxu0 %v2106_v19 }
 0x26d   :  { %v1987_v61 = vmul.f32 0.2, %v1844_v11  ;;  %v2050_v39 = vmax.f32 %v1842_v6, %v1986_v8  ;;  %v1848_v21 = vadd.f32 %v1847_v63, %v1655_v34 }
 0x26e   :  { %v4365_v13 = vpop.f32.mrf.mxu0  ;;  %v1849_v0 = vpop.f32.mrf.mxu1 }
 0x26f   :  { %v2051_v20 = vmax.f32 %v1844_v11, %v1987_v61  ;;  %v1850_v5 = vadd.f32 %v1849_v0, %v1657_v9  ;;  %v2108_v49 = vpack.c.bf16 %v2050_v39, %v2048_v23  ;;  %v1988_v50 = vmul.f32 0.2, %v1848_v21 }
 0x270   :  { %v4371_v56 = vpop.f32.mrf.mxu0  ;;  %v1851_v32 = vpop.f32.mrf.mxu1  ;;  %v1677_v39 = vadd.f32 %v4331_v28, %v4314_v41 }
 0x271   :  { %v1852_v16 = vadd.f32 %v1851_v32, %v1659_v46  ;;  %v2109_v40 = vpack.c.bf16 %v2051_v20, %v2049_v31  ;;  %v1989_v45 = vmul.f32 0.2, %v1850_v5  ;;  %v2052_v38 = vmax.f32 %v1848_v21, %v1988_v50 }
 0x272   :  { %v4375_v15 = vpop.f32.mrf.mxu0  ;;  %v1853_v24 = vpop.f32.mrf.mxu1  ;;  %v1681_v21 = vadd.f32 %v4336_v57, %v4314_v41 }
 0x273   :  { %v1990_v42 = vmul.f32 0.2, %v1852_v16  ;;  %v1854_v33 = vadd.f32 %v1853_v24, %v1661_v27  ;;  %2392 = vmatprep.mubr.bf16.mxu0 %v2109_v40  ;;  %v2053_v55 = vmax.f32 %v1850_v5, %v1989_v45  ;;  %v1679_v5 = vadd.f32 %v4333_v25, %v4317_v1 }
 0x274   :  { %v4377_v18 = vpop.f32.mrf.mxu0  ;;  %v1857_v7 = vpop.f32.mrf.mxu1  ;;  %2393 = vmatmul.mubr.bf16.gmra.mxu0 %v2108_v49 }
 0x275   :  { %v1991_v22 = vmul.f32 0.2, %v1854_v33  ;;  %v2054_v51 = vmax.f32 %v1852_v16, %v1990_v42  ;;  %v1858_v8 = vadd.f32 %v1857_v7, %v1665_v47 }
 0x276   :  { %v4383_v12 = vpop.f32.mrf.mxu0  ;;  %v1859_v17 = vpop.f32.mrf.mxu1 }
 0x277   :  { %v2055_v54 = vmax.f32 %v1854_v33, %v1991_v22  ;;  %v1860_v53 = vadd.f32 %v1859_v17, %v1667_v58  ;;  %v2110_v61 = vpack.c.bf16 %v2054_v51, %v2052_v38  ;;  %v1992_v34 = vmul.f32 0.2, %v1858_v8 }
 0x278   :  { %v4387_v6 = vpop.f32.mrf.mxu0  ;;  %v1861_v3 = vpop.f32.mrf.mxu1  ;;  %v1687_v51 = vadd.f32 %v4343_v37, %v4314_v41 }
 0x279   :  { %v1862_v11 = vadd.f32 %v1861_v3, %v1669_v10  ;;  %v2111_v44 = vpack.c.bf16 %v2055_v54, %v2053_v55  ;;  %v1993_v63 = vmul.f32 0.2, %v1860_v53  ;;  %v2056_v36 = vmax.f32 %v1858_v8, %v1992_v34 }
 0x27a   :  { %v4391_v35 = vpop.f32.mrf.mxu0  ;;  %v1863_v19 = vpop.f32.mrf.mxu1  ;;  %v1685_v10 = vadd.f32 %v4340_v52, %v4317_v1  ;;  %v1689_v55 = vadd.f32 %v4345_v29, %v4317_v1  ;;  %v1691_v8 = vadd.f32 %v4349_v30, %v4314_v41 }
 0x27b   :  { %v1994_v62 = vmul.f32 0.2, %v1862_v11  ;;  %v1864_v2 = vadd.f32 %v1863_v19, %v1671_v26  ;;  %2402 = vmatprep.mubr.bf16.mxu0 %v2111_v44  ;;  %v2057_v32 = vmax.f32 %v1860_v53, %v1993_v63 }
 0x27c   :  { %v4393_v9 = vpop.f32.mrf.mxu0  ;;  %v1867_v0 = vpop.f32.mrf.mxu1  ;;  %2403 = vmatmul.mubr.bf16.gmra.mxu0 %v2110_v61 }
 0x27d   :  { %v1995_v46 = vmul.f32 0.2, %v1864_v2  ;;  %v2058_v27 = vmax.f32 %v1862_v11, %v1994_v62  ;;  %v1868_v42 = vadd.f32 %v1867_v0, %v1675_v43 }
 0x27e   :  { %v4399_v20 = vpop.f32.mrf.mxu0  ;;  %v1869_v31 = vpop.f32.mrf.mxu1 }
 0x27f   :  { %v2059_v23 = vmax.f32 %v1864_v2, %v1995_v46  ;;  %v1870_v16 = vadd.f32 %v1869_v31, %v1677_v39  ;;  %v2112_v7 = vpack.c.bf16 %v2058_v27, %v2056_v36  ;;  %v1996_v57 = vmul.f32 0.2, %v1868_v42 }
 0x280   :  { %v4405_v24 = vpop.f32.mrf.mxu0  ;;  %v1871_v40 = vpop.f32.mrf.mxu1 }
 0x281   :  { %v1872_v33 = vadd.f32 %v1871_v40, %v1679_v5  ;;  %v2113_v28 = vpack.c.bf16 %v2059_v23, %v2057_v32  ;;  %v1997_v58 = vmul.f32 0.2, %v1870_v16  ;;  %v2060_v52 = vmax.f32 %v1868_v42, %v1996_v57 }
 0x282   :  { %v4407_v49 = vpop.f32.mrf.mxu0  ;;  %v1873_v45 = vpop.f32.mrf.mxu1  ;;  %v1695_v5 = vadd.f32 %v4355_v60, %v4317_v1  ;;  %v1697_v32 = vadd.f32 %v4359_v4, %v4314_v41  ;;  %v1701_v42 = vadd.f32 %v4365_v13, %v4314_v41  ;;  %v1705_v13 = vadd.f32 %v4371_v56, %v4317_v1 }
 0x283   :  { %v1998_v25 = vmul.f32 0.2, %v1872_v33  ;;  %v1874_v50 = vadd.f32 %v1873_v45, %v1681_v21  ;;  %2412 = vmatprep.mubr.bf16.mxu0 %v2113_v28  ;;  %v2061_v3 = vmax.f32 %v1870_v16, %v1997_v58  ;;  %v1699_v21 = vadd.f32 %v4361_v59, %v4317_v1 }
 0x284   :  { %v4409_v22 = vpop.f32.mrf.mxu0  ;;  %v1877_v47 = vpop.f32.mrf.mxu1  ;;  %2413 = vmatmul.mubr.bf16.gmra.mxu0 %v2112_v7 }
 0x285   :  { %v1999_v17 = vmul.f32 0.2, %v1874_v50  ;;  %v2062_v26 = vmax.f32 %v1872_v33, %v1998_v25  ;;  %v1878_v63 = vadd.f32 %v1877_v47, %v1685_v10 }
 0x286   :  { %v4415_v54 = vpop.f32.mrf.mxu0  ;;  %v1879_v53 = vpop.f32.mrf.mxu1 }
 0x287   :  { %v2063_v38 = vmax.f32 %v1874_v50, %v1999_v17  ;;  %v1880_v11 = vadd.f32 %v1879_v53, %v1687_v51  ;;  %v2114_v0 = vpack.c.bf16 %v2062_v26, %v2060_v52  ;;  %v2000_v30 = vmul.f32 0.2, %v1878_v63 }
 0x288   :  { %v4421_v19 = vpop.f32.mrf.mxu0  ;;  %v1881_v44 = vpop.f32.mrf.mxu1  ;;  %v1709_v26 = vadd.f32 %v4377_v18, %v4317_v1 }
 0x289   :  { %v1882_v62 = vadd.f32 %v1881_v44, %v1689_v55  ;;  %v2115_v37 = vpack.c.bf16 %v2063_v38, %v2061_v3  ;;  %v2001_v34 = vmul.f32 0.2, %v1880_v11  ;;  %v2064_v45 = vmax.f32 %v1878_v63, %v2000_v30 }
 0x28a   :  { %v4423_v2 = vpop.f32.mrf.mxu0  ;;  %v1883_v61 = vpop.f32.mrf.mxu1  ;;  %v1707_v55 = vadd.f32 %v4375_v15, %v4314_v41  ;;  %v1711_v44 = vadd.f32 %v4383_v12, %v4314_v41  ;;  %v1715_v12 = vadd.f32 %v4387_v6, %v4317_v1 }
 0x28b   :  { %v2002_v29 = vmul.f32 0.2, %v1882_v62  ;;  %v1884_v46 = vadd.f32 %v1883_v61, %v1691_v8  ;;  %2422 = vmatprep.mubr.bf16.mxu0 %v2115_v37  ;;  %v2065_v16 = vmax.f32 %v1880_v11, %v2001_v34 }
 0x28c   :  { %v4425_v43 = vpop.f32.mrf.mxu0  ;;  %v1887_v39 = vpop.f32.mrf.mxu1  ;;  %2423 = vmatmul.mubr.bf16.gmra.mxu0 %v2114_v0 }
 0x28d   :  { %v2003_v31 = vmul.f32 0.2, %v1884_v46  ;;  %v2066_v40 = vmax.f32 %v1882_v62, %v2002_v29  ;;  %v1888_v7 = vadd.f32 %v1887_v39, %v1695_v5 }
 0x28e   :  { %v4431_v27 = vpop.f32.mrf.mxu0  ;;  %v1889_v23 = vpop.f32.mrf.mxu1 }
 0x28f   :  { %v2067_v36 = vmax.f32 %v1884_v46, %v2003_v31  ;;  %v1890_v33 = vadd.f32 %v1889_v23, %v1697_v32  ;;  %v2116_v50 = vpack.c.bf16 %v2066_v40, %v2064_v45  ;;  %v2004_v10 = vmul.f32 0.2, %v1888_v7 }
 0x290   :  { %v1891_v28 = vpop.f32.mrf.mxu1  ;;  %v4437_v60 = vpop.f32.mrf.mxu0  ;;  %v1717_v32 = vadd.f32 %v4391_v35, %v4314_v41 }
 0x291   :  { %v1892_v58 = vadd.f32 %v1891_v28, %v1699_v21  ;;  %v2117_v4 = vpack.c.bf16 %v2067_v36, %v2065_v16  ;;  %v2005_v47 = vmul.f32 0.2, %v1890_v33  ;;  %v2068_v62 = vmax.f32 %v1888_v7, %v2004_v10 }
 0x292   :  { %v1893_v25 = vpop.f32.mrf.mxu1  ;;  %v4439_v51 = vpop.f32.mrf.mxu0  ;;  %v1719_v21 = vadd.f32 %v4393_v9, %v4317_v1 }
 0x293   :  { %v2006_v57 = vmul.f32 0.2, %v1892_v58  ;;  %v1894_v17 = vadd.f32 %v1893_v25, %v1701_v42  ;;  %2432 = vmatprep.mubr.bf16.mxu0 %v2117_v4  ;;  %v2069_v38 = vmax.f32 %v1890_v33, %v2005_v47  ;;  %v1721_v42 = vadd.f32 %v4399_v20, %v4314_v41 }
 0x294   :  { %v1897_v59 = vpop.f32.mrf.mxu1  ;;  %2433 = vmatmul.mubr.bf16.gmra.mxu0 %v2116_v50  ;;  %v4449_v37 = vpop.f32.mrf.mxu0  ;;  %v1725_v20 = vadd.f32 %v4405_v24, %v4317_v1 }
 0x295   :  { %v2007_v53 = vmul.f32 0.2, %v1894_v17  ;;  %v2070_v8 = vmax.f32 %v1892_v58, %v2006_v57  ;;  %v1898_v61 = vadd.f32 %v1897_v59, %v1705_v13 }
 0x296   :  { %v1899_v3 = vpop.f32.mrf.mxu1  ;;  %v4451_v31 = vpop.f32.mrf.mxu0 }
 0x297   :  { %v2071_v11 = vmax.f32 %v1894_v17, %v2007_v53  ;;  %v1900_v52 = vadd.f32 %v1899_v3, %v1707_v55  ;;  %v2118_v15 = vpack.c.bf16 %v2070_v8, %v2068_v62  ;;  %v2008_v30 = vmul.f32 0.2, %v1898_v61 }
 0x298   :  { %v1901_v63 = vpop.f32.mrf.mxu1  ;;  %v4461_v7 = vpop.f32.mrf.mxu0  ;;  %v1727_v53 = vadd.f32 %v4407_v49, %v4314_v41  ;;  %v1729_v55 = vadd.f32 %v4409_v22, %v4317_v1  ;;  %v1731_v8 = vadd.f32 %v4415_v54, %v4314_v41  ;;  %v1735_v54 = vadd.f32 %v4421_v19, %v4317_v1 }
 0x299   :  { %v1902_v56 = vadd.f32 %v1901_v63, %v1709_v26  ;;  %v2119_v0 = vpack.c.bf16 %v2071_v11, %v2069_v38  ;;  %v2009_v29 = vmul.f32 0.2, %v1900_v52  ;;  %v2072_v45 = vmax.f32 %v1898_v61, %v2008_v30 }
 0x29a   :  { %v1903_v34 = vpop.f32.mrf.mxu1  ;;  %v4463_v17 = vpop.f32.mrf.mxu0 }
 0x29b   :  { %v2010_v46 = vmul.f32 0.2, %v1902_v56  ;;  %v1904_v39 = vadd.f32 %v1903_v34, %v1711_v44  ;;  %2442 = vmatprep.mubr.bf16.mxu0 %v2119_v0  ;;  %v2073_v16 = vmax.f32 %v1900_v52, %v2009_v29 }
 0x29c   :  { %v1907_v18 = vpop.f32.mrf.mxu1  ;;  %2443 = vmatmul.mubr.bf16.gmra.mxu0 %v2118_v15  ;;  %v4473_v52 = vpop.f32.mrf.mxu0 }
 0x29d   :  { %v2011_v5 = vmul.f32 0.2, %v1904_v39  ;;  %v2074_v40 = vmax.f32 %v1902_v56, %v2010_v46  ;;  %v1908_v58 = vadd.f32 %v1907_v18, %v1715_v12  ;;  %v1737_v18 = vadd.f32 %v4423_v2, %v4314_v41 }
 0x29e   :  { %v1909_v23 = vpop.f32.mrf.mxu1  ;;  %v4475_v29 = vpop.f32.mrf.mxu0 }
 0x29f   :  { %v2075_v36 = vmax.f32 %v1904_v39, %v2011_v5  ;;  %v1910_v33 = vadd.f32 %v1909_v23, %v1717_v32  ;;  %v2120_v35 = vpack.c.bf16 %v2074_v40, %v2072_v45  ;;  %v2012_v59 = vmul.f32 0.2, %v1908_v58 }
 0x2a0   :  { %v1911_v28 = vpop.f32.mrf.mxu1  ;;  %v1739_v5 = vadd.f32 %v4425_v43, %v4317_v1 }
 0x2a1   :  { %v1912_v6 = vadd.f32 %v1911_v28, %v1719_v21  ;;  %v2121_v4 = vpack.c.bf16 %v2075_v36, %v2073_v16  ;;  %v2013_v50 = vmul.f32 0.2, %v1910_v33  ;;  %v2076_v63 = vmax.f32 %v1908_v58, %v2012_v59  ;;  %v4485_v36 = vpop.f32.mrf.mxu0 }
 0x2a2   :  { %v1913_v25 = vpop.f32.mrf.mxu1  ;;  %v1741_v21 = vadd.f32 %v4431_v27, %v4314_v41 }
 0x2a3   :  { %v2014_v47 = vmul.f32 0.2, %v1912_v6  ;;  %v1914_v57 = vadd.f32 %v1913_v25, %v1721_v42  ;;  %2452 = vmatprep.mubr.bf16.mxu0 %v2121_v4  ;;  %v2077_v3 = vmax.f32 %v1910_v33, %v2013_v50  ;;  %v1747_v25 = vadd.f32 %v4439_v51, %v4314_v41 }
 0x2a4   :  { %v1917_v9 = vpop.f32.mrf.mxu1  ;;  %2453 = vmatmul.mubr.bf16.gmra.mxu0 %v2120_v35  ;;  %v1766_v35 = vpop.f32.mrf.mxu0 }
 0x2a5   :  { %v2015_v10 = vmul.f32 0.2, %v1914_v57  ;;  %v2078_v26 = vmax.f32 %v1912_v6, %v2014_v47  ;;  %v1918_v62 = vadd.f32 %v1917_v9, %v1725_v20  ;;  %v1745_v47 = vadd.f32 %v4437_v60, %v4317_v1 }
 0x2a6   :  { %v1919_v13 = vpop.f32.mrf.mxu1  ;;  %v1768_v51 = vpop.f32.mrf.mxu0 }
 0x2a7   :  { %v2079_v38 = vmax.f32 %v1914_v57, %v2015_v10  ;;  %v1920_v11 = vadd.f32 %v1919_v13, %v1727_v53  ;;  %v2122_v49 = vpack.c.bf16 %v2078_v26, %v2076_v63  ;;  %v2016_v46 = vmul.f32 0.2, %v1918_v62 }
 0x2a8   :  { %v1921_v44 = vpop.f32.mrf.mxu1  ;;  %v1749_v57 = vadd.f32 %v4449_v37, %v4317_v1  ;;  %v1751_v13 = vadd.f32 %v4451_v31, %v4314_v41  ;;  %v1755_v31 = vadd.f32 %v4461_v7, %v4317_v1 }
 0x2a9   :  { %v1922_v24 = vadd.f32 %v1921_v44, %v1729_v55  ;;  %v2123_v61 = vpack.c.bf16 %v2079_v38, %v2077_v3  ;;  %v2017_v0 = vmul.f32 0.2, %v1920_v11  ;;  %v2080_v42 = vmax.f32 %v1918_v62, %v2016_v46 }
 0x2aa   :  { %v1923_v56 = vpop.f32.mrf.mxu1 }
 0x2ab   :  { %v2018_v34 = vmul.f32 0.2, %v1922_v24  ;;  %v1924_v15 = vadd.f32 %v1923_v56, %v1731_v8  ;;  %2462 = vmatprep.mubr.bf16.mxu0 %v2123_v61  ;;  %v2081_v12 = vmax.f32 %v1920_v11, %v2017_v0  ;;  %v1770_v61 = vpop.f32.mrf.mxu0  ;;  %v1759_v0 = vadd.f32 %v4473_v52, %v4317_v1 }
 0x2ac   :  { %v1927_v22 = vpop.f32.mrf.mxu1  ;;  %2463 = vmatmul.mubr.bf16.gmra.mxu0 %v2122_v49 }
 0x2ad   :  { %v2019_v39 = vmul.f32 0.2, %v1924_v15  ;;  %v2082_v32 = vmax.f32 %v1922_v24, %v2018_v34  ;;  %v1928_v33 = vadd.f32 %v1927_v22, %v1735_v54  ;;  %v1757_v24 = vadd.f32 %v4463_v17, %v4314_v41  ;;  %v1774_v17 = vpop.f32.mrf.mxu0 }
 0x2ae   :  { %v1929_v30 = vpop.f32.mrf.mxu1  ;;  %v1761_v54 = vadd.f32 %v4475_v29, %v4314_v41  ;;  %v1765_v29 = vadd.f32 %v4485_v36, %v4317_v1 }
 0x2af   :  { %v2083_v23 = vmax.f32 %v1924_v15, %v2019_v39  ;;  %v1930_v16 = vadd.f32 %v1929_v30, %v1737_v18  ;;  %v2124_v2 = vpack.c.bf16 %v2082_v32, %v2080_v42  ;;  %v2020_v27 = vmul.f32 0.2, %v1928_v33 }
 0x2b0   :  { %v1931_v40 = vpop.f32.mrf.mxu1  ;;  %v1767_v42 = vadd.f32 %v1766_v35, %v4314_v41 }
 0x2b1   :  { %v1932_v19 = vadd.f32 %v1931_v40, %v1739_v5  ;;  %v2125_v28 = vpack.c.bf16 %v2083_v23, %v2081_v12  ;;  %v2021_v58 = vmul.f32 0.2, %v1930_v16  ;;  %v2084_v3 = vmax.f32 %v1928_v33, %v2020_v27  ;;  %v1776_v33 = vpop.f32.mrf.mxu0 }
 0x2b2   :  { %v1933_v45 = vpop.f32.mrf.mxu1 }
 0x2b3   :  { %v2022_v6 = vmul.f32 0.2, %v1932_v19  ;;  %v1934_v4 = vadd.f32 %v1933_v45, %v1741_v21  ;;  %2472 = vmatprep.mubr.bf16.mxu0 %v2125_v28  ;;  %v2085_v59 = vmax.f32 %v1930_v16, %v2021_v58  ;;  %v1769_v45 = vadd.f32 %v1768_v51, %v4317_v1 }
 0x2b4   :  { %v1937_v43 = vpop.f32.mrf.mxu1  ;;  %2473 = vmatmul.mubr.bf16.gmra.mxu0 %v2124_v2 }
 0x2b5   :  { %v2023_v50 = vmul.f32 0.2, %v1934_v4  ;;  %v2086_v10 = vmax.f32 %v1932_v19, %v2022_v6  ;;  %v1938_v26 = vadd.f32 %v1937_v43, %v1745_v47 }
 0x2b6   :  { %v1939_v9 = vpop.f32.mrf.mxu1 }
 0x2b7   :  { %v2087_v20 = vmax.f32 %v1934_v4, %v2023_v50  ;;  %v1940_v53 = vadd.f32 %v1939_v9, %v1747_v25  ;;  %v2126_v44 = vpack.c.bf16 %v2086_v10, %v2084_v3  ;;  %v2024_v56 = vmul.f32 0.2, %v1938_v26  ;;  %v1778_v50 = vpop.f32.mrf.mxu0 }
 0x2b8   :  { %v1941_v55 = vpop.f32.mrf.mxu1  ;;  %v1771_v25 = vadd.f32 %v1770_v61, %v4314_v41 }
 0x2b9   :  { %v1942_v38 = vadd.f32 %v1941_v55, %v1749_v57  ;;  %v2127_v8 = vpack.c.bf16 %v2087_v20, %v2085_v59  ;;  %v2025_v60 = vmul.f32 0.2, %v1940_v53  ;;  %v2088_v30 = vmax.f32 %v1938_v26, %v2024_v56  ;;  %v1780_v51 = vpop.f32.mrf.mxu0 }
 0x2ba   :  { %v1943_v11 = vpop.f32.mrf.mxu1  ;;  %v1777_v55 = vadd.f32 %v1776_v33, %v4314_v41 }
 0x2bb   :  { %v2026_v63 = vmul.f32 0.2, %v1942_v38  ;;  %v1944_v62 = vadd.f32 %v1943_v11, %v1751_v13  ;;  %2482 = vmatprep.mubr.bf16.mxu0 %v2127_v8  ;;  %v2089_v15 = vmax.f32 %v1940_v53, %v2025_v60  ;;  %v1779_v8 = vadd.f32 %v1778_v50, %v4317_v1 }
 0x2bc   :  { %v1947_v37 = vpop.f32.mrf.mxu1  ;;  %2483 = vmatmul.mubr.bf16.gmra.mxu0 %v2126_v44 }
 0x2bd   :  { %v2027_v49 = vmul.f32 0.2, %v1944_v62  ;;  %v2090_v22 = vmax.f32 %v1942_v38, %v2026_v63  ;;  %v1948_v5 = vadd.f32 %v1947_v37, %v1755_v31  ;;  %v1775_v38 = vadd.f32 %v1774_v17, %v4317_v1 }
 0x2be   :  { %v1949_v34 = vpop.f32.mrf.mxu1  ;;  %v1781_v37 = vadd.f32 %v1780_v51, %v4314_v41 }
 0x2bf   :  { %v2091_v46 = vmax.f32 %v1944_v62, %v2027_v49  ;;  %v1950_v39 = vadd.f32 %v1949_v34, %v1757_v24  ;;  %v2128_v21 = vpack.c.bf16 %v2090_v22, %v2088_v30  ;;  %v2028_v19 = vmul.f32 0.2, %v1948_v5 }
 0x2c0   :  { %v1951_v18 = vpop.f32.mrf.mxu1 }
 0x2c1   :  { %v1952_v12 = vadd.f32 %v1951_v18, %v1759_v0  ;;  %v2129_v32 = vpack.c.bf16 %v2091_v46, %v2089_v15  ;;  %v2029_v7 = vmul.f32 0.2, %v1950_v39  ;;  %v2092_v47 = vmax.f32 %v1948_v5, %v2028_v19 }
 0x2c2   :  { %v1953_v23 = vpop.f32.mrf.mxu1 }
 0x2c3   :  { %v2030_v16 = vmul.f32 0.2, %v1952_v12  ;;  %v1954_v40 = vadd.f32 %v1953_v23, %v1761_v54  ;;  %2492 = vmatprep.mubr.bf16.mxu0 %v2129_v32  ;;  %v2093_v58 = vmax.f32 %v1950_v39, %v2029_v7 }
 0x2c4   :  { %v1957_v52 = vpop.f32.mrf.mxu1  ;;  %2493 = vmatmul.mubr.bf16.gmra.mxu0 %v2128_v21 }
 0x2c5   :  { %v2031_v28 = vmul.f32 0.2, %v1954_v40  ;;  %v2094_v6 = vmax.f32 %v1952_v12, %v2030_v16  ;;  %v1958_v35 = vadd.f32 %v1957_v52, %v1765_v29  ;;  %v2168_v12 = vld [vmem:[%s4830_s7] sm:$0x3] }
 0x2c6   :  { %v1959_v2 = vpop.f32.mrf.mxu1  ;;  %v4516_v32 = vrot.slane %v2168_v12, %v3926_v48  ;;  %v4519_v23 = vrot.slane %v2168_v12, %v3960_v14  ;;  %v2661_v16 = vld [vmem:[%s4831_s8] sm:$0x3] }
 0x2c7   :  { %v2095_v4 = vmax.f32 %v1954_v40, %v2031_v28  ;;  %v1960_v43 = vadd.f32 %v1959_v2, %v1767_v42  ;;  %v2130_v10 = vpack.c.bf16 %v2094_v6, %v2092_v47  ;;  %v2032_v3 = vmul.f32 0.2, %v1958_v35 }
 0x2c8   :  { %v1961_v27 = vpop.f32.mrf.mxu1  ;;  %v4527_v19 = vrot.slane %v2661_v16, %v3926_v48  ;;  %v4531_v2 = vrot.slane %v2661_v16, %v3960_v14  ;;  %v15_v14 = vstv %s4832_s9 }
 0x2c9   :  { %v1962_v57 = vadd.f32 %v1961_v27, %v1769_v45  ;;  %v2131_v9 = vpack.c.bf16 %v2095_v4, %v2093_v58  ;;  %v2033_v20 = vmul.f32 0.2, %v1960_v43  ;;  %v2096_v61 = vmax.f32 %v1958_v35, %v2032_v3  ;;  %16 = vst [vmem:[#allocation3] sm:$0x1] %v15_v14 }
 0x2ca   :  { %v1963_v59 = vpop.f32.mrf.mxu1 }
 0x2cb   :  { %v2034_v53 = vmul.f32 0.2, %v1962_v57  ;;  %v1964_v36 = vadd.f32 %v1963_v59, %v1771_v25  ;;  %2502 = vmatprep.mubr.bf16.mxu0 %v2131_v9  ;;  %v2097_v44 = vmax.f32 %v1960_v43, %v2033_v20 }
 0x2cc   :  { %v1967_v13 = vpop.f32.mrf.mxu1  ;;  %2503 = vmatmul.mubr.bf16.gmra.mxu0 %v2130_v10 }
 0x2cd   :  { %v2035_v26 = vmul.f32 0.2, %v1964_v36  ;;  %v2098_v60 = vmax.f32 %v1962_v57, %v2034_v53  ;;  %v1968_v56 = vadd.f32 %v1967_v13, %v1775_v38 }
 0x2ce   :  { %v1969_v11 = vpop.f32.mrf.mxu1 }
 0x2cf   :  { %v2099_v63 = vmax.f32 %v1964_v36, %v2035_v26  ;;  %v1970_v62 = vadd.f32 %v1969_v11, %v1777_v55  ;;  %v2132_v34 = vpack.c.bf16 %v2098_v60, %v2096_v61  ;;  %v2036_v39 = vmul.f32 0.2, %v1968_v56 }
 0x2d0   :  { %v1971_v24 = vpop.f32.mrf.mxu1 }
 0x2d1   :  { %v1972_v49 = vadd.f32 %v1971_v24, %v1779_v8  ;;  %v2133_v31 = vpack.c.bf16 %v2099_v63, %v2097_v44  ;;  %v2037_v15 = vmul.f32 0.2, %v1970_v62  ;;  %v2100_v30 = vmax.f32 %v1968_v56, %v2036_v39 }
 0x2d2   :  { %v1973_v0 = vpop.f32.mrf.mxu1 }
 0x2d3   :  { %v2038_v22 = vmul.f32 0.2, %v1972_v49  ;;  %v1974_v46 = vadd.f32 %v1973_v0, %v1781_v37  ;;  %2512 = vmatprep.mubr.bf16.mxu0 %v2133_v31  ;;  %v2101_v54 = vmax.f32 %v1970_v62, %v2037_v15 }
 0x2d4   :  { %2513 = vmatmul.mubr.bf16.gmra.mxu0 %v2132_v34 }
 0x2d5   :  { %v2039_v1 = vmul.f32 0.2, %v1974_v46  ;;  %v2102_v18 = vmax.f32 %v1972_v49, %v2038_v22 }
 0x2d7   :  { %v2103_v17 = vmax.f32 %v1974_v46, %v2039_v1  ;;  %v2134_v41 = vpack.c.bf16 %v2102_v18, %v2100_v30 }
 0x2d9   :  { %v2135_v5 = vpack.c.bf16 %v2103_v17, %v2101_v54 }
 0x2db   :  { %2522 = vmatprep.mubr.bf16.mxu0 %v2135_v5 }
 0x2dc   :  { %2523 = vmatmul.mubr.bf16.gmra.mxu0 %v2134_v41 }
 0x324   :  { %v2374_v21 = vpop.f32.mrf.mxu0 }
 0x325   :  { %v2375_v7 = vadd.f32 %v2374_v21, %v4516_v32 }
 0x326   :  { %v2376_v40 = vpop.f32.mrf.mxu0 }
 0x327   :  { %v2533_v52 = vmul.f32 0.2, %v2375_v7  ;;  %v2377_v42 = vadd.f32 %v2376_v40, %v4519_v23 }
 0x328   :  { %v2378_v33 = vpop.f32.mrf.mxu0 }
 0x329   :  { %v2597_v28 = vmax.f32 %v2375_v7, %v2533_v52  ;;  %v2534_v29 = vmul.f32 0.2, %v2377_v42  ;;  %v2379_v45 = vadd.f32 %v2378_v33, %v4516_v32 }
 0x32a   :  { %v2380_v58 = vpop.f32.mrf.mxu0 }
 0x32b   :  { %v2598_v6 = vmax.f32 %v2377_v42, %v2534_v29  ;;  %v2535_v4 = vmul.f32 0.2, %v2379_v45  ;;  %v2381_v43 = vadd.f32 %v2380_v58, %v4519_v23  ;;  %v2673_v47 = vmul.f32 %v4527_v19, %v2597_v28 }
 0x32c   :  { %v2384_v50 = vpop.f32.mrf.mxu0 }
 0x32d   :  { %v2599_v25 = vmax.f32 %v2379_v45, %v2535_v4  ;;  %v2536_v27 = vmul.f32 0.2, %v2381_v43  ;;  %v2674_v48 = vmul.f32 %v4531_v2, %v2598_v6  ;;  %v2385_v35 = vadd.f32 %v2384_v50, %v4516_v32 }
 0x32e   :  { %v2386_v9 = vpop.f32.mrf.mxu0 }
 0x32f   :  { %v2600_v57 = vmax.f32 %v2381_v43, %v2536_v27  ;;  %v2737_v59 = vadd.f32 %v2674_v48, %v2673_v47  ;;  %v2537_v10 = vmul.f32 0.2, %v2385_v35  ;;  %v2387_v20 = vadd.f32 %v2386_v9, %v4519_v23 }
 0x330   :  { %v2388_v53 = vpop.f32.mrf.mxu0  ;;  %v2675_v36 = vmul.f32 %v4527_v19, %v2599_v25 }
 0x331   :  { %2738 = vadd.xlane.f32.xlu0 %v2737_v59  ;;  %v2676_v13 = vmul.f32 %v4531_v2, %v2600_v57  ;;  %v2601_v55 = vmax.f32 %v2385_v35, %v2537_v10  ;;  %v2538_v51 = vmul.f32 0.2, %v2387_v20  ;;  %v2389_v3 = vadd.f32 %v2388_v53, %v4516_v32 }
 0x332   :  { %v2390_v26 = vpop.f32.mrf.mxu0 }
 0x333   :  { %v2740_v38 = vadd.f32 %v2676_v13, %v2675_v36  ;;  %v2602_v8 = vmax.f32 %v2387_v20, %v2538_v51  ;;  %v2539_v11 = vmul.f32 0.2, %v2389_v3  ;;  %v2391_v44 = vadd.f32 %v2390_v26, %v4519_v23 }
 0x334   :  { %v2394_v60 = vpop.f32.mrf.mxu0  ;;  %v2677_v63 = vmul.f32 %v4527_v19, %v2601_v55 }
 0x335   :  { %2741 = vadd.xlane.f32.xlu1 %v2740_v38  ;;  %v2603_v62 = vmax.f32 %v2389_v3, %v2539_v11  ;;  %v2540_v37 = vmul.f32 0.2, %v2391_v44  ;;  %v2395_v24 = vadd.f32 %v2394_v60, %v4516_v32  ;;  %v2678_v61 = vmul.f32 %v4531_v2, %v2602_v8 }
 0x336   :  { %v2396_v56 = vpop.f32.mrf.mxu0 }
 0x337   :  { %v2604_v49 = vmax.f32 %v2391_v44, %v2540_v37  ;;  %v2541_v31 = vmul.f32 0.2, %v2395_v24  ;;  %v2397_v0 = vadd.f32 %v2396_v56, %v4519_v23  ;;  %v2743_v34 = vadd.f32 %v2678_v61, %v2677_v63 }
 0x338   :  { %v2398_v15 = vpop.f32.mrf.mxu0  ;;  %v2679_v22 = vmul.f32 %v4527_v19, %v2603_v62 }
 0x339   :  { %v2605_v46 = vmax.f32 %v2395_v24, %v2541_v31  ;;  %v2542_v39 = vmul.f32 0.2, %v2397_v0  ;;  %v2399_v1 = vadd.f32 %v2398_v15, %v4516_v32  ;;  %2744 = vadd.xlane.f32.xlu0 %v2743_v34  ;;  %v2680_v54 = vmul.f32 %v4531_v2, %v2604_v49 }
 0x33a   :  { %v2400_v18 = vpop.f32.mrf.mxu0 }
 0x33b   :  { %v2606_v17 = vmax.f32 %v2397_v0, %v2542_v39  ;;  %v2543_v30 = vmul.f32 0.2, %v2399_v1  ;;  %v2401_v5 = vadd.f32 %v2400_v18, %v4519_v23  ;;  %v2746_v41 = vadd.f32 %v2680_v54, %v2679_v22 }
 0x33c   :  { %v2404_v12 = vpop.f32.mrf.mxu0  ;;  %v2681_v21 = vmul.f32 %v4527_v19, %v2605_v46 }
 0x33d   :  { %v2607_v7 = vmax.f32 %v2399_v1, %v2543_v30  ;;  %v2544_v16 = vmul.f32 0.2, %v2401_v5  ;;  %v2405_v40 = vadd.f32 %v2404_v12, %v4516_v32  ;;  %2747 = vadd.xlane.f32.xlu0 %v2746_v41  ;;  %v2682_v52 = vmul.f32 %v4531_v2, %v2606_v17 }
 0x33e   :  { %v2406_v42 = vpop.f32.mrf.mxu0 }
 0x33f   :  { %v2608_v33 = vmax.f32 %v2401_v5, %v2544_v16  ;;  %v2545_v28 = vmul.f32 0.2, %v2405_v40  ;;  %v2407_v29 = vadd.f32 %v2406_v42, %v4519_v23  ;;  %v2749_v45 = vadd.f32 %v2682_v52, %v2681_v21 }
 0x340   :  { %v2408_v58 = vpop.f32.mrf.mxu0  ;;  %v2683_v6 = vmul.f32 %v4527_v19, %v2607_v7 }
 0x341   :  { %v2609_v4 = vmax.f32 %v2405_v40, %v2545_v28  ;;  %v2546_v43 = vmul.f32 0.2, %v2407_v29  ;;  %v2409_v25 = vadd.f32 %v2408_v58, %v4516_v32  ;;  %2750 = vadd.xlane.f32.xlu1 %v2749_v45  ;;  %v2684_v27 = vmul.f32 %v4531_v2, %v2608_v33 }
 0x342   :  { %v2410_v50 = vpop.f32.mrf.mxu0 }
 0x343   :  { %v2610_v47 = vmax.f32 %v2407_v29, %v2546_v43  ;;  %v2547_v48 = vmul.f32 0.2, %v2409_v25  ;;  %v2411_v35 = vadd.f32 %v2410_v50, %v4519_v23  ;;  %v2752_v57 = vadd.f32 %v2684_v27, %v2683_v6 }
 0x344   :  { %v2414_v9 = vpop.f32.mrf.mxu0  ;;  %v2685_v59 = vmul.f32 %v4527_v19, %v2609_v4 }
 0x345   :  { %v2611_v14 = vmax.f32 %v2409_v25, %v2547_v48  ;;  %v2548_v10 = vmul.f32 0.2, %v2411_v35  ;;  %v2415_v20 = vadd.f32 %v2414_v9, %v4516_v32  ;;  %2753 = vadd.xlane.f32.xlu0 %v2752_v57  ;;  %v2686_v53 = vmul.f32 %v4531_v2, %v2610_v47 }
 0x346   :  { %v2416_v36 = vpop.f32.mrf.mxu0 }
 0x347   :  { %v2612_v13 = vmax.f32 %v2411_v35, %v2548_v10  ;;  %v2549_v55 = vmul.f32 0.2, %v2415_v20  ;;  %v2417_v51 = vadd.f32 %v2416_v36, %v4519_v23  ;;  %v2755_v3 = vadd.f32 %v2686_v53, %v2685_v59 }
 0x348   :  { %v2418_v26 = vpop.f32.mrf.mxu0  ;;  %v2687_v38 = vmul.f32 %v4527_v19, %v2611_v14 }
 0x349   :  { %v2613_v8 = vmax.f32 %v2415_v20, %v2549_v55  ;;  %v2550_v11 = vmul.f32 0.2, %v2417_v51  ;;  %v2419_v44 = vadd.f32 %v2418_v26, %v4516_v32  ;;  %2756 = vadd.xlane.f32.xlu1 %v2755_v3  ;;  %v2688_v60 = vmul.f32 %v4531_v2, %v2612_v13 }
 0x34a   :  { %v2420_v63 = vpop.f32.mrf.mxu0 }
 0x34b   :  { %v2614_v62 = vmax.f32 %v2417_v51, %v2550_v11  ;;  %v2551_v37 = vmul.f32 0.2, %v2419_v44  ;;  %v2421_v24 = vadd.f32 %v2420_v63, %v4519_v23  ;;  %v2758_v61 = vadd.f32 %v2688_v60, %v2687_v38 }
 0x34c   :  { %v2424_v56 = vpop.f32.mrf.mxu0  ;;  %v2689_v49 = vmul.f32 %v4527_v19, %v2613_v8 }
 0x34d   :  { %v2615_v31 = vmax.f32 %v2419_v44, %v2551_v37  ;;  %v2552_v0 = vmul.f32 0.2, %v2421_v24  ;;  %v2425_v34 = vadd.f32 %v2424_v56, %v4516_v32  ;;  %2759 = vadd.xlane.f32.xlu0 %v2758_v61  ;;  %v2690_v15 = vmul.f32 %v4531_v2, %v2614_v62 }
 0x34e   :  { %v2426_v22 = vpop.f32.mrf.mxu0 }
 0x34f   :  { %v2616_v46 = vmax.f32 %v2421_v24, %v2552_v0  ;;  %v2553_v39 = vmul.f32 0.2, %v2425_v34  ;;  %v2427_v1 = vadd.f32 %v2426_v22, %v4519_v23  ;;  %v2761_v54 = vadd.f32 %v2690_v15, %v2689_v49 }
 0x350   :  { %v2428_v18 = vpop.f32.mrf.mxu0  ;;  %v2691_v17 = vmul.f32 %v4527_v19, %v2615_v31 }
 0x351   :  { %v2617_v30 = vmax.f32 %v2425_v34, %v2553_v39  ;;  %v2554_v5 = vmul.f32 0.2, %v2427_v1  ;;  %v2429_v41 = vadd.f32 %v2428_v18, %v4516_v32  ;;  %2762 = vadd.xlane.f32.xlu1 %v2761_v54  ;;  %v2692_v12 = vmul.f32 %v4531_v2, %v2616_v46 }
 0x352   :  { %v2430_v21 = vpop.f32.mrf.mxu0 }
 0x353   :  { %v2618_v7 = vmax.f32 %v2427_v1, %v2554_v5  ;;  %v2555_v16 = vmul.f32 0.2, %v2429_v41  ;;  %v2431_v40 = vadd.f32 %v2430_v21, %v4519_v23  ;;  %v2764_v52 = vadd.f32 %v2692_v12, %v2691_v17 }
 0x354   :  { %v2434_v42 = vpop.f32.mrf.mxu0  ;;  %v2693_v33 = vmul.f32 %v4527_v19, %v2617_v30 }
 0x355   :  { %v2619_v28 = vmax.f32 %v2429_v41, %v2555_v16  ;;  %v2556_v29 = vmul.f32 0.2, %v2431_v40  ;;  %v2435_v45 = vadd.f32 %v2434_v42, %v4516_v32  ;;  %2765 = vadd.xlane.f32.xlu0 %v2764_v52  ;;  %v2694_v58 = vmul.f32 %v4531_v2, %v2618_v7 }
 0x356   :  { %v2436_v6 = vpop.f32.mrf.mxu0 }
 0x357   :  { %v2620_v4 = vmax.f32 %v2431_v40, %v2556_v29  ;;  %v2557_v43 = vmul.f32 0.2, %v2435_v45  ;;  %v2437_v25 = vadd.f32 %v2436_v6, %v4519_v23  ;;  %v2767_v27 = vadd.f32 %v2694_v58, %v2693_v33 }
 0x358   :  { %v2438_v50 = vpop.f32.mrf.mxu0  ;;  %v2695_v47 = vmul.f32 %v4527_v19, %v2619_v28 }
 0x359   :  { %v2621_v48 = vmax.f32 %v2435_v45, %v2557_v43  ;;  %v2558_v35 = vmul.f32 0.2, %v2437_v25  ;;  %v2439_v57 = vadd.f32 %v2438_v50, %v4516_v32  ;;  %2768 = vadd.xlane.f32.xlu1 %v2767_v27  ;;  %v2696_v9 = vmul.f32 %v4531_v2, %v2620_v4 }
 0x35a   :  { %v2440_v59 = vpop.f32.mrf.mxu0 }
 0x35b   :  { %v2622_v14 = vmax.f32 %v2437_v25, %v2558_v35  ;;  %v2559_v10 = vmul.f32 0.2, %v2439_v57  ;;  %v2441_v20 = vadd.f32 %v2440_v59, %v4519_v23  ;;  %v2770_v53 = vadd.f32 %v2696_v9, %v2695_v47 }
 0x35c   :  { %v2444_v36 = vpop.f32.mrf.mxu0  ;;  %v2697_v13 = vmul.f32 %v4527_v19, %v2621_v48 }
 0x35d   :  { %v2623_v55 = vmax.f32 %v2439_v57, %v2559_v10  ;;  %v2560_v51 = vmul.f32 0.2, %v2441_v20  ;;  %v2445_v3 = vadd.f32 %v2444_v36, %v4516_v32  ;;  %2771 = vadd.xlane.f32.xlu0 %v2770_v53  ;;  %v2698_v26 = vmul.f32 %v4531_v2, %v2622_v14 }
 0x35e   :  { %v2446_v38 = vpop.f32.mrf.mxu0 }
 0x35f   :  { %v2624_v8 = vmax.f32 %v2441_v20, %v2560_v51  ;;  %v2561_v11 = vmul.f32 0.2, %v2445_v3  ;;  %v2447_v44 = vadd.f32 %v2446_v38, %v4519_v23  ;;  %v2773_v60 = vadd.f32 %v2698_v26, %v2697_v13 }
 0x360   :  { %v2448_v63 = vpop.f32.mrf.mxu0  ;;  %v2699_v62 = vmul.f32 %v4527_v19, %v2623_v55 }
 0x361   :  { %v2625_v37 = vmax.f32 %v2445_v3, %v2561_v11  ;;  %v2562_v24 = vmul.f32 0.2, %v2447_v44  ;;  %v2449_v61 = vadd.f32 %v2448_v63, %v4516_v32  ;;  %2774 = vadd.xlane.f32.xlu1 %v2773_v60  ;;  %v2700_v56 = vmul.f32 %v4531_v2, %v2624_v8 }
 0x362   :  { %v2450_v49 = vpop.f32.mrf.mxu0 }
 0x363   :  { %v2626_v31 = vmax.f32 %v2447_v44, %v2562_v24  ;;  %v2563_v0 = vmul.f32 0.2, %v2449_v61  ;;  %v2451_v34 = vadd.f32 %v2450_v49, %v4519_v23  ;;  %v2776_v15 = vadd.f32 %v2700_v56, %v2699_v62 }
 0x364   :  { %v2454_v22 = vpop.f32.mrf.mxu0  ;;  %v2701_v46 = vmul.f32 %v4527_v19, %v2625_v37 }
 0x365   :  { %v2627_v39 = vmax.f32 %v2449_v61, %v2563_v0  ;;  %v2564_v1 = vmul.f32 0.2, %v2451_v34  ;;  %v2455_v54 = vadd.f32 %v2454_v22, %v4516_v32  ;;  %2777 = vadd.xlane.f32.xlu0 %v2776_v15  ;;  %v2702_v18 = vmul.f32 %v4531_v2, %v2626_v31 }
 0x366   :  { %v2456_v17 = vpop.f32.mrf.mxu0 }
 0x367   :  { %v2628_v30 = vmax.f32 %v2451_v34, %v2564_v1  ;;  %v2565_v5 = vmul.f32 0.2, %v2455_v54  ;;  %v2457_v41 = vadd.f32 %v2456_v17, %v4519_v23  ;;  %v2779_v12 = vadd.f32 %v2702_v18, %v2701_v46 }
 0x368   :  { %v2458_v21 = vpop.f32.mrf.mxu0  ;;  %v2703_v7 = vmul.f32 %v4527_v19, %v2627_v39 }
 0x369   :  { %v2629_v16 = vmax.f32 %v2455_v54, %v2565_v5  ;;  %v2566_v40 = vmul.f32 0.2, %v2457_v41  ;;  %v2459_v52 = vadd.f32 %v2458_v21, %v4516_v32  ;;  %2780 = vadd.xlane.f32.xlu1 %v2779_v12  ;;  %v2704_v42 = vmul.f32 %v4531_v2, %v2628_v30 }
 0x36a   :  { %v2460_v33 = vpop.f32.mrf.mxu0 }
 0x36b   :  { %v2630_v28 = vmax.f32 %v2457_v41, %v2566_v40  ;;  %v2567_v29 = vmul.f32 0.2, %v2459_v52  ;;  %v2461_v45 = vadd.f32 %v2460_v33, %v4519_v23  ;;  %v2782_v58 = vadd.f32 %v2704_v42, %v2703_v7 }
 0x36c   :  { %v2464_v6 = vpop.f32.mrf.mxu0  ;;  %v2705_v4 = vmul.f32 %v4527_v19, %v2629_v16 }
 0x36d   :  { %v2631_v43 = vmax.f32 %v2459_v52, %v2567_v29  ;;  %v2568_v25 = vmul.f32 0.2, %v2461_v45  ;;  %v2465_v27 = vadd.f32 %v2464_v6, %v4516_v32  ;;  %2783 = vadd.xlane.f32.xlu0 %v2782_v58  ;;  %v2706_v50 = vmul.f32 %v4531_v2, %v2630_v28 }
 0x36e   :  { %v2466_v47 = vpop.f32.mrf.mxu0 }
 0x36f   :  { %v2632_v48 = vmax.f32 %v2461_v45, %v2568_v25  ;;  %v2569_v35 = vmul.f32 0.2, %v2465_v27  ;;  %v2467_v57 = vadd.f32 %v2466_v47, %v4519_v23  ;;  %v2785_v9 = vadd.f32 %v2706_v50, %v2705_v4 }
 0x370   :  { %v2468_v59 = vpop.f32.mrf.mxu0  ;;  %v2707_v14 = vmul.f32 %v4527_v19, %v2631_v43 }
 0x371   :  { %v2633_v10 = vmax.f32 %v2465_v27, %v2569_v35  ;;  %v2570_v20 = vmul.f32 0.2, %v2467_v57  ;;  %v2469_v53 = vadd.f32 %v2468_v59, %v4516_v32  ;;  %2786 = vadd.xlane.f32.xlu1 %v2785_v9  ;;  %v2708_v36 = vmul.f32 %v4531_v2, %v2632_v48 }
 0x372   :  { %v2470_v13 = vpop.f32.mrf.mxu0 }
 0x373   :  { %v2634_v55 = vmax.f32 %v2467_v57, %v2570_v20  ;;  %v2571_v51 = vmul.f32 0.2, %v2469_v53  ;;  %v2471_v3 = vadd.f32 %v2470_v13, %v4519_v23  ;;  %v2788_v26 = vadd.f32 %v2708_v36, %v2707_v14 }
 0x374   :  { %v2474_v38 = vpop.f32.mrf.mxu0  ;;  %v2709_v8 = vmul.f32 %v4527_v19, %v2633_v10 }
 0x375   :  { %v2635_v11 = vmax.f32 %v2469_v53, %v2571_v51  ;;  %v2572_v44 = vmul.f32 0.2, %v2471_v3  ;;  %v2475_v60 = vadd.f32 %v2474_v38, %v4516_v32  ;;  %2789 = vadd.xlane.f32.xlu0 %v2788_v26  ;;  %v2710_v63 = vmul.f32 %v4531_v2, %v2634_v55 }
 0x376   :  { %v2476_v62 = vpop.f32.mrf.mxu0 }
 0x377   :  { %v2636_v37 = vmax.f32 %v2471_v3, %v2572_v44  ;;  %v2573_v24 = vmul.f32 0.2, %v2475_v60  ;;  %v2477_v61 = vadd.f32 %v2476_v62, %v4519_v23  ;;  %v2791_v56 = vadd.f32 %v2710_v63, %v2709_v8 }
 0x378   :  { %v2478_v49 = vpop.f32.mrf.mxu0  ;;  %v2711_v31 = vmul.f32 %v4527_v19, %v2635_v11 }
 0x379   :  { %v2637_v0 = vmax.f32 %v2475_v60, %v2573_v24  ;;  %v2574_v34 = vmul.f32 0.2, %v2477_v61  ;;  %v2479_v15 = vadd.f32 %v2478_v49, %v4516_v32  ;;  %2792 = vadd.xlane.f32.xlu1 %v2791_v56  ;;  %v2712_v22 = vmul.f32 %v4531_v2, %v2636_v37 }
 0x37a   :  { %v2480_v46 = vpop.f32.mrf.mxu0 }
 0x37b   :  { %v2638_v39 = vmax.f32 %v2477_v61, %v2574_v34  ;;  %v2575_v1 = vmul.f32 0.2, %v2479_v15  ;;  %v2481_v54 = vadd.f32 %v2480_v46, %v4519_v23  ;;  %v2794_v18 = vadd.f32 %v2712_v22, %v2711_v31 }
 0x37c   :  { %v2484_v17 = vpop.f32.mrf.mxu0  ;;  %v2713_v30 = vmul.f32 %v4527_v19, %v2637_v0 }
 0x37d   :  { %v2639_v5 = vmax.f32 %v2479_v15, %v2575_v1  ;;  %v2576_v41 = vmul.f32 0.2, %v2481_v54  ;;  %v2485_v12 = vadd.f32 %v2484_v17, %v4516_v32  ;;  %2795 = vadd.xlane.f32.xlu0 %v2794_v18  ;;  %v2714_v21 = vmul.f32 %v4531_v2, %v2638_v39 }
 0x37e   :  { %v2486_v7 = vpop.f32.mrf.mxu0 }
 0x37f   :  { %v2640_v16 = vmax.f32 %v2481_v54, %v2576_v41  ;;  %v2577_v40 = vmul.f32 0.2, %v2485_v12  ;;  %v2487_v52 = vadd.f32 %v2486_v7, %v4519_v23  ;;  %v2797_v42 = vadd.f32 %v2714_v21, %v2713_v30 }
 0x380   :  { %v2488_v33 = vpop.f32.mrf.mxu0  ;;  %v2715_v28 = vmul.f32 %v4527_v19, %v2639_v5 }
 0x381   :  { %v2641_v29 = vmax.f32 %v2485_v12, %v2577_v40  ;;  %v2578_v45 = vmul.f32 0.2, %v2487_v52  ;;  %v2489_v58 = vadd.f32 %v2488_v33, %v4516_v32  ;;  %2798 = vadd.xlane.f32.xlu1 %v2797_v42  ;;  %v2716_v6 = vmul.f32 %v4531_v2, %v2640_v16 }
 0x382   :  { %v2490_v4 = vpop.f32.mrf.mxu0 }
 0x383   :  { %v2642_v43 = vmax.f32 %v2487_v52, %v2578_v45  ;;  %v2579_v25 = vmul.f32 0.2, %v2489_v58  ;;  %v2491_v27 = vadd.f32 %v2490_v4, %v4519_v23  ;;  %v2800_v50 = vadd.f32 %v2716_v6, %v2715_v28 }
 0x384   :  { %v2494_v47 = vpop.f32.mrf.mxu0  ;;  %v2717_v48 = vmul.f32 %v4527_v19, %v2641_v29 }
 0x385   :  { %v2643_v35 = vmax.f32 %v2489_v58, %v2579_v25  ;;  %v2580_v57 = vmul.f32 0.2, %v2491_v27  ;;  %v2495_v9 = vadd.f32 %v2494_v47, %v4516_v32  ;;  %2801 = vadd.xlane.f32.xlu0 %v2800_v50  ;;  %v2718_v59 = vmul.f32 %v4531_v2, %v2642_v43 }
 0x386   :  { %v2496_v14 = vpop.f32.mrf.mxu0 }
 0x387   :  { %v2644_v10 = vmax.f32 %v2491_v27, %v2580_v57  ;;  %v2581_v20 = vmul.f32 0.2, %v2495_v9  ;;  %v2497_v53 = vadd.f32 %v2496_v14, %v4519_v23  ;;  %v2803_v36 = vadd.f32 %v2718_v59, %v2717_v48 }
 0x388   :  { %v2498_v13 = vpop.f32.mrf.mxu0  ;;  %v2719_v55 = vmul.f32 %v4527_v19, %v2643_v35 }
 0x389   :  { %v2645_v51 = vmax.f32 %v2495_v9, %v2581_v20  ;;  %v2582_v3 = vmul.f32 0.2, %v2497_v53  ;;  %v2499_v26 = vadd.f32 %v2498_v13, %v4516_v32  ;;  %2804 = vadd.xlane.f32.xlu1 %v2803_v36  ;;  %v2720_v38 = vmul.f32 %v4531_v2, %v2644_v10 }
 0x38a   :  { %v2500_v8 = vpop.f32.mrf.mxu0 }
 0x38b   :  { %v2646_v11 = vmax.f32 %v2497_v53, %v2582_v3  ;;  %v2583_v44 = vmul.f32 0.2, %v2499_v26  ;;  %v2501_v60 = vadd.f32 %v2500_v8, %v4519_v23  ;;  %v2806_v63 = vadd.f32 %v2720_v38, %v2719_v55 }
 0x38c   :  { %v2504_v62 = vpop.f32.mrf.mxu0  ;;  %v2721_v37 = vmul.f32 %v4527_v19, %v2645_v51 }
 0x38d   :  { %v2647_v24 = vmax.f32 %v2499_v26, %v2583_v44  ;;  %v2584_v61 = vmul.f32 0.2, %v2501_v60  ;;  %v2505_v56 = vadd.f32 %v2504_v62, %v4516_v32  ;;  %2807 = vadd.xlane.f32.xlu0 %v2806_v63  ;;  %v2722_v49 = vmul.f32 %v4531_v2, %v2646_v11 }
 0x38e   :  { %v2506_v31 = vpop.f32.mrf.mxu0 }
 0x38f   :  { %v2648_v0 = vmax.f32 %v2501_v60, %v2584_v61  ;;  %v2585_v34 = vmul.f32 0.2, %v2505_v56  ;;  %v2507_v15 = vadd.f32 %v2506_v31, %v4519_v23  ;;  %v2809_v22 = vadd.f32 %v2722_v49, %v2721_v37 }
 0x390   :  { %v2508_v46 = vpop.f32.mrf.mxu0  ;;  %v2723_v39 = vmul.f32 %v4527_v19, %v2647_v24 }
 0x391   :  { %v2649_v1 = vmax.f32 %v2505_v56, %v2585_v34  ;;  %v2586_v54 = vmul.f32 0.2, %v2507_v15  ;;  %v2509_v18 = vadd.f32 %v2508_v46, %v4516_v32  ;;  %2810 = vadd.xlane.f32.xlu1 %v2809_v22  ;;  %v2724_v17 = vmul.f32 %v4531_v2, %v2648_v0 }
 0x392   :  { %v2510_v30 = vpop.f32.mrf.mxu0 }
 0x393   :  { %v2650_v5 = vmax.f32 %v2507_v15, %v2586_v54  ;;  %v2587_v41 = vmul.f32 0.2, %v2509_v18  ;;  %v2511_v12 = vadd.f32 %v2510_v30, %v4519_v23  ;;  %v2812_v21 = vadd.f32 %v2724_v17, %v2723_v39  ;;  %v4661_v54 = vld [vmem:[#allocation3] ss:$0 sm:$0xff] }
 0x394   :  { %v2514_v7 = vpop.f32.mrf.mxu0  ;;  %v2725_v16 = vmul.f32 %v4527_v19, %v2649_v1 }
 0x395   :  { %v2651_v40 = vmax.f32 %v2509_v18, %v2587_v41  ;;  %v2588_v52 = vmul.f32 0.2, %v2511_v12  ;;  %v2515_v42 = vadd.f32 %v2514_v7, %v4516_v32  ;;  %2813 = vadd.xlane.f32.xlu0 %v2812_v21  ;;  %v2726_v33 = vmul.f32 %v4531_v2, %v2650_v5 }
 0x396   :  { %v2516_v28 = vpop.f32.mrf.mxu0 }
 0x397   :  { %v2652_v29 = vmax.f32 %v2511_v12, %v2588_v52  ;;  %v2589_v45 = vmul.f32 0.2, %v2515_v42  ;;  %v2517_v58 = vadd.f32 %v2516_v28, %v4519_v23  ;;  %v2815_v6 = vadd.f32 %v2726_v33, %v2725_v16 }
 0x398   :  { %v2518_v4 = vpop.f32.mrf.mxu0  ;;  %v2727_v43 = vmul.f32 %v4527_v19, %v2651_v40 }
 0x399   :  { %v2653_v25 = vmax.f32 %v2515_v42, %v2589_v45  ;;  %v2590_v27 = vmul.f32 0.2, %v2517_v58  ;;  %v2519_v50 = vadd.f32 %v2518_v4, %v4516_v32  ;;  %2816 = vadd.xlane.f32.xlu1 %v2815_v6  ;;  %v2728_v47 = vmul.f32 %v4531_v2, %v2652_v29 }
 0x39a   :  { %v2520_v48 = vpop.f32.mrf.mxu0 }
 0x39b   :  { %v2654_v35 = vmax.f32 %v2517_v58, %v2590_v27  ;;  %v2591_v57 = vmul.f32 0.2, %v2519_v50  ;;  %v2521_v9 = vadd.f32 %v2520_v48, %v4519_v23  ;;  %v2818_v59 = vadd.f32 %v2728_v47, %v2727_v43 }
 0x39c   :  { %v2524_v14 = vpop.f32.mrf.mxu0  ;;  %v2729_v10 = vmul.f32 %v4527_v19, %v2653_v25 }
 0x39d   :  { %v2655_v20 = vmax.f32 %v2519_v50, %v2591_v57  ;;  %v2592_v53 = vmul.f32 0.2, %v2521_v9  ;;  %v2525_v36 = vadd.f32 %v2524_v14, %v4516_v32  ;;  %2819 = vadd.xlane.f32.xlu0 %v2818_v59  ;;  %v2730_v13 = vmul.f32 %v4531_v2, %v2654_v35 }
 0x39e   :  { %v2526_v55 = vpop.f32.mrf.mxu0 }
 0x39f   :  { %v2656_v51 = vmax.f32 %v2521_v9, %v2592_v53  ;;  %v2593_v3 = vmul.f32 0.2, %v2525_v36  ;;  %v2527_v26 = vadd.f32 %v2526_v55, %v4519_v23  ;;  %v2821_v38 = vadd.f32 %v2730_v13, %v2729_v10 }
 0x3a0   :  { %v2528_v8 = vpop.f32.mrf.mxu0  ;;  %v2731_v11 = vmul.f32 %v4527_v19, %v2655_v20 }
 0x3a1   :  { %v2657_v44 = vmax.f32 %v2525_v36, %v2593_v3  ;;  %v2594_v60 = vmul.f32 0.2, %v2527_v26  ;;  %v2529_v63 = vadd.f32 %v2528_v8, %v4516_v32  ;;  %2822 = vadd.xlane.f32.xlu1 %v2821_v38  ;;  %v2732_v62 = vmul.f32 %v4531_v2, %v2656_v51 }
 0x3a2   :  { %v2530_v37 = vpop.f32.mrf.mxu0 }
 0x3a3   :  { %v2658_v24 = vmax.f32 %v2527_v26, %v2594_v60  ;;  %v2595_v61 = vmul.f32 0.2, %v2529_v63  ;;  %v2531_v56 = vadd.f32 %v2530_v37, %v4519_v23  ;;  %v2824_v49 = vadd.f32 %v2732_v62, %v2731_v11 }
 0x3a4   :  { %v2733_v34 = vmul.f32 %v4527_v19, %v2657_v44 }
 0x3a5   :  { %v2659_v31 = vmax.f32 %v2529_v63, %v2595_v61  ;;  %v2596_v0 = vmul.f32 0.2, %v2531_v56  ;;  %2825 = vadd.xlane.f32.xlu0 %v2824_v49  ;;  %v2734_v15 = vmul.f32 %v4531_v2, %v2658_v24 }
 0x3a7   :  { %v2660_v22 = vmax.f32 %v2531_v56, %v2596_v0  ;;  %v2827_v46 = vadd.f32 %v2734_v15, %v2733_v34  ;;  %v2735_v32 = vmul.f32 %v4527_v19, %v2659_v31 }
 0x3a9   :  { %2828 = vadd.xlane.f32.xlu1 %v2827_v46  ;;  %v2736_v39 = vmul.f32 %v4531_v2, %v2660_v22 }
 0x3ab   :  { %v2830_v1 = vadd.f32 %v2736_v39, %v2735_v32 }
 0x3ad   :  { %2831 = vadd.xlane.f32.xlu0 %v2830_v1 }
 0x3ba   :  { %v2739_v23 = vpop.xlane.xlu0 %2738 }
 0x3bb   :  { %v2840_v18 = vadd.f32 %v4661_v54, %v2739_v23 }
 0x3bd   :  { %2873 = vst.msk [vmem:[%s4833_s10] sm:$0xff] %vm2872_vm4, %v2840_v18 }
 0x3be   :  { %v2742_v17 = vpop.xlane.xlu1 %2741 }
 0x3bf   :  { %v2841_v30 = vadd.f32 %v4661_v54, %v2742_v17 }
 0x3c1   :  { %2874 = vst.msk [vmem:[%s4833_s10 + $0x8] sm:$0xff] %vm2872_vm4, %v2841_v30 }
 0x3c2   :  { %v2745_v19 = vpop.xlane.xlu0 %2744 }
 0x3c3   :  { %v2842_v2 = vadd.f32 %v4661_v54, %v2745_v19 }
 0x3c5   :  { %2875 = vst.msk [vmem:[%s4833_s10 + $0x10] sm:$0xff] %vm2872_vm4, %v2842_v2 }
 0x3c6   :  { %v2748_v5 = vpop.xlane.xlu0 %2747 }
 0x3c7   :  { %v2843_v41 = vadd.f32 %v4661_v54, %v2748_v5 }
 0x3c9   :  { %2876 = vst.msk [vmem:[%s4833_s10 + $0x18] sm:$0xff] %vm2872_vm4, %v2843_v41 }
 0x3ca   :  { %v2751_v12 = vpop.xlane.xlu1 %2750 }
 0x3cb   :  { %v2844_v21 = vadd.f32 %v4661_v54, %v2751_v12 }
 0x3cd   :  { %2877 = vst.msk [vmem:[%s4833_s10 + $0x20] sm:$0xff] %vm2872_vm4, %v2844_v21 }
 0x3ce   :  { %v2754_v7 = vpop.xlane.xlu0 %2753 }
 0x3cf   :  { %v2845_v16 = vadd.f32 %v4661_v54, %v2754_v7 }
 0x3d1   :  { %2878 = vst.msk [vmem:[%s4833_s10 + $0x28] sm:$0xff] %vm2872_vm4, %v2845_v16 }
 0x3d2   :  { %v2757_v40 = vpop.xlane.xlu1 %2756 }
 0x3d3   :  { %v2846_v52 = vadd.f32 %v4661_v54, %v2757_v40 }
 0x3d5   :  { %2879 = vst.msk [vmem:[%s4833_s10 + $0x30] sm:$0xff] %vm2872_vm4, %v2846_v52 }
 0x3d6   :  { %v2760_v42 = vpop.xlane.xlu0 %2759 }
 0x3d7   :  { %v2847_v33 = vadd.f32 %v4661_v54, %v2760_v42 }
 0x3d9   :  { %2880 = vst.msk [vmem:[%s4833_s10 + $0x38] sm:$0xff] %vm2872_vm4, %v2847_v33 }
 0x3da   :  { %v2763_v28 = vpop.xlane.xlu1 %2762 }
 0x3db   :  { %v2848_v29 = vadd.f32 %v4661_v54, %v2763_v28 }
 0x3dd   :  { %2881 = vst.msk [vmem:[%s4833_s10 + $0x40] sm:$0xff] %vm2872_vm4, %v2848_v29 }
 0x3de   :  { %v2766_v45 = vpop.xlane.xlu0 %2765 }
 0x3df   :  { %v2849_v58 = vadd.f32 %v4661_v54, %v2766_v45 }
 0x3e1   :  { %2882 = vst.msk [vmem:[%s4833_s10 + $0x48] sm:$0xff] %vm2872_vm4, %v2849_v58 }
 0x3e2   :  { %v2769_v6 = vpop.xlane.xlu1 %2768 }
 0x3e3   :  { %v2850_v4 = vadd.f32 %v4661_v54, %v2769_v6 }
 0x3e5   :  { %2883 = vst.msk [vmem:[%s4833_s10 + $0x50] sm:$0xff] %vm2872_vm4, %v2850_v4 }
 0x3e6   :  { %v2772_v43 = vpop.xlane.xlu0 %2771 }
 0x3e7   :  { %v2851_v25 = vadd.f32 %v4661_v54, %v2772_v43 }
 0x3e9   :  { %2884 = vst.msk [vmem:[%s4833_s10 + $0x58] sm:$0xff] %vm2872_vm4, %v2851_v25 }
 0x3ea   :  { %v2775_v27 = vpop.xlane.xlu1 %2774 }
 0x3eb   :  { %v2852_v50 = vadd.f32 %v4661_v54, %v2775_v27 }
 0x3ed   :  { %2885 = vst.msk [vmem:[%s4833_s10 + $0x60] sm:$0xff] %vm2872_vm4, %v2852_v50 }
 0x3ee   :  { %v2778_v47 = vpop.xlane.xlu0 %2777 }
 0x3ef   :  { %v2853_v48 = vadd.f32 %v4661_v54, %v2778_v47 }
 0x3f1   :  { %2886 = vst.msk [vmem:[%s4833_s10 + $0x68] sm:$0xff] %vm2872_vm4, %v2853_v48 }
 0x3f2   :  { %v2781_v35 = vpop.xlane.xlu1 %2780 }
 0x3f3   :  { %v2854_v57 = vadd.f32 %v4661_v54, %v2781_v35 }
 0x3f5   :  { %2887 = vst.msk [vmem:[%s4833_s10 + $0x70] sm:$0xff] %vm2872_vm4, %v2854_v57 }
 0x3f6   :  { %v2784_v9 = vpop.xlane.xlu0 %2783 }
 0x3f7   :  { %v2855_v59 = vadd.f32 %v4661_v54, %v2784_v9 }
 0x3f9   :  { %2888 = vst.msk [vmem:[%s4833_s10 + $0x78] sm:$0xff] %vm2872_vm4, %v2855_v59 }
 0x3fa   :  { %v2787_v14 = vpop.xlane.xlu1 %2786 }
 0x3fb   :  { %v2856_v10 = vadd.f32 %v4661_v54, %v2787_v14 }
 0x3fd   :  { %2889 = vst.msk [vmem:[%s4833_s10 + $0x80] sm:$0xff] %vm2872_vm4, %v2856_v10 }
 0x3fe   :  { %v2790_v20 = vpop.xlane.xlu0 %2789 }
 0x3ff   :  { %v2857_v53 = vadd.f32 %v4661_v54, %v2790_v20 }
 0x401   :  { %2890 = vst.msk [vmem:[%s4833_s10 + $0x88] sm:$0xff] %vm2872_vm4, %v2857_v53 }
 0x402   :  { %v2793_v36 = vpop.xlane.xlu1 %2792 }
 0x403   :  { %v2858_v13 = vadd.f32 %v4661_v54, %v2793_v36 }
 0x405   :  { %2891 = vst.msk [vmem:[%s4833_s10 + $0x90] sm:$0xff] %vm2872_vm4, %v2858_v13 }
 0x406   :  { %v2796_v55 = vpop.xlane.xlu0 %2795 }
 0x407   :  { %v2859_v51 = vadd.f32 %v4661_v54, %v2796_v55 }
 0x409   :  { %2892 = vst.msk [vmem:[%s4833_s10 + $0x98] sm:$0xff] %vm2872_vm4, %v2859_v51 }
 0x40a   :  { %v2799_v3 = vpop.xlane.xlu1 %2798 }
 0x40b   :  { %v2860_v26 = vadd.f32 %v4661_v54, %v2799_v3 }
 0x40d   :  { %2893 = vst.msk [vmem:[%s4833_s10 + $0xa0] sm:$0xff] %vm2872_vm4, %v2860_v26 }
 0x40e   :  { %v2802_v38 = vpop.xlane.xlu0 %2801 }
 0x40f   :  { %v2861_v8 = vadd.f32 %v4661_v54, %v2802_v38 }
 0x411   :  { %2894 = vst.msk [vmem:[%s4833_s10 + $0xa8] sm:$0xff] %vm2872_vm4, %v2861_v8 }
 0x412   :  { %v2805_v11 = vpop.xlane.xlu1 %2804 }
 0x413   :  { %v2862_v44 = vadd.f32 %v4661_v54, %v2805_v11 }
 0x415   :  { %2895 = vst.msk [vmem:[%s4833_s10 + $0xb0] sm:$0xff] %vm2872_vm4, %v2862_v44 }
 0x416   :  { %v2808_v60 = vpop.xlane.xlu0 %2807 }
 0x417   :  { %v2863_v63 = vadd.f32 %v4661_v54, %v2808_v60 }
 0x419   :  { %2896 = vst.msk [vmem:[%s4833_s10 + $0xb8] sm:$0xff] %vm2872_vm4, %v2863_v63 }
 0x41a   :  { %v2811_v62 = vpop.xlane.xlu1 %2810 }
 0x41b   :  { %v2864_v37 = vadd.f32 %v4661_v54, %v2811_v62 }
 0x41d   :  { %2897 = vst.msk [vmem:[%s4833_s10 + $0xc0] sm:$0xff] %vm2872_vm4, %v2864_v37 }
 0x41e   :  { %v2814_v24 = vpop.xlane.xlu0 %2813 }
 0x41f   :  { %v2865_v61 = vadd.f32 %v4661_v54, %v2814_v24 }
 0x421   :  { %2898 = vst.msk [vmem:[%s4833_s10 + $0xc8] sm:$0xff] %vm2872_vm4, %v2865_v61 }
 0x422   :  { %v2817_v56 = vpop.xlane.xlu1 %2816 }
 0x423   :  { %v2866_v49 = vadd.f32 %v4661_v54, %v2817_v56 }
 0x425   :  { %2899 = vst.msk [vmem:[%s4833_s10 + $0xd0] sm:$0xff] %vm2872_vm4, %v2866_v49 }
 0x426   :  { %v2820_v31 = vpop.xlane.xlu0 %2819 }
 0x427   :  { %v2867_v0 = vadd.f32 %v4661_v54, %v2820_v31 }
 0x429   :  { %2900 = vst.msk [vmem:[%s4833_s10 + $0xd8] sm:$0xff] %vm2872_vm4, %v2867_v0 }
 0x42a   :  { %v2823_v34 = vpop.xlane.xlu1 %2822 }
 0x42b   :  { %v2868_v15 = vadd.f32 %v4661_v54, %v2823_v34 }
 0x42d   :  { %2901 = vst.msk [vmem:[%s4833_s10 + $0xe0] sm:$0xff] %vm2872_vm4, %v2868_v15 }
 0x42e   :  { %v2826_v22 = vpop.xlane.xlu0 %2825 }
 0x42f   :  { %v2869_v46 = vadd.f32 %v4661_v54, %v2826_v22 }
 0x431   :  { %2902 = vst.msk [vmem:[%s4833_s10 + $0xe8] sm:$0xff] %vm2872_vm4, %v2869_v46 }
 0x432   :  { %v2829_v32 = vpop.xlane.xlu1 %2828 }
 0x433   :  { %v2870_v39 = vadd.f32 %v4661_v54, %v2829_v32 }
 0x435   :  { %2903 = vst.msk [vmem:[%s4833_s10 + $0xf0] sm:$0xff] %vm2872_vm4, %v2870_v39 }
 0x436   :  { %v2832_v1 = vpop.xlane.xlu0 %2831 }
 0x437   :  { %v2871_v23 = vadd.f32 %v4661_v54, %v2832_v1 }
 0x439   :  { %2904 = vst.msk [vmem:[%s4833_s10 + $0xf8] sm:$0xff] %vm2872_vm4, %v2871_v23 }

</bundles_post_ra>
